<compile_context>
chip_gen: v7x
topology: tpu7x:2x2x1
jax: 0.10.0
libtpu: 0.0.40
codegen_flags: <defaults>
</compile_context>

<pallas_src>
import jax
import jax.numpy as jnp
from jax import lax
from jax.experimental import pallas as pl
from jax.experimental.pallas import tpu as pltpu

MAX_FACES       = 15          # maxFaces in the reference
MAX_FACES_PAD   = 16          # padded (sublane-friendly); padded face is always masked
GLOBAL_FEAT     = 2208        # DenseNet161 feature channels
GLOBAL_FEAT_PAD = 2304        # 18 * 128 (lane-aligned feature chunks)
FEAT_CHUNK      = 256         # per-chunk feature width (2 lane groups)
N_CHUNKS        = GLOBAL_FEAT_PAD // FEAT_CHUNK   # 9
HIDDEN          = 256
ATT_HIDDEN      = 64
NUM_CLASSES     = 3
NUM_CLASSES_PAD = 128         # lane-dense output
IMG_C           = 3           # RGB input to the backbone stand-in
IMG_C_PAD       = 128         # dense lane-padded channel count (zeros; math-identical)
IMG_HW          = 7           # backbone stand-in emits a 7x7 map (avg_pool2d kernel_size=7)
IMG_P           = IMG_HW * IMG_HW   # 49 spatial positions
IMG_P_PAD       = 56          # 7*8, sublane-friendly position count (7 zero-padded positions)
FACE_DIM        = 32          # raw per-face feature dim consumed by the non_align stand-in
BN_EPS          = 1e-5
MASK_NEG        = -1e30       # finite "minus infinity" (avoids NaN for zero-face rows)


def _round_up(x, m):
    return ((x + m - 1) // m) * m


def _face_attention_kernel(
    img_ref,     # (TB*56, 128)               bf16  flattened, zero-padded NHWC image tile
    face_ref,    # (TB*16, FACE_DIM)          bf16  flattened per-face features tile
    mask_ref,    # (TB, 16)                   f32   0 / MASK_NEG additive mask
    wb_ref,      # (N_CHUNKS, 128, FEAT_CHUNK)    bf16  backbone 1x1-conv stand-in (chunked)
    bb_ref,      # (N_CHUNKS, 1, FEAT_CHUNK)      f32   backbone bias (chunked)
    wmain_ref,   # (N_CHUNKS, FEAT_CHUNK, 256)    bf16  global_fc_main (1/49 folded, chunked)
    bmain_ref,   # (1, 256)                   f32   bias (incl. padded-position correction)
    wna_ref,     # (FACE_DIM, 256)            bf16  non_align_model stand-in
    bna_ref,     # (1, 256)                   f32
    wsc_ref,     # (1, FACE_DIM)              f32   attention scores folded to raw face feats
    bsc_ref,     # (1, 1)                     f32
    wfc3_ref,    # (512, 128)                 bf16  global_fc3_debug (BN folded, classes padded)
    bfc3_ref,    # (1, 128)                   f32
    out_ref,     # (TB, 128)                  f32
):
    f32 = jnp.float32
    bf16 = jnp.bfloat16
    TB = out_ref.shape[0]

    # ---------------- global branch ----------------
    # TODO(synk): DenseNet161 backbone replaced by a deterministic 1x1-conv (linear) stand-in.
    img = img_ref[...]                                                   # (TB*56, 128) bf16

    def chunk_step(c, gacc):
        # relu(backbone) for one 256-wide slice of the (padded) 2304 feature channels
        feats = jnp.maximum(
            jnp.dot(img, wb_ref[c], preferred_element_type=f32) + bb_ref[c],
            0.0)                                                         # (TB*56, 256) f32
        # avg_pool2d(kernel=7): per-sample sum over the 56 padded positions (sublane reduce);
        # the 1/49 scale is folded into wmain and the 7 zero-padded positions' relu(bb)
        # contribution is subtracted from bmain on the host (exact).
        g = jnp.sum(feats.reshape(TB, IMG_P_PAD, FEAT_CHUNK), axis=1)    # (TB, 256) f32
        return gacc + jnp.dot(g.astype(bf16), wmain_ref[c], preferred_element_type=f32)

    gfeat = lax.fori_loop(0, N_CHUNKS, chunk_step,
                          jnp.zeros((TB, HIDDEN), f32)) + bmain_ref[...]  # global_fc_main -> (TB,256)

    # ---------------- face branch ----------------
    # TODO(synk): non_align_model replaced by a deterministic linear stand-in (labels ignored).
    faces = face_ref[...]                                                # (TB*16, 32) bf16
    ff = (jnp.dot(faces, wna_ref[...], preferred_element_type=f32)
          + bna_ref[...]).reshape(TB, MAX_FACES_PAD, HIDDEN)             # (TB, 16, 256) f32

    # attentionfc2(attentionfc1(non_align(x))) folded down to the raw face features (exact here:
    # the stand-in is linear and no nonlinearity sits between those layers; dropout = id in eval).
    scores = (jnp.sum(faces.astype(f32).reshape(TB, MAX_FACES_PAD, FACE_DIM)
                      * wsc_ref[...][None], axis=-1)
              + bsc_ref[...])                                            # (TB, 16)

    # ---------------- masked softmax over faces ----------------
    scores = scores + mask_ref[...]                                      # finite everywhere
    m = jnp.max(scores, axis=-1, keepdims=True)
    e = jnp.exp(scores - m)
    w = e / jnp.sum(e, axis=-1, keepdims=True)
    # rows with min(numberFaces, maxFaces) == 0 get all-zero attention weights (as in the torch loop);
    # "first face masked" <=> zero faces, so no separate flag operand is needed.
    zero_row = mask_ref[:, 0:1] < (0.5 * MASK_NEG)
    w = jnp.where(zero_row, 0.0, w)                                      # (TB, 16)

    # bmm((TB,1,16), (TB,16,256)) -> (TB, 256)
    attended = jnp.sum(w[:, :, None] * ff, axis=1)

    # BatchNorm1d(256, affine=False, eval, default stats) scale 1/sqrt(1+eps) folded into wfc3.
    # torch.cat((face, global), dim=1) @ W_fc3^T + b  ==  split-dot (avoids in-kernel concat).
    out_ref[...] = (
        jnp.dot(attended.astype(bf16), wfc3_ref[0:HIDDEN, :], preferred_element_type=f32)
        + jnp.dot(gfeat.astype(bf16), wfc3_ref[HIDDEN:2 * HIDDEN, :], preferred_element_type=f32)
        + bfc3_ref[...]
    )


def _fold_params(params):
    """Host-side algebraic folding / padding (exact): fc1∘fc2 (and through the linear non_align
    stand-in), BatchNorm scale, 1/49 avg-pool, zero-padding of channel/feature/class dims."""
    f32, bf16 = jnp.float32, jnp.bfloat16
    pad_f = GLOBAL_FEAT_PAD - GLOBAL_FEAT

    # backbone stand-in, padded: channels 3->128, feature columns 2208->2304 (zeros, math-identical)
    wb = jnp.pad(params['wb'].astype(f32), ((0, IMG_C_PAD - IMG_C), (0, pad_f)))   # (128, 2304)
    bb = jnp.pad(params['bb'].astype(f32), ((0, 0), (0, pad_f)))                   # (1, 2304)

    # global_fc_main with the avg-pool 1/49 folded in; feature rows zero-padded to 2304
    wmain = jnp.pad(params['wmain'].astype(f32), ((0, pad_f), (0, 0))) / float(IMG_P)   # (2304, 256)
    # each of the 7 zero-padded spatial positions contributes relu(bb) to the in-kernel position
    # sum; subtract that constant here so the kernel result is exact.
    bmain = params['bmain'] - (IMG_P_PAD - IMG_P) * jnp.dot(jnp.maximum(bb, 0.0), wmain)

    # attentionfc2 ∘ attentionfc1 (no nonlinearity between them) ...
    w_att = jnp.dot(params['watt1'], params['watt2'].T)                        # (256, 1)
    b_att = jnp.dot(params['batt1'], params['watt2'].T) + params['batt2']      # (1, 1)
    # ... folded further through the linear non_align stand-in (exact for the stand-in only).
    w_score = jnp.dot(params['wna'], w_att)                                    # (FACE_DIM, 1)
    b_score = jnp.dot(params['bna'], w_att) + b_att                            # (1, 1)

    # BatchNorm1d(affine=False, eval, default stats): scale folded into fc3; classes padded 3->128
    inv_bn = 1.0 / jnp.sqrt(jnp.float32(1.0 + BN_EPS))
    wfc3 = jnp.pad(params['wfc3'] * inv_bn, ((0, 0), (0, NUM_CLASSES_PAD - NUM_CLASSES)))
    bfc3 = jnp.pad(params['bfc3'], ((0, 0), (0, NUM_CLASSES_PAD - NUM_CLASSES)))

    return dict(
        wb3=jnp.transpose(wb.reshape(IMG_C_PAD, N_CHUNKS, FEAT_CHUNK), (1, 0, 2)).astype(bf16),
        bb3=bb.reshape(N_CHUNKS, 1, FEAT_CHUNK).astype(f32),
        wmain3=wmain.reshape(N_CHUNKS, FEAT_CHUNK, HIDDEN).astype(bf16),
        bmain=bmain.astype(f32),
        wna=params['wna'].astype(bf16), bna=params['bna'].astype(f32),
        wsc=w_score.T.astype(f32),       # (1, FACE_DIM)
        bsc=b_score.astype(f32),         # (1, 1)
        wfc3=wfc3.astype(bf16), bfc3=bfc3.astype(f32),
    )


def face_attention_forward(image, face_features_initial, numberFaces, labels, params,
                           *, batch_tile=None):
    """image: NCHW (B, 3, 7, 7); face_features_initial: (B, 15, FACE_DIM);
    numberFaces: (B,) int; labels: unused by the stand-in non_align model."""
    del labels  # TODO(synk): labels only feed the external non_align_model; stand-in ignores them.
    B = image.shape[0]

    if batch_tile is None:
        batch_tile = min(128, _round_up(max(B, 1), 8))   # big tile now that feats is chunked
    TB = batch_tile
    Bp = _round_up(B, TB)
    pad_b = Bp - B

    fp = _fold_params(params)

    # NCHW -> (B, 49, 3); pad positions 49->56, channels 3->128 (dense DMA), batch -> Bp; bf16.
    img = jnp.transpose(image, (0, 2, 3, 1)).reshape(B, IMG_P, IMG_C).astype(jnp.float32)
    img = jnp.pad(img, ((0, pad_b), (0, IMG_P_PAD - IMG_P), (0, IMG_C_PAD - IMG_C)))
    img2d = img.reshape(Bp * IMG_P_PAD, IMG_C_PAD).astype(jnp.bfloat16)

    faces = jnp.pad(face_features_initial.astype(jnp.float32),
                    ((0, pad_b), (0, MAX_FACES_PAD - MAX_FACES), (0, 0)))
    faces2d = faces.reshape(Bp * MAX_FACES_PAD, FACE_DIM).astype(jnp.bfloat16)

    # mask[j, p] = MASK_NEG for p >= min(numberFaces[j], maxFaces) (matches the numpy loop; the
    # padded 16th face slot is always masked). Padded batch rows get nf=0 and are sliced off.
    nf = jnp.pad(numberFaces.astype(jnp.int32), ((0, pad_b),))
    nf_clip = jnp.minimum(nf, MAX_FACES)
    pos = jnp.arange(MAX_FACES_PAD, dtype=jnp.int32)[None, :]
    mask = jnp.where(pos >= nf_clip[:, None], MASK_NEG, 0.0).astype(jnp.float32)   # (Bp, 16)

    weights = (fp['wb3'], fp['bb3'], fp['wmain3'], fp['bmain'],
               fp['wna'], fp['bna'], fp['wsc'], fp['bsc'],
               fp['wfc3'], fp['bfc3'])

    tiled_specs = [
        pl.BlockSpec((TB * IMG_P_PAD, IMG_C_PAD), lambda i: (i, 0)),        # img tile
        pl.BlockSpec((TB * MAX_FACES_PAD, FACE_DIM), lambda i: (i, 0)),     # faces tile
        pl.BlockSpec((TB, MAX_FACES_PAD), lambda i: (i, 0)),                # mask tile
    ]
    # VMEM-resident weights: constant index_map (same block every grid step).
    weight_specs = [pl.BlockSpec(tuple(w.shape), lambda i, nd=w.ndim: (0,) * nd) for w in weights]

    # Advisory cost estimate reflecting the executed (padded) work.
    flops_per_sample = (
        2 * IMG_P_PAD * IMG_C_PAD * GLOBAL_FEAT_PAD     # backbone stand-in matmul
        + IMG_P_PAD * GLOBAL_FEAT_PAD                   # spatial position sum
        + 2 * GLOBAL_FEAT_PAD * HIDDEN                  # global_fc_main
        + 2 * MAX_FACES_PAD * FACE_DIM * HIDDEN         # non_align stand-in
        + 2 * MAX_FACES_PAD * FACE_DIM                  # folded attention scores
        + 8 * MAX_FACES_PAD                             # softmax / masking
        + 2 * MAX_FACES_PAD * HIDDEN                    # attention-weighted sum
        + 2 * (2 * HIDDEN) * NUM_CLASSES_PAD            # fc3
    )
    bytes_accessed = (int(img2d.size) * 2 + int(faces2d.size) * 2 + int(mask.size) * 4
                      + sum(int(w.size) * w.dtype.itemsize for w in weights)
                      + Bp * NUM_CLASSES_PAD * 4)

    out = pl.pallas_call(
        _face_attention_kernel,
        out_shape=jax.ShapeDtypeStruct((Bp, NUM_CLASSES_PAD), jnp.float32),
        grid_spec=pltpu.PrefetchScalarGridSpec(
            num_scalar_prefetch=0,
            grid=(Bp // TB,),
            in_specs=tiled_specs + weight_specs,
            out_specs=pl.BlockSpec((TB, NUM_CLASSES_PAD), lambda i: (i, 0)),
        ),
        compiler_params=pltpu.CompilerParams(
            dimension_semantics=("parallel",),
            vmem_limit_bytes=48 * 1024 * 1024,
        ),
        cost_estimate=pl.CostEstimate(
            flops=Bp * flops_per_sample,
            transcendentals=Bp * MAX_FACES_PAD,
            bytes_accessed=bytes_accessed),
    )(img2d, faces2d, mask, *weights)

    return out[:B, :NUM_CLASSES]


def _reference_forward(image, faces, numberFaces, params):
    """Pure-JAX f32 reference (unfolded math) used only for the correctness check."""
    f32 = jnp.float32
    B = image.shape[0]
    x = jnp.transpose(image, (0, 2, 3, 1)).reshape(B, IMG_P, IMG_C).astype(f32)
    feats = jnp.maximum(jnp.einsum('bpc,cf->bpf', x, params['wb']) + params['bb'], 0.0)
    gfi = jnp.mean(feats, axis=1)                                        # avg_pool2d(kernel=7)
    gfeat = gfi @ params['wmain'] + params['bmain']                      # (B, 256)

    ff = jnp.einsum('bnd,dh->bnh', faces.astype(f32), params['wna']) + params['bna']   # (B,15,256)
    inter = jnp.einsum('bnh,ha->bna', ff, params['watt1']) + params['batt1']
    sc = jnp.einsum('bna,oa->bno', inter, params['watt2'])[..., 0] + params['batt2'][0, 0]

    nf_clip = jnp.minimum(numberFaces, MAX_FACES)
    pos = jnp.arange(MAX_FACES)[None, :]
    sc = sc + jnp.where(pos >= nf_clip[:, None], MASK_NEG, 0.0)
    w = jax.nn.softmax(sc, axis=-1)
    w = jnp.where((nf_clip <= 0)[:, None], 0.0, w)
    attended = jnp.einsum('bn,bnh->bh', w, ff)

    inv_bn = 1.0 / jnp.sqrt(jnp.float32(1.0 + BN_EPS))
    final = jnp.concatenate([attended * inv_bn, gfeat * inv_bn], axis=-1)
    return final @ params['wfc3'] + params['bfc3']


def init_params(key):
    ks = jax.random.split(key, 6)

    def kaiming(k, out_f, in_f):  # kaiming_normal_ on torch Linear weight (out, in): std = sqrt(2/in)
        return ((2.0 / in_f) ** 0.5) * jax.random.normal(k, (out_f, in_f), dtype=jnp.float32)

    w_main = kaiming(ks[0], HIDDEN, GLOBAL_FEAT)          # global_fc_main
    w_att1 = kaiming(ks[1], ATT_HIDDEN, HIDDEN)           # attentionfc1
    w_att2 = kaiming(ks[2], 1, ATT_HIDDEN)                # attentionfc2
    w_fc3 = kaiming(ks[3], NUM_CLASSES, 2 * HIDDEN)       # global_fc3_debug

    # deterministic stand-in weights (backbone / non_align)
    wb = 0.05 * jax.random.normal(ks[4], (IMG_C, GLOBAL_FEAT), dtype=jnp.float32)
    wna = 0.05 * jax.random.normal(ks[5], (FACE_DIM, HIDDEN), dtype=jnp.float32)

    fill = lambda n: jnp.full((1, n), 0.01, dtype=jnp.float32)  # bias.data.fill_(0.01)
    return dict(
        wb=wb, bb=fill(GLOBAL_FEAT),
        wna=wna, bna=fill(HIDDEN),
        wmain=w_main.T, bmain=fill(HIDDEN),          # pre-transposed to (in, out) for x @ W
        watt1=w_att1.T, batt1=fill(ATT_HIDDEN),      # (256, 64)
        watt2=w_att2, batt2=fill(1),                 # torch (out=1, in=64) layout
        wfc3=w_fc3.T, bfc3=fill(NUM_CLASSES),
    )


if __name__ == "__main__":
    key = jax.random.PRNGKey(0)
    kp, ki, kf = jax.random.split(key, 3)
    params = init_params(kp)

    B = 2
    image = jax.random.normal(ki, (B, IMG_C, IMG_HW, IMG_HW), dtype=jnp.float32)   # NCHW like PyTorch
    faces = jax.random.normal(kf, (B, MAX_FACES, FACE_DIM), dtype=jnp.float32)
    numberFaces = jnp.array([4, 0], dtype=jnp.int32)   # one partially masked, one with zero faces
    labels = jnp.zeros((B,), dtype=jnp.int32)

    out = face_attention_forward(image, faces, numberFaces, labels, params)
    out = jax.block_until_ready(out)
    ref = _reference_forward(image, faces, numberFaces, params)

    assert out.shape == (B, NUM_CLASSES)
    assert bool(jnp.all(jnp.isfinite(out)))
    assert bool(jnp.allclose(out, ref, rtol=5e-2, atol=5e-2)), (out, ref)
    print("KERNEL_OK")
</pallas_src>

<mosaic_0001>
module attributes {stable_mosaic.version = 11 : i64} {
  func.func @_face_attention_kernel(%arg0: i32, %arg1: memref<448x128xbf16, #tpu.memory_space<vmem>>, %arg2: memref<128x32xbf16, #tpu.memory_space<vmem>>, %arg3: memref<8x16xf32, #tpu.memory_space<vmem>>, %arg4: memref<9x128x256xbf16, #tpu.memory_space<vmem>>, %arg5: memref<9x1x256xf32, #tpu.memory_space<vmem>>, %arg6: memref<9x256x256xbf16, #tpu.memory_space<vmem>>, %arg7: memref<1x256xf32, #tpu.memory_space<vmem>>, %arg8: memref<32x256xbf16, #tpu.memory_space<vmem>>, %arg9: memref<1x256xf32, #tpu.memory_space<vmem>>, %arg10: memref<1x32xf32, #tpu.memory_space<vmem>>, %arg11: memref<1x1xf32, #tpu.memory_space<vmem>>, %arg12: memref<512x128xbf16, #tpu.memory_space<vmem>>, %arg13: memref<1x128xf32, #tpu.memory_space<vmem>>, %arg14: memref<8x128xf32, #tpu.memory_space<vmem>>) attributes {dimension_semantics = [#tpu.dimension_semantics<parallel>], iteration_bounds = array<i64: 1>, scalar_prefetch = 0 : i64, scratch_operands = 0 : i64, tpu.core_type = #tpu.core_type<tc>, window_params = [{transform_indices = @transform_0, window_bounds = array<i64: 448, 128>}, {transform_indices = @transform_1, window_bounds = array<i64: 128, 32>}, {transform_indices = @transform_2, window_bounds = array<i64: 8, 16>}, {pipeline_mode = #tpu.pipeline_mode<synchronous>, transform_indices = @transform_3, window_bounds = array<i64: 9, 128, 256>}, {pipeline_mode = #tpu.pipeline_mode<synchronous>, transform_indices = @transform_4, window_bounds = array<i64: 9, 1, 256>}, {pipeline_mode = #tpu.pipeline_mode<synchronous>, transform_indices = @transform_5, window_bounds = array<i64: 9, 256, 256>}, {pipeline_mode = #tpu.pipeline_mode<synchronous>, transform_indices = @transform_6, window_bounds = array<i64: 1, 256>}, {pipeline_mode = #tpu.pipeline_mode<synchronous>, transform_indices = @transform_7, window_bounds = array<i64: 32, 256>}, {pipeline_mode = #tpu.pipeline_mode<synchronous>, transform_indices = @transform_8, window_bounds = array<i64: 1, 256>}, {pipeline_mode = #tpu.pipeline_mode<synchronous>, transform_indices = @transform_9, window_bounds = array<i64: 1, 32>}, {pipeline_mode = #tpu.pipeline_mode<synchronous>, transform_indices = @transform_10, window_bounds = array<i64: 1, 1>}, {pipeline_mode = #tpu.pipeline_mode<synchronous>, transform_indices = @transform_11, window_bounds = array<i64: 512, 128>}, {pipeline_mode = #tpu.pipeline_mode<synchronous>, transform_indices = @transform_12, window_bounds = array<i64: 1, 128>}, {transform_indices = @transform_13, window_bounds = array<i64: 8, 128>}]} {
    %c0 = arith.constant 0 : index
    %c0_0 = arith.constant 0 : index
    %0 = vector.load %arg1[%c0, %c0_0] : memref<448x128xbf16, #tpu.memory_space<vmem>>, vector<448x128xbf16>
    %cst = arith.constant 0.000000e+00 : f32
    %1 = vector.broadcast %cst : f32 to vector<8x256xf32>
    %c0_i32 = arith.constant 0 : i32
    %c9_i32 = arith.constant 9 : i32
    %2 = arith.addi %c0_i32, %c9_i32 : i32
    %c1_i32 = arith.constant 1 : i32
    %3 = scf.for %arg15 = %c0_i32 to %2 step %c1_i32 iter_args(%arg16 = %1) -> (vector<8x256xf32>)  : i32 {
      %57 = arith.index_cast %arg15 : i32 to index
      %c0_34 = arith.constant 0 : index
      %c0_35 = arith.constant 0 : index
      %58 = vector.load %arg4[%57, %c0_34, %c0_35] : memref<9x128x256xbf16, #tpu.memory_space<vmem>>, vector<1x128x256xbf16>
      %59 = vector.shape_cast %58 : vector<1x128x256xbf16> to vector<128x256xbf16>
      %cst_36 = arith.constant dense<0.000000e+00> : vector<448x256xf32>
      %60 = tpu.matmul %0, %59, %cst_36 {dimension_numbers = #tpu.dot_dimension_numbers<[1], [0], [0], [1], [0, 0, 1, 1], [], []>} : vector<448x128xbf16>, vector<128x256xbf16>, vector<448x256xf32> -> vector<448x256xf32>
      %61 = arith.index_cast %arg15 : i32 to index
      %c0_37 = arith.constant 0 : index
      %c0_38 = arith.constant 0 : index
      %62 = vector.load %arg5[%61, %c0_37, %c0_38] : memref<9x1x256xf32, #tpu.memory_space<vmem>>, vector<1x1x256xf32>
      %63 = vector.shape_cast %62 : vector<1x1x256xf32> to vector<1x256xf32>
      %64 = vector.broadcast %63 : vector<1x256xf32> to vector<448x256xf32>
      %65 = arith.addf %60, %64 : vector<448x256xf32>
      %cst_39 = arith.constant 0.000000e+00 : f32
      %66 = vector.broadcast %cst_39 : f32 to vector<448x256xf32>
      %67 = arith.maximumf %65, %66 : vector<448x256xf32>
      %68 = vector.shape_cast %67 : vector<448x256xf32> to vector<8x56x256xf32>
      %cst_40 = arith.constant dense<0.000000e+00> : vector<8x256xf32>
      %69 = vector.multi_reduction <add>, %68, %cst_40 [1] : vector<8x56x256xf32> to vector<8x256xf32>
      %70 = arith.truncf %69 : vector<8x256xf32> to vector<8x256xbf16>
      %71 = arith.index_cast %arg15 : i32 to index
      %c0_41 = arith.constant 0 : index
      %c0_42 = arith.constant 0 : index
      %72 = vector.load %arg6[%71, %c0_41, %c0_42] : memref<9x256x256xbf16, #tpu.memory_space<vmem>>, vector<1x256x256xbf16>
      %73 = vector.shape_cast %72 : vector<1x256x256xbf16> to vector<256x256xbf16>
      %cst_43 = arith.constant dense<0.000000e+00> : vector<8x256xf32>
      %74 = tpu.matmul %70, %73, %cst_43 {dimension_numbers = #tpu.dot_dimension_numbers<[1], [0], [0], [1], [0, 0, 1, 1], [], []>} : vector<8x256xbf16>, vector<256x256xbf16>, vector<8x256xf32> -> vector<8x256xf32>
      %75 = arith.addf %arg16, %74 : vector<8x256xf32>
      scf.yield %75 : vector<8x256xf32>
    }
    %c9_i32_1 = arith.constant 9 : i32
    %c0_2 = arith.constant 0 : index
    %c0_3 = arith.constant 0 : index
    %4 = vector.load %arg7[%c0_2, %c0_3] : memref<1x256xf32, #tpu.memory_space<vmem>>, vector<1x256xf32>
    %5 = vector.broadcast %4 : vector<1x256xf32> to vector<8x256xf32>
    %6 = arith.addf %3, %5 : vector<8x256xf32>
    %c0_4 = arith.constant 0 : index
    %c0_5 = arith.constant 0 : index
    %7 = vector.load %arg2[%c0_4, %c0_5] : memref<128x32xbf16, #tpu.memory_space<vmem>>, vector<128x32xbf16>
    %c0_6 = arith.constant 0 : index
    %c0_7 = arith.constant 0 : index
    %8 = vector.load %arg8[%c0_6, %c0_7] : memref<32x256xbf16, #tpu.memory_space<vmem>>, vector<32x256xbf16>
    %cst_8 = arith.constant dense<0.000000e+00> : vector<128x256xf32>
    %9 = tpu.matmul %7, %8, %cst_8 {dimension_numbers = #tpu.dot_dimension_numbers<[1], [0], [0], [1], [0, 0, 1, 1], [], []>} : vector<128x32xbf16>, vector<32x256xbf16>, vector<128x256xf32> -> vector<128x256xf32>
    %c0_9 = arith.constant 0 : index
    %c0_10 = arith.constant 0 : index
    %10 = vector.load %arg9[%c0_9, %c0_10] : memref<1x256xf32, #tpu.memory_space<vmem>>, vector<1x256xf32>
    %11 = vector.broadcast %10 : vector<1x256xf32> to vector<128x256xf32>
    %12 = arith.addf %9, %11 : vector<128x256xf32>
    %13 = vector.shape_cast %12 : vector<128x256xf32> to vector<8x16x256xf32>
    %14 = arith.extf %7 : vector<128x32xbf16> to vector<128x32xf32>
    %15 = vector.shape_cast %14 : vector<128x32xf32> to vector<8x16x32xf32>
    %c0_11 = arith.constant 0 : index
    %c0_12 = arith.constant 0 : index
    %16 = vector.load %arg10[%c0_11, %c0_12] : memref<1x32xf32, #tpu.memory_space<vmem>>, vector<1x32xf32>
    %17 = vector.shape_cast %16 : vector<1x32xf32> to vector<1x1x32xf32>
    %18 = vector.broadcast %17 : vector<1x1x32xf32> to vector<8x16x32xf32>
    %19 = arith.mulf %15, %18 : vector<8x16x32xf32>
    %cst_13 = arith.constant dense<0.000000e+00> : vector<8x16xf32>
    %20 = vector.multi_reduction <add>, %19, %cst_13 [2] : vector<8x16x32xf32> to vector<8x16xf32>
    %c0_14 = arith.constant 0 : index
    %c0_15 = arith.constant 0 : index
    %21 = vector.load %arg11[%c0_14, %c0_15] : memref<1x1xf32, #tpu.memory_space<vmem>>, vector<1x1xf32>
    %22 = vector.broadcast %21 : vector<1x1xf32> to vector<8x16xf32>
    %23 = arith.addf %20, %22 : vector<8x16xf32>
    %c0_16 = arith.constant 0 : index
    %c0_17 = arith.constant 0 : index
    %24 = vector.load %arg3[%c0_16, %c0_17] : memref<8x16xf32, #tpu.memory_space<vmem>>, vector<8x16xf32>
    %25 = arith.addf %23, %24 : vector<8x16xf32>
    %cst_18 = arith.constant dense<0xFF800000> : vector<8xf32>
    %26 = vector.multi_reduction <maximumf>, %25, %cst_18 [1] : vector<8x16xf32> to vector<8xf32>
    %27 = vector.shape_cast %26 : vector<8xf32> to vector<8x1xf32>
    %28 = vector.broadcast %27 : vector<8x1xf32> to vector<8x16xf32>
    %29 = arith.subf %25, %28 : vector<8x16xf32>
    %30 = math.exp %29 : vector<8x16xf32>
    %cst_19 = arith.constant dense<0.000000e+00> : vector<8xf32>
    %31 = vector.multi_reduction <add>, %30, %cst_19 [1] : vector<8x16xf32> to vector<8xf32>
    %32 = vector.shape_cast %31 : vector<8xf32> to vector<8x1xf32>
    %33 = vector.broadcast %32 : vector<8x1xf32> to vector<8x16xf32>
    %34 = arith.divf %30, %33 : vector<8x16xf32>
    %c0_20 = arith.constant 0 : index
    %c0_21 = arith.constant 0 : index
    %35 = vector.load %arg3[%c0_20, %c0_21] : memref<8x16xf32, #tpu.memory_space<vmem>>, vector<8x1xf32>
    %cst_22 = arith.constant -5.000000e+29 : f32
    %36 = vector.broadcast %cst_22 : f32 to vector<8x1xf32>
    %37 = arith.cmpf olt, %35, %36 : vector<8x1xf32>
    %cst_23 = arith.constant 0.000000e+00 : f32
    %38 = vector.shape_cast %37 : vector<8x1xi1> to vector<8x1xi1>
    %39 = vector.broadcast %38 : vector<8x1xi1> to vector<8x16xi1>
    %40 = vector.broadcast %cst_23 : f32 to vector<8x16xf32>
    %41 = arith.select %39, %40, %34 : vector<8x16xi1>, vector<8x16xf32>
    %42 = vector.shape_cast %41 : vector<8x16xf32> to vector<8x16x1xf32>
    %43 = vector.broadcast %42 : vector<8x16x1xf32> to vector<8x16x256xf32>
    %44 = arith.mulf %43, %13 : vector<8x16x256xf32>
    %cst_24 = arith.constant dense<0.000000e+00> : vector<8x256xf32>
    %45 = vector.multi_reduction <add>, %44, %cst_24 [1] : vector<8x16x256xf32> to vector<8x256xf32>
    %46 = arith.truncf %45 : vector<8x256xf32> to vector<8x256xbf16>
    %c0_25 = arith.constant 0 : index
    %c0_26 = arith.constant 0 : index
    %47 = vector.load %arg12[%c0_25, %c0_26] : memref<512x128xbf16, #tpu.memory_space<vmem>>, vector<256x128xbf16>
    %cst_27 = arith.constant dense<0.000000e+00> : vector<8x128xf32>
    %48 = tpu.matmul %46, %47, %cst_27 {dimension_numbers = #tpu.dot_dimension_numbers<[1], [0], [0], [1], [0, 0, 1, 1], [], []>} : vector<8x256xbf16>, vector<256x128xbf16>, vector<8x128xf32> -> vector<8x128xf32>
    %49 = arith.truncf %6 : vector<8x256xf32> to vector<8x256xbf16>
    %c256 = arith.constant 256 : index
    %c0_28 = arith.constant 0 : index
    %50 = vector.load %arg12[%c256, %c0_28] : memref<512x128xbf16, #tpu.memory_space<vmem>>, vector<256x128xbf16>
    %cst_29 = arith.constant dense<0.000000e+00> : vector<8x128xf32>
    %51 = tpu.matmul %49, %50, %cst_29 {dimension_numbers = #tpu.dot_dimension_numbers<[1], [0], [0], [1], [0, 0, 1, 1], [], []>} : vector<8x256xbf16>, vector<256x128xbf16>, vector<8x128xf32> -> vector<8x128xf32>
    %52 = arith.addf %48, %51 : vector<8x128xf32>
    %c0_30 = arith.constant 0 : index
    %c0_31 = arith.constant 0 : index
    %53 = vector.load %arg13[%c0_30, %c0_31] : memref<1x128xf32, #tpu.memory_space<vmem>>, vector<1x128xf32>
    %54 = vector.broadcast %53 : vector<1x128xf32> to vector<8x128xf32>
    %55 = arith.addf %52, %54 : vector<8x128xf32>
    %c0_32 = arith.constant 0 : index
    %c0_33 = arith.constant 0 : index
    %56 = vector.load %arg14[%c0_32, %c0_33] : memref<8x128xf32, #tpu.memory_space<vmem>>, vector<8x128xf32>
    tpu.vector_store %arg14[%c0_32, %c0_33], %55 {strides = array<i32>} : memref<8x128xf32, #tpu.memory_space<vmem>>, vector<8x128xf32>,
    return
  }
  func.func @transform_0(%arg0: i32) -> (i32, i32) {
    %c0_i32 = arith.constant 0 : i32
    %c0_i32_0 = arith.constant 0 : i32
    return %arg0, %c0_i32 : i32, i32
  }
  func.func @transform_1(%arg0: i32) -> (i32, i32) {
    %c0_i32 = arith.constant 0 : i32
    %c0_i32_0 = arith.constant 0 : i32
    return %arg0, %c0_i32 : i32, i32
  }
  func.func @transform_2(%arg0: i32) -> (i32, i32) {
    %c0_i32 = arith.constant 0 : i32
    %c0_i32_0 = arith.constant 0 : i32
    return %arg0, %c0_i32 : i32, i32
  }
  func.func @transform_3(%arg0: i32) -> (i32, i32, i32) {
    %c0_i32 = arith.constant 0 : i32
    %c0_i32_0 = arith.constant 0 : i32
    %c0_i32_1 = arith.constant 0 : i32
    %c0_i32_2 = arith.constant 0 : i32
    return %c0_i32, %c0_i32_0, %c0_i32_1 : i32, i32, i32
  }
  func.func @transform_4(%arg0: i32) -> (i32, i32, i32) {
    %c0_i32 = arith.constant 0 : i32
    %c0_i32_0 = arith.constant 0 : i32
    %c0_i32_1 = arith.constant 0 : i32
    %c0_i32_2 = arith.constant 0 : i32
    return %c0_i32, %c0_i32_0, %c0_i32_1 : i32, i32, i32
  }
  func.func @transform_5(%arg0: i32) -> (i32, i32, i32) {
    %c0_i32 = arith.constant 0 : i32
    %c0_i32_0 = arith.constant 0 : i32
    %c0_i32_1 = arith.constant 0 : i32
    %c0_i32_2 = arith.constant 0 : i32
    return %c0_i32, %c0_i32_0, %c0_i32_1 : i32, i32, i32
  }
  func.func @transform_6(%arg0: i32) -> (i32, i32) {
    %c0_i32 = arith.constant 0 : i32
    %c0_i32_0 = arith.constant 0 : i32
    %c0_i32_1 = arith.constant 0 : i32
    return %c0_i32, %c0_i32_0 : i32, i32
  }
  func.func @transform_7(%arg0: i32) -> (i32, i32) {
    %c0_i32 = arith.constant 0 : i32
    %c0_i32_0 = arith.constant 0 : i32
    %c0_i32_1 = arith.constant 0 : i32
    return %c0_i32, %c0_i32_0 : i32, i32
  }
  func.func @transform_8(%arg0: i32) -> (i32, i32) {
    %c0_i32 = arith.constant 0 : i32
    %c0_i32_0 = arith.constant 0 : i32
    %c0_i32_1 = arith.constant 0 : i32
    return %c0_i32, %c0_i32_0 : i32, i32
  }
  func.func @transform_9(%arg0: i32) -> (i32, i32) {
    %c0_i32 = arith.constant 0 : i32
    %c0_i32_0 = arith.constant 0 : i32
    %c0_i32_1 = arith.constant 0 : i32
    return %c0_i32, %c0_i32_0 : i32, i32
  }
  func.func @transform_10(%arg0: i32) -> (i32, i32) {
    %c0_i32 = arith.constant 0 : i32
    %c0_i32_0 = arith.constant 0 : i32
    %c0_i32_1 = arith.constant 0 : i32
    return %c0_i32, %c0_i32_0 : i32, i32
  }
  func.func @transform_11(%arg0: i32) -> (i32, i32) {
    %c0_i32 = arith.constant 0 : i32
    %c0_i32_0 = arith.constant 0 : i32
    %c0_i32_1 = arith.constant 0 : i32
    return %c0_i32, %c0_i32_0 : i32, i32
  }
  func.func @transform_12(%arg0: i32) -> (i32, i32) {
    %c0_i32 = arith.constant 0 : i32
    %c0_i32_0 = arith.constant 0 : i32
    %c0_i32_1 = arith.constant 0 : i32
    return %c0_i32, %c0_i32_0 : i32, i32
  }
  func.func @transform_13(%arg0: i32) -> (i32, i32) {
    %c0_i32 = arith.constant 0 : i32
    %c0_i32_0 = arith.constant 0 : i32
    return %arg0, %c0_i32 : i32, i32
  }
}

</mosaic_0001>

<bundles_post_ra>
// kernel: tpu_custom_call.1
= control target key start
LH: loop header
LB: loop body
LE: loop exit
PB: predicated region body
PF: predicated region fallthrough
CT: control target
= control target key end

     0   :  { %s5338_s0 = inlined_call_operand.hbm [shape: bf16[448,128], index: 0, kind: input, shape index: {}]   ;;  %s5339_s1 = inlined_call_operand.vmem [shape: bf16[128,32], index: 1, kind: input, shape index: {}]   ;;  %s5340_s2 = inlined_call_operand.hbm [shape: f32[8,16], index: 2, kind: input, shape index: {}]   ;;  %s5341_s3 = inlined_call_operand.hbm [shape: bf16[9,128,256], index: 3, kind: input, shape index: {}]   ;;  %s5342_s4 = inlined_call_operand.hbm [shape: f32[9,1,256], index: 4, kind: input, shape index: {}]   ;;  %s5343_s5 = inlined_call_operand.hbm [shape: bf16[9,256,256], index: 5, kind: input, shape index: {}]   ;;  %s5344_s6 = inlined_call_operand.hbm [shape: f32[1,256], index: 6, kind: input, shape index: {}]   ;;  %s5345_s7 = inlined_call_operand.hbm [shape: bf16[32,256], index: 7, kind: input, shape index: {}]   ;;  %s5346_s8 = inlined_call_operand.hbm [shape: f32[1,256], index: 8, kind: input, shape index: {}]   ;;  %s5347_s9 = inlined_call_operand.hbm [shape: f32[1,32], index: 9, kind: input, shape index: {}]   ;;  %s5348_s10 = inlined_call_operand.<no memory space> [shape: f32[1,1], index: 10, kind: input, shape index: {}]   ;;  %s5349_s11 = inlined_call_operand.hbm [shape: bf16[512,128], index: 11, kind: input, shape index: {}]   ;;  %s5350_s12 = inlined_call_operand.hbm [shape: f32[1,128], index: 12, kind: input, shape index: {}]   ;;  %s5351_s13 = inlined_call_operand.hbm [shape: f32[8,128], index: 13, kind: output, shape index: {}]  }
   0x1   :  { %v18_v0 = vstv %s5348_s10 }
   0x2   :  { %19 = vst [vmem:[#allocation2] sm:$0x1] %v18_v0 }
   0x3   :  { %20 = vsyncpa [#allocation4], 0 }
   0x4   :  { %21 = vsyncpa [#allocation7], 0 }
   0x5   :  { %22 = vsyncpa [#allocation10], 0 }
   0x6   :  { %23 = vsyncpa [#allocation13], 0 }
   0x7   :  { %24 = vsyncpa [#allocation16], 0 }
   0x8   :  { %25 = vsyncpa [#allocation19], 0 }
   0x9   :  { %26 = vsyncpa [#allocation5], 0  ;;  %s3952_s27 = smov [#allocation6]   ;;  %s3953_s29 = smov [#allocation9]  }
   0xa   :  { %s47_s28 = sshll.u32 %s3952_s27, 4  ;;  %s68_s30 = sshll.u32 %s3953_s29, 4  ;;  %s48_s28 = int_to_ptr.vmem [resolvable:$true] %s47_s28  ;;  %s4045_s30 = int_to_ptr.vmem [resolvable:$true] %s68_s30 }
   0xb   :  { %s3650_s16 = scalar_lea.hbm %s5340_s2, 128 }
   0xc   :  { %p3651_p0 = scmp.ne.s32.totalorder %s5340_s2, %s3650_s16  ;;  %p3654_p1 = scmp.lt.u32.totalorder %s3650_s16, %s5340_s2 }
   0xe   :  { %p3656_p2 = pnand %p3654_p1, %p3651_p0 }
  0x10   :  { %3659 = shalt.err (!%p3656_p2)
}
  0x11   :  { %s3660_s20 = scalar_lea.vmem %s48_s28, 128  ;;  %p3665_p4 = scmp.lt.s32.totalorder %s48_s28, %s48_s28 }
  0x12   :  { %p3661_p3 = scmp.ne.s32.totalorder %s48_s28, %s3660_s20  ;;  %p3666_p5 = scmp.lt.s32.totalorder %s3660_s20, %s3660_s20 }
  0x14   :  { %p3667_p6 = por %p3666_p5, %p3665_p4 }
  0x16   :  { %p3668_p7 = pnand %p3667_p6, %p3661_p3 }
  0x18   :  { %3671 = shalt.err (!%p3668_p7)
}
  0x19   :  { %50 = dma.hbm_to_vmem [thread:$0]  %s5340_s2, 128, %s48_s28, [#allocation7]  }
  0x1a   :  { %s3672_s25 = scalar_lea.hbm %s5342_s4, 288 }
  0x1b   :  { %p3673_p8 = scmp.ne.s32.totalorder %s5342_s4, %s3672_s25  ;;  %p3676_p9 = scmp.lt.u32.totalorder %s3672_s25, %s5342_s4 }
  0x1d   :  { %p3678_p10 = pnand %p3676_p9, %p3673_p8 }
  0x1f   :  { %3681 = shalt.err (!%p3678_p10)
}
  0x20   :  { %s3682_s15 = scalar_lea.vmem %s4045_s30, 288  ;;  %p3687_p12 = scmp.lt.s32.totalorder %s4045_s30, %s4045_s30 }
  0x21   :  { %p3683_p11 = scmp.ne.s32.totalorder %s4045_s30, %s3682_s15  ;;  %p3688_p13 = scmp.lt.s32.totalorder %s3682_s15, %s3682_s15 }
  0x23   :  { %p3689_p0 = por %p3688_p13, %p3687_p12 }
  0x25   :  { %p3690_p1 = pnand %p3689_p0, %p3683_p11 }
  0x27   :  { %3693 = shalt.err (!%p3690_p1)
}
  0x28   :  { %s3954_s2 = smov 32   ;;  %s3955_s28 = smov 2  }
  0x29   :  { %74 = dma.hbm_to_vmem [thread:$0]  %s5342_s4, 288, %s4045_s30, [#allocation10], %s3954_s2, %s3954_s2, %s3955_s28  }
  0x2a   :  { %s3956_s17 = smov [#allocation12]   ;;  %s3957_s19 = smov [#allocation15]  }
  0x2b   :  { %s93_s18 = sshll.u32 %s3956_s17, 4  ;;  %s115_s20 = sshll.u32 %s3957_s19, 4  ;;  %s94_s18 = int_to_ptr.vmem [resolvable:$true] %s93_s18  ;;  %s116_s20 = int_to_ptr.vmem [resolvable:$true] %s115_s20 }
  0x2c   :  { %s3694_s23 = scalar_lea.hbm %s5344_s6, 32 }
  0x2d   :  { %p3695_p2 = scmp.ne.s32.totalorder %s5344_s6, %s3694_s23  ;;  %p3698_p3 = scmp.lt.u32.totalorder %s3694_s23, %s5344_s6 }
  0x2f   :  { %p3700_p4 = pnand %p3698_p3, %p3695_p2 }
  0x31   :  { %3703 = shalt.err (!%p3700_p4)
}
  0x32   :  { %s3704_s4 = scalar_lea.vmem %s94_s18, 32  ;;  %p3709_p6 = scmp.lt.s32.totalorder %s94_s18, %s94_s18 }
  0x33   :  { %p3705_p5 = scmp.ne.s32.totalorder %s94_s18, %s3704_s4  ;;  %p3710_p7 = scmp.lt.s32.totalorder %s3704_s4, %s3704_s4 }
  0x35   :  { %p3711_p8 = por %p3710_p7, %p3709_p6 }
  0x37   :  { %p3712_p9 = pnand %p3711_p8, %p3705_p5 }
  0x39   :  { %3715 = shalt.err (!%p3712_p9)
}
  0x3a   :  { %96 = dma.hbm_to_vmem [thread:$0]  %s5344_s6, 32, %s94_s18, [#allocation13]  }
  0x3b   :  { %s3716_s2 = scalar_lea.hbm %s5346_s8, 32 }
  0x3c   :  { %p3717_p10 = scmp.ne.s32.totalorder %s5346_s8, %s3716_s2  ;;  %p3720_p11 = scmp.lt.u32.totalorder %s3716_s2, %s5346_s8 }
  0x3e   :  { %p3722_p12 = pnand %p3720_p11, %p3717_p10 }
  0x40   :  { %3725 = shalt.err (!%p3722_p12)
}
  0x41   :  { %s3726_s19 = scalar_lea.vmem %s116_s20, 32  ;;  %p3731_p0 = scmp.lt.s32.totalorder %s116_s20, %s116_s20 }
  0x42   :  { %p3727_p13 = scmp.ne.s32.totalorder %s116_s20, %s3726_s19  ;;  %p3732_p1 = scmp.lt.s32.totalorder %s3726_s19, %s3726_s19 }
  0x44   :  { %p3733_p2 = por %p3732_p1, %p3731_p0 }
  0x46   :  { %p3734_p3 = pnand %p3733_p2, %p3727_p13 }
  0x48   :  { %3737 = shalt.err (!%p3734_p3)
}
  0x49   :  { %118 = dma.hbm_to_vmem [thread:$0]  %s5346_s8, 32, %s116_s20, [#allocation16]  }
  0x4a   :  { %s3958_s21 = smov [#allocation18]   ;;  %s3959_s23 = smov [#allocation3]  }
  0x4b   :  { %s136_s22 = sshll.u32 %s3958_s21, 4  ;;  %s32_s24 = sshll.u32 %s3959_s23, 4  ;;  %s137_s22 = int_to_ptr.vmem [resolvable:$true] %s136_s22  ;;  %s4100_s24 = int_to_ptr.vmem [resolvable:$true] %s32_s24 }
  0x4c   :  { %s3738_s27 = scalar_lea.hbm %s5349_s11, 4096 }
  0x4d   :  { %p3739_p4 = scmp.ne.s32.totalorder %s5349_s11, %s3738_s27  ;;  %p3742_p5 = scmp.lt.u32.totalorder %s3738_s27, %s5349_s11 }
  0x4f   :  { %p3744_p6 = pnand %p3742_p5, %p3739_p4 }
  0x51   :  { %3747 = shalt.err (!%p3744_p6)
}
  0x52   :  { %s3748_s8 = scalar_lea.vmem %s137_s22, 4096  ;;  %p3753_p8 = scmp.lt.s32.totalorder %s137_s22, %s137_s22 }
  0x53   :  { %p3749_p7 = scmp.ne.s32.totalorder %s137_s22, %s3748_s8  ;;  %p3754_p9 = scmp.lt.s32.totalorder %s3748_s8, %s3748_s8 }
  0x55   :  { %p3755_p10 = por %p3754_p9, %p3753_p8 }
  0x57   :  { %p3756_p11 = pnand %p3755_p10, %p3749_p7 }
  0x59   :  { %3759 = shalt.err (!%p3756_p11)
}
  0x5a   :  { %s3960_s20 = smov 64   ;;  %s3961_s15 = smov 4  }
  0x5b   :  { %142 = dma.hbm_to_vmem [thread:$0]  %s5349_s11, 4096, %s137_s22, [#allocation19], %s3960_s20, %s3960_s20, %s3961_s15  }
  0x5c   :  { %s3760_s17 = scalar_lea.hbm %s5338_s0, 3584 }
  0x5d   :  { %p3761_p12 = scmp.ne.s32.totalorder %s5338_s0, %s3760_s17  ;;  %p3764_p13 = scmp.lt.u32.totalorder %s3760_s17, %s5338_s0 }
  0x5f   :  { %p3766_p0 = pnand %p3764_p13, %p3761_p12 }
  0x61   :  { %3769 = shalt.err (!%p3766_p0)
}
  0x62   :  { %s3770_s23 = scalar_lea.vmem %s4100_s24, 3584  ;;  %p3775_p2 = scmp.lt.s32.totalorder %s4100_s24, %s4100_s24 }
  0x63   :  { %p3771_p1 = scmp.ne.s32.totalorder %s4100_s24, %s3770_s23  ;;  %p3776_p3 = scmp.lt.s32.totalorder %s3770_s23, %s3770_s23 }
  0x65   :  { %p3777_p4 = por %p3776_p3, %p3775_p2 }
  0x67   :  { %p3778_p5 = pnand %p3777_p4, %p3771_p1 }
  0x69   :  { %3781 = shalt.err (!%p3778_p5)
}
  0x6a   :  { %38 = dma.hbm_to_vmem [thread:$0]  %s5338_s0, 3584, %s4100_s24, [#allocation4], %s3960_s20, %s3960_s20, %s3961_s15  }
  0x6b   :  { %s3962_s25 = smov [#allocation8]   ;;  %s3782_s30 = scalar_lea.hbm %s5341_s3, 18432 }
  0x6c   :  { %s56_s26 = sshll.u32 %s3962_s25, 4  ;;  %p3783_p6 = scmp.ne.s32.totalorder %s5341_s3, %s3782_s30  ;;  %s57_s26 = int_to_ptr.vmem [resolvable:$true] %s56_s26 }
  0x6d   :  { %p3786_p7 = scmp.lt.u32.totalorder %s3782_s30, %s5341_s3 }
  0x6f   :  { %p3788_p8 = pnand %p3786_p7, %p3783_p6 }
  0x71   :  { %3791 = shalt.err (!%p3788_p8)
}
  0x72   :  { %s3792_s28 = scalar_lea.vmem %s57_s26, 18432  ;;  %p3797_p10 = scmp.lt.s32.totalorder %s57_s26, %s57_s26 }
  0x73   :  { %p3793_p9 = scmp.ne.s32.totalorder %s57_s26, %s3792_s28  ;;  %p3798_p11 = scmp.lt.s32.totalorder %s3792_s28, %s3792_s28 }
  0x75   :  { %p3799_p12 = por %p3798_p11, %p3797_p10 }
  0x77   :  { %p3800_p13 = pnand %p3799_p12, %p3793_p9 }
  0x79   :  { %3803 = shalt.err (!%p3800_p13)
}
  0x7a   :  { %s3963_s0 = smov 128   ;;  %s3964_s24 = smov 8  }
  0x7b   :  { %62 = dma.hbm_to_vmem [thread:$0]  %s5341_s3, 18432, %s57_s26, [#allocation7], %s3963_s0, %s3963_s0, %s3964_s24  }
  0x7c   :  { %s3965_s16 = smov [#allocation11]   ;;  %s3966_s17 = smov [#allocation14]  }
  0x7d   :  { %s80_s10 = sshll.u32 %s3965_s16, 4  ;;  %s102_s19 = sshll.u32 %s3966_s17, 4  ;;  %s81_s10 = int_to_ptr.vmem [resolvable:$true] %s80_s10  ;;  %s103_s19 = int_to_ptr.vmem [resolvable:$true] %s102_s19 }
  0x7e   :  { %s3804_s21 = scalar_lea.hbm %s5343_s5, 36864 }
  0x7f   :  { %p3805_p0 = scmp.ne.s32.totalorder %s5343_s5, %s3804_s21  ;;  %p3808_p1 = scmp.lt.u32.totalorder %s3804_s21, %s5343_s5 }
  0x81   :  { %p3810_p2 = pnand %p3808_p1, %p3805_p0 }
  0x83   :  { %3813 = shalt.err (!%p3810_p2)
}
  0x84   :  { %s3814_s3 = scalar_lea.vmem %s81_s10, 36864  ;;  %p3819_p4 = scmp.lt.s32.totalorder %s81_s10, %s81_s10 }
  0x85   :  { %p3815_p3 = scmp.ne.s32.totalorder %s81_s10, %s3814_s3  ;;  %p3820_p5 = scmp.lt.s32.totalorder %s3814_s3, %s3814_s3 }
  0x87   :  { %p3821_p6 = por %p3820_p5, %p3819_p4 }
  0x89   :  { %p3822_p7 = pnand %p3821_p6, %p3815_p3 }
  0x8b   :  { %3825 = shalt.err (!%p3822_p7)
}
  0x8c   :  { %86 = dma.hbm_to_vmem [thread:$0]  %s5343_s5, 36864, %s81_s10, [#allocation10], %s3963_s0, %s3963_s0, %s3964_s24  }
  0x8d   :  { %s3826_s29 = scalar_lea.hbm %s5345_s7, 512 }
  0x8e   :  { %p3827_p8 = scmp.ne.s32.totalorder %s5345_s7, %s3826_s29  ;;  %p3830_p9 = scmp.lt.u32.totalorder %s3826_s29, %s5345_s7 }
  0x90   :  { %p3832_p10 = pnand %p3830_p9, %p3827_p8 }
  0x92   :  { %3835 = shalt.err (!%p3832_p10)
}
  0x93   :  { %s3836_s20 = scalar_lea.vmem %s103_s19, 512  ;;  %p3841_p12 = scmp.lt.s32.totalorder %s103_s19, %s103_s19 }
  0x94   :  { %p3837_p11 = scmp.ne.s32.totalorder %s103_s19, %s3836_s20  ;;  %p3842_p13 = scmp.lt.s32.totalorder %s3836_s20, %s3836_s20 }
  0x96   :  { %p3843_p0 = por %p3842_p13, %p3841_p12 }
  0x98   :  { %p3844_p1 = pnand %p3843_p0, %p3837_p11 }
  0x9a   :  { %3847 = shalt.err (!%p3844_p1)
}
  0x9b   :  { %108 = dma.hbm_to_vmem [thread:$0]  %s5345_s7, 512, %s103_s19, [#allocation13], %s3963_s0, %s3963_s0, %s3964_s24  }
  0x9c   :  { %s3967_s16 = smov [#allocation17]   ;;  %s3968_s17 = smov [#allocation20]  }
  0x9d   :  { %s125_s10 = sshll.u32 %s3967_s16, 4  ;;  %s149_s6 = sshll.u32 %s3968_s17, 4  ;;  %s126_s10 = int_to_ptr.vmem [resolvable:$true] %s125_s10  ;;  %s150_s6 = int_to_ptr.vmem [resolvable:$true] %s149_s6 }
  0x9e   :  { %s3848_s23 = scalar_lea.hbm %s5347_s9, 16 }
  0x9f   :  { %p3849_p2 = scmp.ne.s32.totalorder %s5347_s9, %s3848_s23  ;;  %p3852_p3 = scmp.lt.u32.totalorder %s3848_s23, %s5347_s9 }
  0xa1   :  { %p3854_p4 = pnand %p3852_p3, %p3849_p2 }
  0xa3   :  { %3857 = shalt.err (!%p3854_p4)
}
  0xa4   :  { %s3858_s7 = scalar_lea.vmem %s126_s10, 16  ;;  %s3862_s0 = scalar_lea.vmem %s126_s10, 32 }
  0xa5   :  { %p3859_p5 = scmp.ne.s32.totalorder %s126_s10, %s3858_s7  ;;  %p3863_p6 = scmp.lt.s32.totalorder %s126_s10, %s126_s10 }
  0xa6   :  { %p3864_p7 = scmp.lt.s32.totalorder %s3862_s0, %s3858_s7 }
  0xa8   :  { %p3865_p8 = por %p3864_p7, %p3863_p6 }
  0xaa   :  { %p3866_p9 = pnand %p3865_p8, %p3859_p5 }
  0xac   :  { %3869 = shalt.err (!%p3866_p9)
}
  0xad   :  { %128 = dma.hbm_to_vmem [thread:$0]  %s5347_s9, 16, %s126_s10, [#allocation16]  }
  0xae   :  { %s3870_s4 = scalar_lea.hbm %s5350_s12, 16 }
  0xaf   :  { %p3871_p10 = scmp.ne.s32.totalorder %s5350_s12, %s3870_s4  ;;  %p3874_p11 = scmp.lt.u32.totalorder %s3870_s4, %s5350_s12 }
  0xb1   :  { %p3876_p12 = pnand %p3874_p11, %p3871_p10 }
  0xb3   :  { %3879 = shalt.err (!%p3876_p12)
}
  0xb4   :  { %s3880_s2 = scalar_lea.vmem %s150_s6, 16  ;;  %s3884_s28 = scalar_lea.vmem %s150_s6, 32 }
  0xb5   :  { %p3881_p13 = scmp.ne.s32.totalorder %s150_s6, %s3880_s2  ;;  %p3885_p0 = scmp.lt.s32.totalorder %s150_s6, %s150_s6 }
  0xb6   :  { %p3886_p1 = scmp.lt.s32.totalorder %s3884_s28, %s3880_s2 }
  0xb8   :  { %p3887_p2 = por %p3886_p1, %p3885_p0 }
  0xba   :  { %p3888_p3 = pnand %p3887_p2, %p3881_p13 }
  0xbc   :  { %3891 = shalt.err (!%p3888_p3)
}
  0xbd   :  { %152 = dma.hbm_to_vmem [thread:$0]  %s5350_s12, 16, %s150_s6, [#allocation19]  }
  0xbe   :  { %3926 = dma.done.wait [#allocation4], 3584  }
  0xbf   :  { %3927 = vsyncadd [#allocation4], 4294963712 }
  0xc0   :  { %3928 = dma.done.wait [#allocation7], 18560  }
  0xc1   :  { %3929 = vsyncadd [#allocation7], 4294948736 }
  0xc2   :  { %3930 = dma.done.wait [#allocation10], 37152  }
  0xc3   :  { %3931 = vsyncadd [#allocation10], 4294930144 }
  0xc4   :  { %3932 = dma.done.wait [#allocation13], 544  }
  0xc5   :  { %3933 = vsyncadd [#allocation13], 4294966752 }
  0xc6   :  { %3934 = dma.done.wait [#allocation16], 48  }
  0xc7   :  { %3935 = vsyncadd [#allocation16], 4294967248 }
  0xc8   :  { %3936 = dma.done.wait [#allocation19], 4112  }
  0xc9   :  { %3937 = vsyncadd [#allocation19], 4294963184  ;;  %v4200_v1 = vld [vmem:[#allocation3] sm:$0xf]  ;;  %v4202_v2 = vld [vmem:[#allocation3 + $0x4] sm:$0xf] }
  0xca   :  { %5355 = vst [vmem:[#allocation29_spill] sm:$0xff] %v4200_v1  ;;  %5356 = vst [vmem:[#allocation30_spill] sm:$0xff] %v4202_v2  ;;  %v4204_v3 = vld [vmem:[#allocation3 + $0x8] sm:$0xf]  ;;  %v4206_v4 = vld [vmem:[#allocation3 + $0xc] sm:$0xf] }
  0xcb   :  { %5357 = vst [vmem:[#allocation31_spill] sm:$0xff] %v4204_v3  ;;  %5358 = vst [vmem:[#allocation32_spill] sm:$0xff] %v4206_v4  ;;  %v4208_v5 = vld [vmem:[#allocation3 + $0x10] sm:$0xf]  ;;  %v4210_v6 = vld [vmem:[#allocation3 + $0x14] sm:$0xf] }
  0xcc   :  { %5359 = vst [vmem:[#allocation33_spill] sm:$0xff] %v4208_v5  ;;  %5360 = vst [vmem:[#allocation34_spill] sm:$0xff] %v4210_v6  ;;  %v4212_v7 = vld [vmem:[#allocation3 + $0x18] sm:$0xf]  ;;  %v4214_v8 = vld [vmem:[#allocation3 + $0x1c] sm:$0xf] }
  0xcd   :  { %5361 = vst [vmem:[#allocation35_spill] sm:$0xff] %v4212_v7  ;;  %5362 = vst [vmem:[#allocation36_spill] sm:$0xff] %v4214_v8  ;;  %v4216_v9 = vld [vmem:[#allocation3 + $0x20] sm:$0xf]  ;;  %v4218_v10 = vld [vmem:[#allocation3 + $0x24] sm:$0xf] }
  0xce   :  { %5363 = vst [vmem:[#allocation37_spill] sm:$0xff] %v4216_v9  ;;  %5364 = vst [vmem:[#allocation38_spill] sm:$0xff] %v4218_v10  ;;  %v4220_v11 = vld [vmem:[#allocation3 + $0x28] sm:$0xf]  ;;  %v4222_v12 = vld [vmem:[#allocation3 + $0x2c] sm:$0xf] }
  0xcf   :  { %5365 = vst [vmem:[#allocation39_spill] sm:$0xff] %v4220_v11  ;;  %5366 = vst [vmem:[#allocation40_spill] sm:$0xff] %v4222_v12  ;;  %v4224_v13 = vld [vmem:[#allocation3 + $0x30] sm:$0xf]  ;;  %v4226_v14 = vld [vmem:[#allocation3 + $0x34] sm:$0xf] }
  0xd0   :  { %5367 = vst [vmem:[#allocation41_spill] sm:$0xff] %v4224_v13  ;;  %5368 = vst [vmem:[#allocation42_spill] sm:$0xff] %v4226_v14  ;;  %v4228_v15 = vld [vmem:[#allocation3 + $0x38] sm:$0xf]  ;;  %v4230_v16 = vld [vmem:[#allocation3 + $0x3c] sm:$0xf] }
  0xd1   :  { %5369 = vst [vmem:[#allocation43_spill] sm:$0xff] %v4228_v15  ;;  %5370 = vst [vmem:[#allocation44_spill] sm:$0xff] %v4230_v16  ;;  %v4232_v17 = vld [vmem:[#allocation3 + $0x40] sm:$0xf]  ;;  %v4234_v18 = vld [vmem:[#allocation3 + $0x44] sm:$0xf] }
  0xd2   :  { %5371 = vst [vmem:[#allocation45_spill] sm:$0xff] %v4232_v17  ;;  %5372 = vst [vmem:[#allocation46_spill] sm:$0xff] %v4234_v18  ;;  %v4236_v19 = vld [vmem:[#allocation3 + $0x48] sm:$0xf]  ;;  %v4238_v20 = vld [vmem:[#allocation3 + $0x4c] sm:$0xf] }
  0xd3   :  { %5373 = vst [vmem:[#allocation47_spill] sm:$0xff] %v4236_v19  ;;  %5374 = vst [vmem:[#allocation48_spill] sm:$0xff] %v4238_v20  ;;  %v4240_v21 = vld [vmem:[#allocation3 + $0x50] sm:$0xf]  ;;  %v4242_v22 = vld [vmem:[#allocation3 + $0x54] sm:$0xf] }
  0xd4   :  { %5375 = vst [vmem:[#allocation49_spill] sm:$0xff] %v4240_v21  ;;  %5376 = vst [vmem:[#allocation50_spill] sm:$0xff] %v4242_v22  ;;  %v4244_v23 = vld [vmem:[#allocation3 + $0x58] sm:$0xf]  ;;  %v4246_v24 = vld [vmem:[#allocation3 + $0x5c] sm:$0xf] }
  0xd5   :  { %5377 = vst [vmem:[#allocation51_spill] sm:$0xff] %v4244_v23  ;;  %5378 = vst [vmem:[#allocation52_spill] sm:$0xff] %v4246_v24  ;;  %v4248_v25 = vld [vmem:[#allocation3 + $0x60] sm:$0xf]  ;;  %v4250_v26 = vld [vmem:[#allocation3 + $0x64] sm:$0xf] }
  0xd6   :  { %5379 = vst [vmem:[#allocation53_spill] sm:$0xff] %v4248_v25  ;;  %5380 = vst [vmem:[#allocation54_spill] sm:$0xff] %v4250_v26  ;;  %v4252_v27 = vld [vmem:[#allocation3 + $0x68] sm:$0xf]  ;;  %v4254_v28 = vld [vmem:[#allocation3 + $0x6c] sm:$0xf] }
  0xd7   :  { %5381 = vst [vmem:[#allocation55_spill] sm:$0xff] %v4252_v27  ;;  %5382 = vst [vmem:[#allocation56_spill] sm:$0xff] %v4254_v28  ;;  %v4256_v29 = vld [vmem:[#allocation3 + $0x70] sm:$0xf]  ;;  %v4258_v30 = vld [vmem:[#allocation3 + $0x74] sm:$0xf] }
  0xd8   :  { %5383 = vst [vmem:[#allocation57_spill] sm:$0xff] %v4256_v29  ;;  %5384 = vst [vmem:[#allocation58_spill] sm:$0xff] %v4258_v30  ;;  %v4260_v31 = vld [vmem:[#allocation3 + $0x78] sm:$0xf]  ;;  %v4262_v32 = vld [vmem:[#allocation3 + $0x7c] sm:$0xf] }
  0xd9   :  { %5385 = vst [vmem:[#allocation59_spill] sm:$0xff] %v4260_v31  ;;  %5386 = vst [vmem:[#allocation60_spill] sm:$0xff] %v4262_v32  ;;  %v4264_v33 = vld [vmem:[#allocation3 + $0x80] sm:$0xf]  ;;  %v4266_v34 = vld [vmem:[#allocation3 + $0x84] sm:$0xf] }
  0xda   :  { %5387 = vst [vmem:[#allocation61_spill] sm:$0xff] %v4264_v33  ;;  %5388 = vst [vmem:[#allocation62_spill] sm:$0xff] %v4266_v34  ;;  %v4268_v35 = vld [vmem:[#allocation3 + $0x88] sm:$0xf]  ;;  %v4270_v36 = vld [vmem:[#allocation3 + $0x8c] sm:$0xf] }
  0xdb   :  { %5389 = vst [vmem:[#allocation63_spill] sm:$0xff] %v4268_v35  ;;  %5390 = vst [vmem:[#allocation64_spill] sm:$0xff] %v4270_v36  ;;  %v4272_v37 = vld [vmem:[#allocation3 + $0x90] sm:$0xf]  ;;  %v4274_v38 = vld [vmem:[#allocation3 + $0x94] sm:$0xf] }
  0xdc   :  { %5391 = vst [vmem:[#allocation65_spill] sm:$0xff] %v4272_v37  ;;  %5392 = vst [vmem:[#allocation66_spill] sm:$0xff] %v4274_v38  ;;  %v4276_v39 = vld [vmem:[#allocation3 + $0x98] sm:$0xf]  ;;  %v4278_v40 = vld [vmem:[#allocation3 + $0x9c] sm:$0xf] }
  0xdd   :  { %5393 = vst [vmem:[#allocation67_spill] sm:$0xff] %v4276_v39  ;;  %5394 = vst [vmem:[#allocation68_spill] sm:$0xff] %v4278_v40  ;;  %v4280_v41 = vld [vmem:[#allocation3 + $0xa0] sm:$0xf]  ;;  %v4282_v42 = vld [vmem:[#allocation3 + $0xa4] sm:$0xf] }
  0xde   :  { %5395 = vst [vmem:[#allocation69_spill] sm:$0xff] %v4280_v41  ;;  %5396 = vst [vmem:[#allocation70_spill] sm:$0xff] %v4282_v42  ;;  %v4284_v43 = vld [vmem:[#allocation3 + $0xa8] sm:$0xf]  ;;  %v4286_v44 = vld [vmem:[#allocation3 + $0xac] sm:$0xf] }
  0xdf   :  { %5397 = vst [vmem:[#allocation71_spill] sm:$0xff] %v4284_v43  ;;  %5398 = vst [vmem:[#allocation72_spill] sm:$0xff] %v4286_v44  ;;  %v4288_v45 = vld [vmem:[#allocation3 + $0xb0] sm:$0xf]  ;;  %v4290_v46 = vld [vmem:[#allocation3 + $0xb4] sm:$0xf] }
  0xe0   :  { %5399 = vst [vmem:[#allocation73_spill] sm:$0xff] %v4288_v45  ;;  %5400 = vst [vmem:[#allocation74_spill] sm:$0xff] %v4290_v46  ;;  %v4292_v47 = vld [vmem:[#allocation3 + $0xb8] sm:$0xf]  ;;  %v4294_v48 = vld [vmem:[#allocation3 + $0xbc] sm:$0xf] }
  0xe1   :  { %5401 = vst [vmem:[#allocation75_spill] sm:$0xff] %v4292_v47  ;;  %5402 = vst [vmem:[#allocation76_spill] sm:$0xff] %v4294_v48  ;;  %v4296_v49 = vld [vmem:[#allocation3 + $0xc0] sm:$0xf]  ;;  %v4298_v50 = vld [vmem:[#allocation3 + $0xc4] sm:$0xf] }
  0xe2   :  { %v4300_v51 = vld [vmem:[#allocation3 + $0xc8] sm:$0xf]  ;;  %v4302_v52 = vld [vmem:[#allocation3 + $0xcc] sm:$0xf]  ;;  %v4304_v53 = vld [vmem:[#allocation3 + $0xd0] sm:$0xf] }
  0xe3   :  { %v4306_v54 = vld [vmem:[#allocation3 + $0xd4] sm:$0xf]  ;;  %v4308_v55 = vld [vmem:[#allocation3 + $0xd8] sm:$0xf]  ;;  %v4310_v56 = vld [vmem:[#allocation3 + $0xdc] sm:$0xf] }
  0xe4   :  { %v4312_v57 = vmov 0.0   ;;  %v4314_v58 = vmov 0.0   ;;  %s4316_s12 = smov 0  }
  0xe5 LB: > { %5403 = vst [vmem:[#allocation77_spill] sm:$0xff] %v3942_v57  ;;  %5404 = vst [vmem:[#allocation78_spill] sm:$0xff] %v3946_v58  ;;  %v5352_v59 = vmov 0   ;;  %s3368_s5 = sshll.u32 %s3950_s12, 7  ;;  %s3369_s16 = sshll.u32 %s3950_s12, 8  ;;  %v5405_v2 = vld [vmem:[#allocation30_spill] sm:$0xff]  ;;  %s3950_s12 = sphi %s4316_s12, %s248_s12   ;;  %v3946_v58 = vphi %v4314_v58, %v5459_v58   ;;  %v3942_v57 = vphi %v4312_v57, %v5458_v57  }
  0xe6   : > { %564 = vmatprep.mubr.bf16.mxu0 %v5352_v59  ;;  %714 = vmatprep.mubr.bf16.mxu1 %v5352_v59  ;;  %s4330_s15 = scalar_lea.vmem [#allocation8], %s3368_s5  ;;  %s4342_s10 = scalar_lea.vmem [#allocation11], %s3369_s16  ;;  %v5406_v1 = vld [vmem:[#allocation29_spill] sm:$0xff]  ;;  %v5407_v32 = vld [vmem:[#allocation60_spill] sm:$0xff]  ;;  %v5408_v31 = vld [vmem:[#allocation59_spill] sm:$0xff]  ;;  %vm1232_vm0 = vcmask 1041409  }
  0xe7   : > { %v3474_v60 = vld [vmem:[%s4330_s15 + $0x4] ss:$8 sps:$4 sm:$0xff]   ;;  %v3476_v61 = vld [vmem:[%s4330_s15] ss:$8 sps:$4 sm:$0xff]   ;;  %v3477_v62 = vld [vmem:[%s4330_s15 + $0x14] ss:$8 sps:$4 sm:$0xff]  }
  0xe8   : > { %532 = vmatprep.subr.bf16.mxu0 %v3474_v60  ;;  %3414 = vmatprep.subr.bf16.mxu1 %v3474_v60  ;;  %v3479_v63 = vld [vmem:[%s4330_s15 + $0x10] ss:$8 sps:$4 sm:$0xff]   ;;  %v3480_v0 = vld [vmem:[%s4330_s15 + $0x24] ss:$8 sps:$4 sm:$0xff]   ;;  %v3482_v59 = vld [vmem:[%s4330_s15 + $0x20] ss:$8 sps:$4 sm:$0xff]  }
  0xe9   : > { %533 = vmatpush1.bf16.msra.mxu0 %v3476_v61  ;;  %3422 = vmatpush1.bf16.msra.mxu1 %v3476_v61  ;;  %v3483_v57 = vld [vmem:[%s4330_s15 + $0x34] ss:$8 sps:$4 sm:$0xff]   ;;  %v3485_v58 = vld [vmem:[%s4330_s15 + $0x30] ss:$8 sps:$4 sm:$0xff]   ;;  %v3486_v29 = vld [vmem:[%s4330_s15 + $0x44] ss:$8 sps:$4 sm:$0xff]  }
  0xea   : > { %534 = vmatprep.subr.bf16.mxu0 %v3477_v62  ;;  %3415 = vmatprep.subr.bf16.mxu1 %v3477_v62  ;;  %v3488_v60 = vld [vmem:[%s4330_s15 + $0x40] ss:$8 sps:$4 sm:$0xff]   ;;  %v3489_v61 = vld [vmem:[%s4330_s15 + $0x54] ss:$8 sps:$4 sm:$0xff]   ;;  %v3491_v62 = vld [vmem:[%s4330_s15 + $0x50] ss:$8 sps:$4 sm:$0xff]  }
  0xeb   : > { %v5410_v4 = vld [vmem:[#allocation32_spill] sm:$0xff]  ;;  %v5411_v3 = vld [vmem:[#allocation31_spill] sm:$0xff]  ;;  %v5412_v34 = vld [vmem:[#allocation62_spill] sm:$0xff]  ;;  %s3234_s17 = sshll.u32 %s3950_s12, 1  ;;  %vm1234_vm1 = vcmask 1042434   ;;  %vm1236_vm2 = vcmask 1043459  }
  0xec   : > { %v5413_v33 = vld [vmem:[#allocation61_spill] sm:$0xff]  ;;  %v5414_v6 = vld [vmem:[#allocation34_spill] sm:$0xff]  ;;  %v5416_v36 = vld [vmem:[#allocation64_spill] sm:$0xff]  ;;  %s271_s6 = scalar_lea.vmem [#allocation9], %s3234_s17  ;;  %vm1238_vm3 = vcmask 1044484   ;;  %vm1240_vm4 = vcmask 1045509  }
  0xed   : > { %535 = vmatpush1.bf16.msra.mxu0 %v3479_v63  ;;  %3423 = vmatpush1.bf16.msra.mxu1 %v3479_v63  ;;  %v3492_v63 = vld [vmem:[%s4330_s15 + $0x64] ss:$8 sps:$4 sm:$0xff]   ;;  %v5417_v35 = vld [vmem:[#allocation63_spill] sm:$0xff]  ;;  %v5420_v38 = vld [vmem:[#allocation66_spill] sm:$0xff]  ;;  %vm1242_vm5 = vcmask 1046534   ;;  %vm1244_vm6 = vcmask 1047559  }
  0xee   : > { %536 = vmatprep.subr.bf16.mxu0 %v3480_v0  ;;  %3416 = vmatprep.subr.bf16.mxu1 %v3480_v0  ;;  %v3494_v0 = vld [vmem:[%s4330_s15 + $0x60] ss:$8 sps:$4 sm:$0xff]   ;;  %v5422_v10 = vld [vmem:[#allocation38_spill] sm:$0xff]  ;;  %s248_s12 = sadd.s32 1, %s3950_s12  }
  0xef   : > { %v5415_v5 = vld [vmem:[#allocation33_spill] sm:$0xff]  ;;  %v5418_v8 = vld [vmem:[#allocation36_spill] sm:$0xff]  ;;  %v5419_v7 = vld [vmem:[#allocation35_spill] sm:$0xff]  ;;  %p245_p4 = scmp.ge.s32.totalorder %s248_s12, 9  }
  0xf0   : > { %v5421_v37 = vld [vmem:[#allocation65_spill] sm:$0xff]  ;;  %v5424_v40 = vld [vmem:[#allocation68_spill] sm:$0xff]  ;;  %v5425_v39 = vld [vmem:[#allocation67_spill] sm:$0xff]  ;;  %vm1566_vm7 = vcmask (%p245_p4), 261120   ;;  %vm2014_vm8 = vcmask (%p245_p4), 130112   ;;  %vm2094_vm9 = vcmask (%p245_p4), 130048  }
  0xf1   : > { %537 = vmatpush1.bf16.msra.mxu0 %v3482_v59  ;;  %3424 = vmatpush1.bf16.msra.mxu1 %v3482_v59  ;;  %v3495_v59 = vld [vmem:[%s4330_s15 + $0x74] ss:$8 sps:$4 sm:$0xff]   ;;  %v5423_v9 = vld [vmem:[#allocation37_spill] sm:$0xff]  ;;  %v5426_v12 = vld [vmem:[#allocation40_spill] sm:$0xff] }
  0xf2   : > { %538 = vmatprep.subr.bf16.mxu0 %v3483_v57  ;;  %3417 = vmatprep.subr.bf16.mxu1 %v3483_v57  ;;  %v3497_v57 = vld [vmem:[%s4330_s15 + $0x70] ss:$8 sps:$4 sm:$0xff]   ;;  %v5432_v44 = vld [vmem:[#allocation72_spill] sm:$0xff] }
  0xf3   : > { %v5427_v11 = vld [vmem:[#allocation39_spill] sm:$0xff]  ;;  %v5428_v42 = vld [vmem:[#allocation70_spill] sm:$0xff]  ;;  %v5429_v41 = vld [vmem:[#allocation69_spill] sm:$0xff] }
  0xf4   : > { %v5430_v14 = vld [vmem:[#allocation42_spill] sm:$0xff]  ;;  %v5431_v13 = vld [vmem:[#allocation41_spill] sm:$0xff]  ;;  %v5433_v43 = vld [vmem:[#allocation71_spill] sm:$0xff] }
  0xf5   : > { %539 = vmatpush1.bf16.msra.mxu0 %v3485_v58  ;;  %3425 = vmatpush1.bf16.msra.mxu1 %v3485_v58  ;;  %v3250_v58 = vcombine.low %v5408_v31, %v5407_v32  ;;  %v5434_v16 = vld [vmem:[#allocation44_spill] sm:$0xff]  ;;  %v5435_v15 = vld [vmem:[#allocation43_spill] sm:$0xff]  ;;  %v5436_v46 = vld [vmem:[#allocation74_spill] sm:$0xff] }
  0xf6   : > { %540 = vmatprep.subr.bf16.mxu0 %v3486_v29  ;;  %3418 = vmatprep.subr.bf16.mxu1 %v3486_v29  ;;  %v3235_v29 = vcombine.low %v5406_v1, %v5405_v2  ;;  %v5437_v45 = vld [vmem:[#allocation73_spill] sm:$0xff]  ;;  %v5438_v18 = vld [vmem:[#allocation46_spill] sm:$0xff]  ;;  %v5440_v48 = vld [vmem:[#allocation76_spill] sm:$0xff] }
  0xf7   : > { %v5439_v17 = vld [vmem:[#allocation45_spill] sm:$0xff]  ;;  %v5441_v47 = vld [vmem:[#allocation75_spill] sm:$0xff]  ;;  %v5442_v20 = vld [vmem:[#allocation48_spill] sm:$0xff] }
  0xf8   : > { %v5443_v19 = vld [vmem:[#allocation47_spill] sm:$0xff]  ;;  %v5444_v22 = vld [vmem:[#allocation50_spill] sm:$0xff]  ;;  %v5445_v21 = vld [vmem:[#allocation49_spill] sm:$0xff] }
  0xf9   : > { %541 = vmatpush1.bf16.msra.mxu0 %v3488_v60  ;;  %3426 = vmatpush1.bf16.msra.mxu1 %v3488_v60  ;;  %v5409_v60 = vmov 0   ;;  %v5446_v24 = vld [vmem:[#allocation52_spill] sm:$0xff]  ;;  %v5447_v23 = vld [vmem:[#allocation51_spill] sm:$0xff]  ;;  %v5448_v26 = vld [vmem:[#allocation54_spill] sm:$0xff] }
  0xfa   : > { %542 = vmatprep.subr.bf16.mxu0 %v3489_v61  ;;  %3419 = vmatprep.subr.bf16.mxu1 %v3489_v61  ;;  %v3236_v61 = vcombine.low %v5411_v3, %v5410_v4  ;;  %v5449_v25 = vld [vmem:[#allocation53_spill] sm:$0xff]  ;;  %v5450_v28 = vld [vmem:[#allocation56_spill] sm:$0xff]  ;;  %v5451_v27 = vld [vmem:[#allocation55_spill] sm:$0xff] }
  0xfb   : > { %v5452_v30 = vld [vmem:[#allocation58_spill] sm:$0xff] }
  0xfc   : > { %v3521_v1 = vld [vmem:[%s4342_s10 + $0x74] ss:$8 sps:$4 sm:$0xff]  }
  0xfd   : > { %543 = vmatpush1.bf16.msra.mxu0 %v3491_v62  ;;  %3427 = vmatpush1.bf16.msra.mxu1 %v3491_v62  ;;  %v3251_v62 = vcombine.low %v5413_v33, %v5412_v34 }
  0xfe   : > { %544 = vmatprep.subr.bf16.mxu0 %v3492_v63  ;;  %3420 = vmatprep.subr.bf16.mxu1 %v3492_v63  ;;  %v3237_v63 = vcombine.low %v5415_v5, %v5414_v6 }
 0x101   : > { %545 = vmatpush1.bf16.msra.mxu0 %v3494_v0  ;;  %3428 = vmatpush1.bf16.msra.mxu1 %v3494_v0  ;;  %v3252_v0 = vcombine.low %v5417_v35, %v5416_v36 }
 0x102   : > { %546 = vmatprep.subr.bf16.mxu0 %v3495_v59  ;;  %3421 = vmatprep.subr.bf16.mxu1 %v3495_v59  ;;  %v3238_v59 = vcombine.low %v5419_v7, %v5418_v8 }
 0x105   : > { %547 = vmatpush1.bf16.msra.mxu0 %v3497_v57  ;;  %3429 = vmatpush1.bf16.msra.mxu1 %v3497_v57  ;;  %v3253_v57 = vcombine.low %v5421_v37, %v5420_v38 }
 0x108   : > { %565 = vmatmul.mubr.bf16.vlgmr.msra.gmra.mrb[0].mxu0 %v3235_v29  ;;  %715 = vmatmul.mubr.bf16.vlgmr.msra.gmra.mrb[0].mxu1 %v3250_v58  ;;  %v3239_v29 = vcombine.low %v5423_v9, %v5422_v10  ;;  %v3254_v58 = vcombine.low %v5425_v39, %v5424_v40  ;;  %v3530_v9 = vld [vmem:[%s4342_s10 + $0xa4] ss:$8 sps:$4 sm:$0xff]  }
 0x109   : > { %574 = vmatprep.mubr.bf16.mxu0 %v5409_v60  ;;  %724 = vmatprep.mubr.bf16.mxu1 %v5409_v60 }
 0x110   : > { %575 = vmatmul.mubr.bf16.gmra.mrb[4].mxu0 %v3236_v61  ;;  %725 = vmatmul.mubr.bf16.gmra.mrb[4].mxu1 %v3251_v62  ;;  %v3240_v61 = vcombine.low %v5427_v11, %v5426_v12  ;;  %v3255_v62 = vcombine.low %v5429_v41, %v5428_v42  ;;  %v3528_v11 = vld [vmem:[%s4342_s10 + $0xa0] ss:$8 sps:$4 sm:$0xff]  }
 0x111   : > { %584 = vmatprep.mubr.bf16.mxu0 %v5409_v60  ;;  %734 = vmatprep.mubr.bf16.mxu1 %v5409_v60 }
 0x118   : > { %585 = vmatmul.mubr.bf16.gmra.mrb[8].mxu0 %v3237_v63  ;;  %735 = vmatmul.mubr.bf16.gmra.mrb[8].mxu1 %v3252_v0  ;;  %v3241_v63 = vcombine.low %v5431_v13, %v5430_v14  ;;  %v3256_v0 = vcombine.low %v5433_v43, %v5432_v44 }
 0x119   : > { %594 = vmatprep.mubr.bf16.mxu0 %v5409_v60  ;;  %744 = vmatprep.mubr.bf16.mxu1 %v5409_v60 }
 0x120   : > { %595 = vmatmul.mubr.bf16.gmra.mrb[12].mxu0 %v3238_v59  ;;  %745 = vmatmul.mubr.bf16.gmra.mrb[12].mxu1 %v3253_v57  ;;  %v3242_v59 = vcombine.low %v5435_v15, %v5434_v16  ;;  %v3257_v57 = vcombine.low %v5437_v45, %v5436_v46  ;;  %v3533_v15 = vld [vmem:[%s4342_s10 + $0xb4] ss:$8 sps:$4 sm:$0xff]   ;;  %v3531_v16 = vld [vmem:[%s4342_s10 + $0xb0] ss:$8 sps:$4 sm:$0xff]  }
 0x121   : > { %604 = vmatprep.mubr.bf16.mxu0 %v5409_v60  ;;  %754 = vmatprep.mubr.bf16.mxu1 %v5409_v60 }
 0x128   : > { %605 = vmatmul.mubr.bf16.gmra.mrb[16].mxu0 %v3239_v29  ;;  %755 = vmatmul.mubr.bf16.gmra.mrb[16].mxu1 %v3254_v58  ;;  %v3243_v29 = vcombine.low %v5439_v17, %v5438_v18  ;;  %v3258_v58 = vcombine.low %v5441_v47, %v5440_v48 }
 0x129   : > { %614 = vmatprep.mubr.bf16.mxu0 %v5409_v60  ;;  %764 = vmatprep.mubr.bf16.mxu1 %v5409_v60 }
 0x130   : > { %615 = vmatmul.mubr.bf16.gmra.mrb[20].mxu0 %v3240_v61  ;;  %765 = vmatmul.mubr.bf16.gmra.mrb[20].mxu1 %v3255_v62  ;;  %v3244_v61 = vcombine.low %v5443_v19, %v5442_v20  ;;  %v3259_v62 = vcombine.low %v4296_v49, %v4298_v50  ;;  %v4698_v49 = vld [vmem:[%s5339_s1 + $0x10] sm:$0xff] (%p245_p4)   ;;  %v3970_v50 = vmov (%p245_p4), 0  }
 0x131   : > { %624 = vmatprep.mubr.bf16.mxu0 %v5409_v60  ;;  %774 = vmatprep.mubr.bf16.mxu1 %v5409_v60 }
 0x132   :  { %3546 = vset.pattern.permute.xlu0 (%p245_p4), %v3970_v50  ;;  %3547 = vset.pattern.permute.xlu1 (%p245_p4), %v3970_v50 }
 0x138   : > { %625 = vmatmul.mubr.bf16.gmra.mrb[24].mxu0 %v3241_v63  ;;  %775 = vmatmul.mubr.bf16.gmra.mrb[24].mxu1 %v3256_v0  ;;  %v3245_v63 = vcombine.low %v5445_v21, %v5444_v22  ;;  %v3260_v0 = vcombine.low %v4300_v51, %v4302_v52  ;;  %v3539_v21 = vld [vmem:[%s4342_s10 + $0xd4] ss:$8 sps:$4 sm:$0xff]   ;;  %v1709_v52 = vunpack.c.h.bf16 (%p245_p4), %v4698_v49 }
 0x139   : > { %634 = vmatprep.mubr.bf16.mxu0 %v5409_v60  ;;  %784 = vmatprep.mubr.bf16.mxu1 %v5409_v60 }
 0x140   : > { %635 = vmatmul.mubr.bf16.gmra.mrb[28].mxu0 %v3242_v59  ;;  %785 = vmatmul.mubr.bf16.gmra.mrb[28].mxu1 %v3257_v57  ;;  %v3246_v59 = vcombine.low %v5447_v23, %v5446_v24  ;;  %v3261_v57 = vcombine.low %v4304_v53, %v4306_v54  ;;  %v3537_v23 = vld [vmem:[%s4342_s10 + $0xd0] ss:$8 sps:$4 sm:$0xff]  }
 0x141   : > { %644 = vmatprep.mubr.bf16.mxu0 %v5409_v60  ;;  %794 = vmatprep.mubr.bf16.mxu1 %v5409_v60 }
 0x148   : > { %645 = vmatmul.mubr.bf16.gmra.mrb[32].mxu0 %v3243_v29  ;;  %795 = vmatmul.mubr.bf16.gmra.mrb[32].mxu1 %v3258_v58  ;;  %v3247_v29 = vcombine.low %v5449_v25, %v5448_v26  ;;  %v3262_v58 = vcombine.low %v4308_v55, %v4310_v56  ;;  %v1708_v56 = vunpack.c.l.bf16 (%p245_p4), %v4698_v49 }
 0x149   : > { %654 = vmatprep.mubr.bf16.mxu0 %v5409_v60  ;;  %804 = vmatprep.mubr.bf16.mxu1 %v5409_v60 }
 0x150   : > { %655 = vmatmul.mubr.bf16.gmra.mrb[36].mxu0 %v3244_v61  ;;  %805 = vmatmul.mubr.bf16.gmra.mrb[36].mxu1 %v3259_v62  ;;  %v3248_v61 = vcombine.low %v5451_v27, %v5450_v28  ;;  %v5453_v62 = vld [vmem:[#allocation57_spill] sm:$0xff] }
 0x151   : > { %664 = vmatprep.mubr.bf16.mxu0 %v5409_v60  ;;  %814 = vmatprep.mubr.bf16.mxu1 %v5409_v60 }
 0x158   : > { %665 = vmatmul.mubr.bf16.gmra.mrb[40].mxu0 %v3245_v63  ;;  %815 = vmatmul.mubr.bf16.gmra.mrb[40].mxu1 %v3260_v0  ;;  %v3249_v63 = vcombine.low %v5453_v62, %v5452_v30  ;;  %v3498_v0 = vld [vmem:[%s4342_s10] ss:$8 sps:$4 sm:$0xff]   ;;  %v3507_v62 = vld [vmem:[%s4342_s10 + $0x30] ss:$8 sps:$4 sm:$0xff]  }
 0x159   : > { %674 = vmatprep.mubr.bf16.mxu0 %v5409_v60  ;;  %824 = vmatprep.mubr.bf16.mxu1 %v5409_v60 }
 0x160   : > { %675 = vmatmul.mubr.bf16.gmra.mrb[44].mxu0 %v3246_v59  ;;  %825 = vmatmul.mubr.bf16.gmra.mrb[44].mxu1 %v3261_v57  ;;  %v3500_v59 = vld [vmem:[%s4342_s10 + $0x4] ss:$8 sps:$4 sm:$0xff]   ;;  %v3503_v57 = vld [vmem:[%s4342_s10 + $0x14] ss:$8 sps:$4 sm:$0xff]  }
 0x161   : > { %684 = vmatprep.mubr.bf16.mxu0 %v5409_v60  ;;  %834 = vmatprep.mubr.bf16.mxu1 %v5409_v60 }
 0x162   : > { %1417 = vmatprep.subr.bf16.mxu1 %v3500_v59  ;;  %v3513_v59 = vld [vmem:[%s4342_s10 + $0x50] ss:$8 sps:$4 sm:$0xff]  }
 0x163   : > { %1418 = vmatpush1.bf16.msra.mxu1 %v3498_v0  ;;  %v3510_v0 = vld [vmem:[%s4342_s10 + $0x40] ss:$8 sps:$4 sm:$0xff]  }
 0x164   : > { %1419 = vmatprep.subr.bf16.mxu1 %v3503_v57  ;;  %v3515_v57 = vld [vmem:[%s4342_s10 + $0x54] ss:$8 sps:$4 sm:$0xff]  }
 0x168   : > { %685 = vmatmul.mubr.bf16.gmra.mrb[48].mxu0 %v3247_v29  ;;  %835 = vmatmul.mubr.bf16.gmra.mrb[48].mxu1 %v3262_v58  ;;  %v3501_v29 = vld [vmem:[%s4342_s10 + $0x10] ss:$8 sps:$4 sm:$0xff]   ;;  %v3506_v58 = vld [vmem:[%s4342_s10 + $0x24] ss:$8 sps:$4 sm:$0xff]  }
 0x169   : > { %694 = vmatprep.mubr.bf16.mxu0 %v5409_v60  ;;  %1420 = vmatpush1.bf16.msra.mxu1 %v3501_v29  ;;  %v3518_v29 = vld [vmem:[%s4342_s10 + $0x64] ss:$8 sps:$4 sm:$0xff]  }
 0x16a   : > { %1421 = vmatprep.subr.bf16.mxu1 %v3506_v58  ;;  %v3516_v58 = vld [vmem:[%s4342_s10 + $0x60] ss:$8 sps:$4 sm:$0xff]  }
 0x170   : > { %695 = vmatmul.mubr.bf16.gmra.mrb[52].mxu0 %v3248_v61  ;;  %v3509_v61 = vld [vmem:[%s4342_s10 + $0x34] ss:$8 sps:$4 sm:$0xff]  }
 0x171   : > { %704 = vmatprep.mubr.bf16.mxu0 %v5409_v60  ;;  %v3504_v60 = vld [vmem:[%s4342_s10 + $0x20] ss:$8 sps:$4 sm:$0xff]  }
 0x172   : > { %1422 = vmatpush1.bf16.msra.mxu1 %v3504_v60  ;;  %v3519_v60 = vld [vmem:[%s4342_s10 + $0x70] ss:$8 sps:$4 sm:$0xff]  }
 0x173   : > { %1423 = vmatprep.subr.bf16.mxu1 %v3509_v61  ;;  %v3524_v61 = vld [vmem:[%s4342_s10 + $0x84] ss:$8 sps:$4 sm:$0xff]  }
 0x176   : > { %1424 = vmatpush1.bf16.msra.mxu1 %v3507_v62  ;;  %v5354_v62 = vlaneseq }
 0x178   : > { %705 = vmatmul.mubr.bf16.gmra.mrb[56].mxu0 %v3249_v63  ;;  %v3512_v63 = vld [vmem:[%s4342_s10 + $0x44] ss:$8 sps:$4 sm:$0xff]  }
 0x179   : > { %1425 = vmatprep.subr.bf16.mxu1 %v3512_v63  ;;  %v3522_v63 = vld [vmem:[%s4342_s10 + $0x80] ss:$8 sps:$4 sm:$0xff]   ;;  %1623 = vmatprep.mubr.bf16.mxu0 (%p245_p4), %v3970_v50 }
 0x17a   : > { %1426 = vmatpush1.bf16.msra.mxu1 %v3510_v0  ;;  %v4453_v0 = vshrl.u32 %v5354_v62, 7 }
 0x17b   : > { %1427 = vmatprep.subr.bf16.mxu1 %v3515_v57  ;;  %v272_v57 = vld [vmem:[%s271_s6] sm:$0x3] }
 0x17e   : > { %1428 = vmatpush1.bf16.msra.mxu1 %v3513_v59  ;;  %v4456_v59 = vsub.s32 0, %v4453_v0 }
 0x17f   : > { %1429 = vmatprep.subr.bf16.mxu1 %v3518_v29  ;;  %v4459_v29 = vsub.s32 1, %v4453_v0 }
 0x182   : > { %1430 = vmatpush1.bf16.msra.mxu1 %v3516_v58  ;;  %v4465_v58 = vrot.slane %v272_v57, %v4459_v29 }
 0x183   : > { %1431 = vmatprep.subr.bf16.mxu1 %v3521_v1  ;;  %v4462_v1 = vrot.slane %v272_v57, %v4456_v59 }
 0x186   : > { %1432 = vmatpush1.bf16.msra.mxu1 %v3519_v60  ;;  %v3527_v60 = vld [vmem:[%s4342_s10 + $0x94] ss:$8 sps:$4 sm:$0xff]  }
 0x187   : > { %1433 = vmatprep.subr.bf16.mxu1 %v3524_v61  ;;  %v3525_v61 = vld [vmem:[%s4342_s10 + $0x90] ss:$8 sps:$4 sm:$0xff]  }
 0x18a   : > { %1434 = vmatpush1.bf16.msra.mxu1 %v3522_v63 }
 0x18b   : > { %1435 = vmatprep.subr.bf16.mxu1 %v3527_v60 }
 0x18e   : > { %1436 = vmatpush1.bf16.msra.mxu1 %v3525_v61 }
 0x18f   : > { %1437 = vmatprep.subr.bf16.mxu1 %v3530_v9 }
 0x192   : > { %1438 = vmatpush1.bf16.msra.mxu1 %v3528_v11 }
 0x193   : > { %1439 = vmatprep.subr.bf16.mxu1 %v3533_v15 }
 0x196   : > { %1440 = vmatpush1.bf16.msra.mxu1 %v3531_v16  ;;  %v3534_v16 = vld [vmem:[%s4342_s10 + $0xc0] ss:$8 sps:$4 sm:$0xff]  }
 0x1db   : > { %v566_v62 = vpop.f32.mrb[0].mxu0  ;;  %v716_v2 = vpop.f32.mrb[0].mxu1 }
 0x1dc   : > { %v567_v63 = vadd.f32 %v566_v62, %v4462_v1  ;;  %v568_v3 = vpop.f32.mrb[1].mxu0  ;;  %v4471_v4 = vadd.f32 %v716_v2, %v4462_v1  ;;  %v718_v5 = vpop.f32.mrb[1].mxu1 }
 0x1dd   : > { %v569_v6 = vadd.f32 %v568_v3, %v4465_v58  ;;  %v570_v7 = vpop.f32.mrb[2].mxu0  ;;  %v4475_v57 = vadd.f32 %v718_v5, %v4465_v58  ;;  %v720_v8 = vpop.f32.mrb[2].mxu1 }
 0x1de   : > { %v571_v60 = vadd.f32 %v570_v7, %v4462_v1  ;;  %v572_v10 = vpop.f32.mrb[3].mxu0  ;;  %v4480_v62 = vadd.f32 %v720_v8, %v4462_v1  ;;  %v722_v2 = vpop.f32.mrb[3].mxu1  ;;  %v845_v5 = vmax.f32 %v567_v63, 0.0 }
 0x1df   : > { %v573_v61 = vadd.f32 %v572_v10, %v4465_v58  ;;  %v4485_v3 = vadd.f32 %v722_v2, %v4465_v58  ;;  %v846_v13 = vmax.f32 %v569_v6, 0.0 }
 0x1e0   : > { %v847_v12 = vmax.f32 %v571_v60, 0.0 }
 0x1e1   : > { %v848_v14 = vmax.f32 %v573_v61, 0.0 }
 0x1e2   : > { %v957_v7 = vadd.f32 %v847_v12, %v845_v5 }
 0x1e3   : > { %v969_v17 = vadd.f32 %v848_v14, %v846_v13  ;;  %v576_v8 = vpop.f32.mrb[4].mxu0  ;;  %v726_v18 = vpop.f32.mrb[4].mxu1  ;;  %v3536_v13 = vld [vmem:[%s4342_s10 + $0xc4] ss:$8 sps:$4 sm:$0xff]  }
 0x1e4   : > { %v577_v10 = vadd.f32 %v576_v8, %v4462_v1  ;;  %v578_v19 = vpop.f32.mrb[5].mxu0  ;;  %v4491_v2 = vadd.f32 %v726_v18, %v4462_v1  ;;  %v728_v9 = vpop.f32.mrb[5].mxu1  ;;  %1441 = vmatprep.subr.bf16.mxu1 %v3536_v13 }
 0x1e5   : > { %v579_v6 = vadd.f32 %v578_v19, %v4465_v58  ;;  %v580_v11 = vpop.f32.mrb[6].mxu0  ;;  %v4495_v63 = vadd.f32 %v728_v9, %v4465_v58  ;;  %v730_v12 = vpop.f32.mrb[6].mxu1  ;;  %1442 = vmatpush1.bf16.msra.mxu1 %v3534_v16 }
 0x1e6   : > { %v849_v14 = vmax.f32 %v577_v10, 0.0  ;;  %v581_v15 = vadd.f32 %v580_v11, %v4462_v1  ;;  %v582_v60 = vpop.f32.mrb[7].mxu0  ;;  %v4500_v18 = vadd.f32 %v730_v12, %v4462_v1  ;;  %v732_v61 = vpop.f32.mrb[7].mxu1  ;;  %v3542_v12 = vld [vmem:[%s4342_s10 + $0xe4] ss:$8 sps:$4 sm:$0xff]   ;;  %1443 = vmatprep.subr.bf16.mxu1 %v3539_v21 }
 0x1e7   : > { %v850_v5 = vmax.f32 %v579_v6, 0.0  ;;  %v583_v19 = vadd.f32 %v582_v60, %v4465_v58  ;;  %v4505_v8 = vadd.f32 %v732_v61, %v4465_v58 }
 0x1e8   : > { %v958_v9 = vadd.f32 %v957_v7, %v849_v14  ;;  %v851_v20 = vmax.f32 %v581_v15, 0.0  ;;  %v3540_v14 = vld [vmem:[%s4342_s10 + $0xe0] ss:$8 sps:$4 sm:$0xff]  }
 0x1e9   : > { %v970_v10 = vadd.f32 %v969_v17, %v850_v5  ;;  %v852_v11 = vmax.f32 %v583_v19, 0.0  ;;  %1444 = vmatpush1.bf16.msra.mxu1 %v3537_v23  ;;  %v3545_v5 = vld [vmem:[%s4342_s10 + $0xf4] ss:$8 sps:$4 sm:$0xff]  }
 0x1ea   : > { %v959_v22 = vadd.f32 %v958_v9, %v851_v20  ;;  %1445 = vmatprep.subr.bf16.mxu1 %v3542_v12 }
 0x1eb   : > { %v971_v24 = vadd.f32 %v970_v10, %v852_v11  ;;  %v586_v25 = vpop.f32.mrb[8].mxu0  ;;  %v736_v6 = vpop.f32.mrb[8].mxu1 }
 0x1ec   : > { %v587_v60 = vadd.f32 %v586_v25, %v4462_v1  ;;  %v588_v61 = vpop.f32.mrb[9].mxu0  ;;  %v4512_v13 = vadd.f32 %v736_v6, %v4462_v1  ;;  %v738_v7 = vpop.f32.mrb[9].mxu1 }
 0x1ed   : > { %v589_v17 = vadd.f32 %v588_v61, %v4465_v58  ;;  %v590_v15 = vpop.f32.mrb[10].mxu0  ;;  %v4517_v20 = vadd.f32 %v738_v7, %v4465_v58  ;;  %v740_v16 = vpop.f32.mrb[10].mxu1  ;;  %1446 = vmatpush1.bf16.msra.mxu1 %v3540_v14  ;;  %v3543_v7 = vld [vmem:[%s4342_s10 + $0xf0] ss:$8 sps:$4 sm:$0xff]  }
 0x1ee   : > { %v853_v21 = vmax.f32 %v587_v60, 0.0  ;;  %v591_v25 = vadd.f32 %v590_v15, %v4462_v1  ;;  %v592_v19 = vpop.f32.mrb[11].mxu0  ;;  %v741_v9 = vadd.f32 %v740_v16, %v4462_v1  ;;  %v742_v10 = vpop.f32.mrb[11].mxu1  ;;  %1447 = vmatprep.subr.bf16.mxu1 %v3545_v5 }
 0x1ef   : > { %v854_v11 = vmax.f32 %v589_v17, 0.0  ;;  %v593_v23 = vadd.f32 %v592_v19, %v4465_v58  ;;  %v743_v6 = vadd.f32 %v742_v10, %v4465_v58 }
 0x1f0   : > { %v960_v61 = vadd.f32 %v959_v22, %v853_v21  ;;  %v855_v26 = vmax.f32 %v591_v25, 0.0  ;;  %v915_v32 = vmax.f32 %v741_v9, 0.0 }
 0x1f1   : > { %v972_v27 = vadd.f32 %v971_v24, %v854_v11  ;;  %v856_v28 = vmax.f32 %v593_v23, 0.0  ;;  %1448 = vmatpush1.bf16.msra.mxu1 %v3543_v7  ;;  %v916_v14 = vmax.f32 %v743_v6, 0.0 }
 0x1f2   : > { %v961_v12 = vadd.f32 %v960_v61, %v855_v26 }
 0x1f3   : > { %v973_v60 = vadd.f32 %v972_v27, %v856_v28  ;;  %v596_v30 = vpop.f32.mrb[12].mxu0  ;;  %v746_v15 = vpop.f32.mrb[12].mxu1 }
 0x1f4   : > { %v597_v31 = vadd.f32 %v596_v30, %v4462_v1  ;;  %v598_v16 = vpop.f32.mrb[13].mxu0  ;;  %v747_v17 = vadd.f32 %v746_v15, %v4462_v1  ;;  %v748_v19 = vpop.f32.mrb[13].mxu1 }
 0x1f5   : > { %v599_v22 = vadd.f32 %v598_v16, %v4465_v58  ;;  %v600_v21 = vpop.f32.mrb[14].mxu0  ;;  %v749_v24 = vadd.f32 %v748_v19, %v4465_v58  ;;  %v750_v25 = vpop.f32.mrb[14].mxu1 }
 0x1f6   : > { %v857_v5 = vmax.f32 %v597_v31, 0.0  ;;  %v601_v26 = vadd.f32 %v600_v21, %v4462_v1  ;;  %v602_v27 = vpop.f32.mrb[15].mxu0  ;;  %v917_v28 = vmax.f32 %v747_v17, 0.0  ;;  %v751_v30 = vadd.f32 %v750_v25, %v4462_v1  ;;  %v752_v10 = vpop.f32.mrb[15].mxu1 }
 0x1f7   : > { %v858_v9 = vmax.f32 %v599_v22, 0.0  ;;  %v603_v11 = vadd.f32 %v602_v27, %v4465_v58  ;;  %v918_v23 = vmax.f32 %v749_v24, 0.0  ;;  %v753_v61 = vadd.f32 %v752_v10, %v4465_v58 }
 0x1f8   : > { %v962_v7 = vadd.f32 %v961_v12, %v857_v5  ;;  %v1077_v15 = vadd.f32 %v917_v28, %v915_v32  ;;  %v919_v6 = vmax.f32 %v751_v30, 0.0  ;;  %v859_v5 = vmax.f32 %v601_v26, 0.0 }
 0x1f9   : > { %v974_v16 = vadd.f32 %v973_v60, %v858_v9  ;;  %v1089_v19 = vadd.f32 %v918_v23, %v916_v14  ;;  %v920_v33 = vmax.f32 %v753_v61, 0.0  ;;  %v860_v10 = vmax.f32 %v603_v11, 0.0 }
 0x1fa   : > { %v1078_v31 = vadd.f32 %v1077_v15, %v919_v6 }
 0x1fb   : > { %v606_v34 = vpop.f32.mrb[16].mxu0  ;;  %v1090_v21 = vadd.f32 %v1089_v19, %v920_v33  ;;  %v756_v35 = vpop.f32.mrb[16].mxu1  ;;  %v975_v19 = vrot.slane %v974_v16, 4 }
 0x1fc   : > { %v607_v17 = vadd.f32 %v606_v34, %v4462_v1  ;;  %v608_v25 = vpop.f32.mrb[17].mxu0  ;;  %v757_v22 = vadd.f32 %v756_v35, %v4462_v1  ;;  %v758_v36 = vpop.f32.mrb[17].mxu1  ;;  %v963_v35 = vrot.slane %v962_v7, 4 }
 0x1fd   : > { %v609_v24 = vadd.f32 %v608_v25, %v4465_v58  ;;  %v610_v27 = vpop.f32.mrb[18].mxu0  ;;  %v759_v12 = vadd.f32 %v758_v36, %v4465_v58  ;;  %v760_v32 = vpop.f32.mrb[18].mxu1 }
 0x1fe   : > { %v861_v60 = vmax.f32 %v607_v17, 0.0  ;;  %v611_v14 = vadd.f32 %v610_v27, %v4462_v1  ;;  %v612_v28 = vpop.f32.mrb[19].mxu0  ;;  %v921_v30 = vmax.f32 %v757_v22, 0.0  ;;  %v762_v33 = vpop.f32.mrb[19].mxu1  ;;  %v761_v17 = vadd.f32 %v760_v32, %v4462_v1 }
 0x1ff   : > { %v862_v9 = vmax.f32 %v609_v24, 0.0  ;;  %v613_v34 = vadd.f32 %v612_v28, %v4465_v58  ;;  %v922_v23 = vmax.f32 %v759_v12, 0.0  ;;  %v763_v27 = vadd.f32 %v762_v33, %v4465_v58 }
 0x200   : > { %v981_v61 = vadd.f32 %v861_v60, %v859_v5  ;;  %v863_v15 = vmax.f32 %v611_v14, 0.0  ;;  %v1079_v6 = vadd.f32 %v1078_v31, %v921_v30  ;;  %v964_v24 = vadd.f32 %v963_v35, %v962_v7 }
 0x201   : > { %v993_v25 = vadd.f32 %v862_v9, %v860_v10  ;;  %v864_v36 = vmax.f32 %v613_v34, 0.0  ;;  %v1091_v37 = vadd.f32 %v1090_v21, %v922_v23  ;;  %v923_v39 = vmax.f32 %v761_v17, 0.0 }
 0x202   : > { %v982_v26 = vadd.f32 %v981_v61, %v863_v15  ;;  %v924_v5 = vmax.f32 %v763_v27, 0.0  ;;  %v976_v31 = vadd.f32 %v975_v19, %v974_v16  ;;  %v965_v15 = vrot.slane %v964_v24, 2 }
 0x203   : > { %v994_v22 = vadd.f32 %v993_v25, %v864_v36  ;;  %v616_v38 = vpop.f32.mrb[20].mxu0  ;;  %v766_v11 = vpop.f32.mrb[20].mxu1  ;;  %v1080_v7 = vadd.f32 %v1079_v6, %v923_v39 }
 0x204   : > { %v617_v28 = vadd.f32 %v616_v38, %v4462_v1  ;;  %v618_v12 = vpop.f32.mrb[21].mxu0  ;;  %v768_v60 = vpop.f32.mrb[21].mxu1  ;;  %v767_v21 = vadd.f32 %v766_v11, %v4462_v1  ;;  %v1092_v61 = vadd.f32 %v1091_v37, %v924_v5  ;;  %v977_v36 = vrot.slane %v976_v31, 2 }
 0x205   : > { %v619_v14 = vadd.f32 %v618_v12, %v4465_v58  ;;  %v620_v30 = vpop.f32.mrb[22].mxu0  ;;  %v769_v32 = vadd.f32 %v768_v60, %v4465_v58  ;;  %v770_v10 = vpop.f32.mrb[22].mxu1 }
 0x206   : > { %v865_v33 = vmax.f32 %v617_v28, 0.0  ;;  %v621_v9 = vadd.f32 %v620_v30, %v4462_v1  ;;  %v622_v34 = vpop.f32.mrb[23].mxu0  ;;  %v772_v23 = vpop.f32.mrb[23].mxu1  ;;  %v925_v25 = vmax.f32 %v767_v21, 0.0  ;;  %v771_v28 = vadd.f32 %v770_v10, %v4462_v1 }
 0x207   : > { %v866_v38 = vmax.f32 %v619_v14, 0.0  ;;  %v623_v35 = vadd.f32 %v622_v34, %v4465_v58  ;;  %v926_v11 = vmax.f32 %v769_v32, 0.0  ;;  %v773_v30 = vadd.f32 %v772_v23, %v4465_v58 }
 0x208   : > { %v983_v16 = vadd.f32 %v982_v26, %v865_v33  ;;  %v867_v19 = vmax.f32 %v621_v9, 0.0  ;;  %v1081_v60 = vadd.f32 %v1080_v7, %v925_v25  ;;  %v927_v5 = vmax.f32 %v771_v28, 0.0 }
 0x209   : > { %v995_v17 = vadd.f32 %v994_v22, %v866_v38  ;;  %v868_v27 = vmax.f32 %v623_v35, 0.0  ;;  %v1093_v6 = vadd.f32 %v1092_v61, %v926_v11  ;;  %v928_v33 = vmax.f32 %v773_v30, 0.0 }
 0x20a   : > { %v984_v12 = vadd.f32 %v983_v16, %v867_v19  ;;  %v966_v9 = vadd.f32 %v965_v15, %v964_v24  ;;  %v978_v32 = vadd.f32 %v977_v36, %v976_v31  ;;  %v4553_v35 = vadd.f32 %v1081_v60, %v927_v5 }
 0x20b   : > { %v996_v39 = vadd.f32 %v995_v17, %v868_v27  ;;  %v626_v14 = vpop.f32.mrb[24].mxu0  ;;  %v776_v40 = vpop.f32.mrb[24].mxu1  ;;  %v4555_v61 = vadd.f32 %v1093_v6, %v928_v33 }
 0x20c   : > { %v627_v37 = vadd.f32 %v626_v14, %v4462_v1  ;;  %v628_v26 = vpop.f32.mrb[25].mxu0  ;;  %v777_v21 = vadd.f32 %v776_v40, %v4462_v1  ;;  %v778_v22 = vpop.f32.mrb[25].mxu1  ;;  %v967_v30 = vrot.slane %v966_v9, 1  ;;  %v979_v6 = vrot.slane %v978_v32, 1 }
 0x20d   : > { %v629_v34 = vadd.f32 %v628_v26, %v4465_v58  ;;  %v630_v7 = vpop.f32.mrb[26].mxu0  ;;  %v779_v10 = vadd.f32 %v778_v22, %v4465_v58  ;;  %v780_v23 = vpop.f32.mrb[26].mxu1 }
 0x20e   : > { %v869_v38 = vmax.f32 %v627_v37, 0.0  ;;  %v631_v16 = vadd.f32 %v630_v7, %v4462_v1  ;;  %v632_v19 = vpop.f32.mrb[27].mxu0  ;;  %v782_v25 = vpop.f32.mrb[27].mxu1  ;;  %v929_v15 = vmax.f32 %v777_v21, 0.0  ;;  %v781_v28 = vadd.f32 %v780_v23, %v4462_v1 }
 0x20f   : > { %v870_v17 = vmax.f32 %v629_v34, 0.0  ;;  %v633_v40 = vadd.f32 %v632_v19, %v4465_v58  ;;  %v930_v36 = vmax.f32 %v779_v10, 0.0  ;;  %v783_v60 = vadd.f32 %v782_v25, %v4465_v58 }
 0x210   : > { %v985_v24 = vadd.f32 %v984_v12, %v869_v38  ;;  %v871_v31 = vmax.f32 %v631_v16, 0.0  ;;  %v931_v26 = vmax.f32 %v781_v28, 0.0  ;;  %v968_v25 = vadd.f32 %v967_v30, %v966_v9 }
 0x211   : > { %v997_v27 = vadd.f32 %v996_v39, %v870_v17  ;;  %v872_v11 = vmax.f32 %v633_v40, 0.0  ;;  %v932_v33 = vmax.f32 %v783_v60, 0.0  ;;  %v980_v17 = vadd.f32 %v979_v6, %v978_v32 }
 0x212   : > { %v986_v14 = vadd.f32 %v985_v24, %v871_v31  ;;  %v1101_v23 = vadd.f32 %v931_v26, %v929_v15  ;;  %v1149_v9 = vpack.c.bf16 %v968_v25, %v968_v25 }
 0x213   : > { %v998_v37 = vadd.f32 %v997_v27, %v872_v11  ;;  %v636_v5 = vpop.f32.mrb[28].mxu0  ;;  %v786_v22 = vpop.f32.mrb[28].mxu1  ;;  %v1113_v16 = vadd.f32 %v932_v33, %v930_v36  ;;  %v1150_v32 = vpack.c.bf16 %v980_v17, %v980_v17 }
 0x214   : > { %v987_v34 = vrot.slane %v986_v14, 4  ;;  %v637_v12 = vadd.f32 %v636_v5, %v4462_v1  ;;  %v638_v7 = vpop.f32.mrb[29].mxu0  ;;  %v788_v21 = vpop.f32.mrb[29].mxu1  ;;  %v787_v42 = vadd.f32 %v786_v22, %v4462_v1 }
 0x215   : > { %v999_v10 = vrot.slane %v998_v37, 4  ;;  %v639_v39 = vadd.f32 %v638_v7, %v4465_v58  ;;  %v640_v38 = vpop.f32.mrb[30].mxu0  ;;  %v790_v19 = vpop.f32.mrb[30].mxu1  ;;  %v789_v36 = vadd.f32 %v788_v21, %v4465_v58 }
 0x216   : > { %v988_v40 = vadd.f32 %v987_v34, %v986_v14  ;;  %v642_v24 = vpop.f32.mrb[31].mxu0  ;;  %v792_v31 = vpop.f32.mrb[31].mxu1  ;;  %v641_v11 = vadd.f32 %v640_v38, %v4462_v1  ;;  %v873_v5 = vmax.f32 %v637_v12, 0.0  ;;  %v933_v6 = vmax.f32 %v787_v42, 0.0 }
 0x217   : > { %v1000_v27 = vadd.f32 %v999_v10, %v998_v37  ;;  %v643_v28 = vadd.f32 %v642_v24, %v4465_v58  ;;  %v874_v41 = vmax.f32 %v639_v39, 0.0  ;;  %v934_v34 = vmax.f32 %v789_v36, 0.0 }
 0x218   : > { %v989_v60 = vrot.slane %v988_v40, 2  ;;  %v875_v43 = vmax.f32 %v641_v11, 0.0  ;;  %v1102_v25 = vadd.f32 %v1101_v23, %v933_v6  ;;  %v1216_v42 = vunpack.c.l.b16 %v1149_v9 }
 0x219   : > { %v1001_v7 = vrot.slane %v1000_v27, 2  ;;  %v876_v15 = vmax.f32 %v643_v28, 0.0  ;;  %v1114_v17 = vadd.f32 %v1113_v16, %v934_v34  ;;  %v793_v23 = vadd.f32 %v792_v31, %v4465_v58 }
 0x21a   : > { %v990_v30 = vadd.f32 %v989_v60, %v988_v40  ;;  %v1005_v37 = vadd.f32 %v875_v43, %v873_v5 }
 0x21b   : > { %v1002_v14 = vadd.f32 %v1001_v7, %v1000_v27  ;;  %v1017_v26 = vadd.f32 %v876_v15, %v874_v41  ;;  %v646_v33 = vpop.f32.mrb[32].mxu0  ;;  %v796_v10 = vpop.f32.mrb[32].mxu1  ;;  %v1217_v27 = vunpack.c.l.b16 %v1150_v32 }
 0x21c   : > { %v991_v38 = vrot.slane %v990_v30, 1  ;;  %v647_v12 = vadd.f32 %v646_v33, %v4462_v1  ;;  %v648_v22 = vpop.f32.mrb[33].mxu0  ;;  %v798_v39 = vpop.f32.mrb[33].mxu1 }
 0x21d   : > { %v1003_v24 = vrot.slane %v1002_v14, 1  ;;  %v649_v11 = vadd.f32 %v648_v22, %v4465_v58  ;;  %v650_v21 = vpop.f32.mrb[34].mxu0  ;;  %v800_v40 = vpop.f32.mrb[34].mxu1  ;;  %v791_v22 = vadd.f32 %v790_v19, %v4462_v1 }
 0x21e   : > { %v992_v43 = vadd.f32 %v991_v38, %v990_v30  ;;  %v877_v41 = vmax.f32 %v647_v12, 0.0  ;;  %v652_v28 = vpop.f32.mrb[35].mxu0  ;;  %v802_v60 = vpop.f32.mrb[35].mxu1  ;;  %v651_v15 = vadd.f32 %v650_v21, %v4462_v1  ;;  %v936_v38 = vmax.f32 %v793_v23, 0.0 }
 0x21f   : > { %v1004_v5 = vadd.f32 %v1003_v24, %v1002_v14  ;;  %v878_v7 = vmax.f32 %v649_v11, 0.0  ;;  %v653_v36 = vadd.f32 %v652_v28, %v4465_v58  ;;  %v935_v34 = vmax.f32 %v791_v22, 0.0 }
 0x220   : > { %v1151_v33 = vpack.c.bf16 %v992_v43, %v992_v43  ;;  %v1006_v44 = vadd.f32 %v1005_v37, %v877_v41  ;;  %v879_v9 = vmax.f32 %v651_v15, 0.0  ;;  %v797_v14 = vadd.f32 %v796_v10, %v4462_v1 }
 0x221   : > { %v1152_v16 = vpack.c.bf16 %v1004_v5, %v1004_v5  ;;  %v1018_v6 = vadd.f32 %v1017_v26, %v878_v7  ;;  %v880_v32 = vmax.f32 %v653_v36, 0.0  ;;  %v799_v43 = vadd.f32 %v798_v39, %v4465_v58 }
 0x222   : > { %v1218_v30 = vunpack.c.l.b16 %v1151_v33  ;;  %v1007_v24 = vadd.f32 %v1006_v44, %v879_v9  ;;  %v1103_v41 = vadd.f32 %v1102_v25, %v935_v34  ;;  %v1115_v28 = vadd.f32 %v1114_v17, %v936_v38 }
 0x223   : > { %v1219_v12 = vunpack.c.l.b16 %v1152_v16  ;;  %v1019_v11 = vadd.f32 %v1018_v6, %v880_v32  ;;  %v656_v21 = vpop.f32.mrb[36].mxu0  ;;  %v806_v37 = vpop.f32.mrb[36].mxu1  ;;  %v937_v15 = vmax.f32 %v797_v14, 0.0  ;;  %v938_v36 = vmax.f32 %v799_v43, 0.0 }
 0x224   : > { %v4576_v19 = vsel %vm1232_vm0, %v1218_v30, %v1216_v42  ;;  %v657_v31 = vadd.f32 %v656_v21, %v4462_v1  ;;  %v658_v26 = vpop.f32.mrb[37].mxu0  ;;  %v808_v5 = vpop.f32.mrb[37].mxu1  ;;  %v801_v23 = vadd.f32 %v800_v40, %v4462_v1  ;;  %v803_v16 = vadd.f32 %v802_v60, %v4465_v58 }
 0x225   : > { %v4580_v7 = vsel %vm1232_vm0, %v1219_v12, %v1217_v27  ;;  %v659_v10 = vadd.f32 %v658_v26, %v4465_v58  ;;  %v660_v44 = vpop.f32.mrb[38].mxu0  ;;  %v810_v33 = vpop.f32.mrb[38].mxu1  ;;  %v1104_v27 = vadd.f32 %v1103_v41, %v937_v15  ;;  %v1116_v9 = vadd.f32 %v1115_v28, %v938_v36 }
 0x226   : > { %v881_v39 = vmax.f32 %v657_v31, 0.0  ;;  %v661_v22 = vadd.f32 %v660_v44, %v4462_v1  ;;  %v662_v42 = vpop.f32.mrb[39].mxu0  ;;  %v812_v25 = vpop.f32.mrb[39].mxu1  ;;  %v939_v34 = vmax.f32 %v801_v23, 0.0  ;;  %v940_v38 = vmax.f32 %v803_v16, 0.0 }
 0x227   : > { %v882_v17 = vmax.f32 %v659_v10, 0.0  ;;  %v663_v6 = vadd.f32 %v662_v42, %v4465_v58  ;;  %v807_v21 = vadd.f32 %v806_v37, %v4462_v1  ;;  %v809_v43 = vadd.f32 %v808_v5, %v4465_v58 }
 0x228   : > { %v1008_v32 = vadd.f32 %v1007_v24, %v881_v39  ;;  %v883_v30 = vmax.f32 %v661_v22, 0.0  ;;  %v1105_v40 = vadd.f32 %v1104_v27, %v939_v34  ;;  %v1117_v26 = vadd.f32 %v1116_v9, %v940_v38 }
 0x229   : > { %v1020_v14 = vadd.f32 %v1019_v11, %v882_v17  ;;  %v884_v12 = vmax.f32 %v663_v6, 0.0  ;;  %v811_v60 = vadd.f32 %v810_v33, %v4462_v1  ;;  %v941_v42 = vmax.f32 %v807_v21, 0.0 }
 0x22a   : > { %v1009_v31 = vadd.f32 %v1008_v32, %v883_v30  ;;  %v942_v41 = vmax.f32 %v809_v43, 0.0  ;;  %v813_v24 = vadd.f32 %v812_v25, %v4465_v58 }
 0x22b   : > { %v1021_v10 = vadd.f32 %v1020_v14, %v884_v12  ;;  %v666_v44 = vpop.f32.mrb[40].mxu0  ;;  %v816_v28 = vpop.f32.mrb[40].mxu1  ;;  %v943_v36 = vmax.f32 %v811_v60, 0.0  ;;  %v4593_v5 = vadd.f32 %v1105_v40, %v941_v42 }
 0x22c   : > { %v667_v15 = vadd.f32 %v666_v44, %v4462_v1  ;;  %v668_v11 = vpop.f32.mrb[41].mxu0  ;;  %v817_v37 = vadd.f32 %v816_v28, %v4462_v1  ;;  %v818_v39 = vpop.f32.mrb[41].mxu1  ;;  %v4596_v23 = vadd.f32 %v1117_v26, %v942_v41  ;;  %v944_v16 = vmax.f32 %v813_v24, 0.0 }
 0x22d   : > { %v669_v22 = vadd.f32 %v668_v11, %v4465_v58  ;;  %v670_v33 = vpop.f32.mrb[42].mxu0  ;;  %v820_v17 = vpop.f32.mrb[42].mxu1  ;;  %v819_v32 = vadd.f32 %v818_v39, %v4465_v58 }
 0x22e   : > { %v885_v6 = vmax.f32 %v667_v15, 0.0  ;;  %v671_v25 = vadd.f32 %v670_v33, %v4462_v1  ;;  %v672_v27 = vpop.f32.mrb[43].mxu0  ;;  %v945_v9 = vmax.f32 %v817_v37, 0.0  ;;  %v822_v30 = vpop.f32.mrb[43].mxu1  ;;  %v821_v60 = vadd.f32 %v820_v17, %v4462_v1 }
 0x22f   : > { %v886_v34 = vmax.f32 %v669_v22, 0.0  ;;  %v673_v38 = vadd.f32 %v672_v27, %v4465_v58  ;;  %v946_v21 = vmax.f32 %v819_v32, 0.0  ;;  %v823_v44 = vadd.f32 %v822_v30, %v4465_v58 }
 0x230   : > { %v1010_v14 = vadd.f32 %v1009_v31, %v885_v6  ;;  %v1125_v12 = vadd.f32 %v945_v9, %v943_v36  ;;  %v947_v37 = vmax.f32 %v821_v60, 0.0  ;;  %v887_v31 = vmax.f32 %v671_v25, 0.0 }
 0x231   : > { %v1022_v43 = vadd.f32 %v1021_v10, %v886_v34  ;;  %v1137_v26 = vadd.f32 %v946_v21, %v944_v16  ;;  %v948_v33 = vmax.f32 %v823_v44, 0.0 }
 0x232   : > { %v1011_v40 = vrot.slane %v1010_v14, 4  ;;  %v1126_v32 = vadd.f32 %v1125_v12, %v947_v37 }
 0x233   : > { %v1023_v42 = vrot.slane %v1022_v43, 4  ;;  %v676_v41 = vpop.f32.mrb[44].mxu0  ;;  %v826_v24 = vpop.f32.mrb[44].mxu1  ;;  %v1138_v46 = vadd.f32 %v1137_v26, %v948_v33 }
 0x234   : > { %v1012_v28 = vadd.f32 %v1011_v40, %v1010_v14  ;;  %v677_v15 = vadd.f32 %v676_v41, %v4462_v1  ;;  %v678_v11 = vpop.f32.mrb[45].mxu0  ;;  %v828_v39 = vpop.f32.mrb[45].mxu1  ;;  %v888_v14 = vmax.f32 %v673_v38, 0.0 }
 0x235   : > { %v1024_v22 = vadd.f32 %v1023_v42, %v1022_v43  ;;  %v679_v36 = vadd.f32 %v678_v11, %v4465_v58  ;;  %v680_v10 = vpop.f32.mrb[46].mxu0  ;;  %v830_v16 = vpop.f32.mrb[46].mxu1 }
 0x236   : > { %v1013_v6 = vrot.slane %v1012_v28, 2  ;;  %v889_v17 = vmax.f32 %v677_v15, 0.0  ;;  %v681_v27 = vadd.f32 %v680_v10, %v4462_v1  ;;  %v682_v9 = vpop.f32.mrb[47].mxu0  ;;  %v832_v30 = vpop.f32.mrb[47].mxu1  ;;  %v827_v10 = vadd.f32 %v826_v24, %v4462_v1 }
 0x237   : > { %v1025_v34 = vrot.slane %v1024_v22, 2  ;;  %v890_v21 = vmax.f32 %v679_v36, 0.0  ;;  %v683_v25 = vadd.f32 %v682_v9, %v4465_v58 }
 0x238   : > { %v1014_v40 = vadd.f32 %v1013_v6, %v1012_v28  ;;  %v1029_v60 = vadd.f32 %v889_v17, %v887_v31  ;;  %v891_v41 = vmax.f32 %v681_v27, 0.0  ;;  %v829_v31 = vadd.f32 %v828_v39, %v4465_v58 }
 0x239   : > { %v1026_v43 = vadd.f32 %v1025_v34, %v1024_v22  ;;  %v1041_v42 = vadd.f32 %v890_v21, %v888_v14  ;;  %v892_v45 = vmax.f32 %v683_v25, 0.0  ;;  %v949_v24 = vmax.f32 %v827_v10, 0.0 }
 0x23a   : > { %v1015_v11 = vrot.slane %v1014_v40, 1  ;;  %v1030_v44 = vadd.f32 %v1029_v60, %v891_v41 }
 0x23b   : > { %v1027_v15 = vrot.slane %v1026_v43, 1  ;;  %v686_v47 = vpop.f32.mrb[48].mxu0  ;;  %v836_v12 = vpop.f32.mrb[48].mxu1  ;;  %v1042_v48 = vadd.f32 %v1041_v42, %v892_v45  ;;  %v1127_v25 = vadd.f32 %v1126_v32, %v949_v24 }
 0x23c   : > { %v1016_v37 = vadd.f32 %v1015_v11, %v1014_v40  ;;  %v687_v38 = vadd.f32 %v686_v47, %v4462_v1  ;;  %v688_v28 = vpop.f32.mrb[49].mxu0  ;;  %v838_v36 = vpop.f32.mrb[49].mxu1  ;;  %v950_v40 = vmax.f32 %v829_v31, 0.0  ;;  %v837_v32 = vadd.f32 %v836_v12, %v4462_v1 }
 0x23d   : > { %v1028_v22 = vadd.f32 %v1027_v15, %v1026_v43  ;;  %v689_v6 = vadd.f32 %v688_v28, %v4465_v58  ;;  %v690_v17 = vpop.f32.mrb[50].mxu0  ;;  %v840_v27 = vpop.f32.mrb[50].mxu1  ;;  %v833_v28 = vadd.f32 %v832_v30, %v4465_v58 }
 0x23e   : > { %v1153_v26 = vpack.c.bf16 %v1016_v37, %v1016_v37  ;;  %v893_v33 = vmax.f32 %v687_v38, 0.0  ;;  %v691_v9 = vadd.f32 %v690_v17, %v4462_v1  ;;  %v692_v34 = vpop.f32.mrb[51].mxu0  ;;  %v842_v14 = vpop.f32.mrb[51].mxu1  ;;  %v1139_v15 = vadd.f32 %v1138_v46, %v950_v40 }
 0x23f   : > { %v1154_v45 = vpack.c.bf16 %v1028_v22, %v1028_v22  ;;  %v894_v21 = vmax.f32 %v689_v6, 0.0  ;;  %v693_v47 = vadd.f32 %v692_v34, %v4465_v58  ;;  %v831_v38 = vadd.f32 %v830_v16, %v4462_v1 }
 0x240   : > { %v1220_v39 = vunpack.c.l.b16 %v1153_v26  ;;  %v1031_v60 = vadd.f32 %v1030_v44, %v893_v33  ;;  %v895_v41 = vmax.f32 %v691_v9, 0.0  ;;  %v952_v6 = vmax.f32 %v833_v28, 0.0 }
 0x241   : > { %v1221_v43 = vunpack.c.l.b16 %v1154_v45  ;;  %v1043_v42 = vadd.f32 %v1042_v48, %v894_v21  ;;  %v896_v11 = vmax.f32 %v693_v47, 0.0  ;;  %v839_v48 = vadd.f32 %v838_v36, %v4465_v58 }
 0x242   : > { %v4615_v37 = vsel %vm1234_vm1, %v1220_v39, %v4576_v19  ;;  %v1032_v10 = vadd.f32 %v1031_v60, %v895_v41  ;;  %v951_v46 = vmax.f32 %v831_v38, 0.0  ;;  %v841_v17 = vadd.f32 %v840_v27, %v4462_v1 }
 0x243   : > { %v4621_v31 = vsel %vm1234_vm1, %v1221_v43, %v4580_v7  ;;  %v1044_v44 = vadd.f32 %v1043_v42, %v896_v11  ;;  %v696_v22 = vpop.f32.mrb[52].mxu0  ;;  %v953_v16 = vmax.f32 %v837_v32, 0.0  ;;  %v954_v33 = vmax.f32 %v839_v48, 0.0 }
 0x244   : > { %v697_v19 = vadd.f32 %v696_v22, %v4462_v1  ;;  %v698_v26 = vpop.f32.mrb[53].mxu0  ;;  %v843_v7 = vadd.f32 %v842_v14, %v4465_v58  ;;  %v1128_v24 = vadd.f32 %v1127_v25, %v951_v46  ;;  %v1140_v34 = vadd.f32 %v1139_v15, %v952_v6 }
 0x245   : > { %v699_v30 = vadd.f32 %v698_v26, %v4465_v58  ;;  %v700_v9 = vpop.f32.mrb[54].mxu0  ;;  %v955_v45 = vmax.f32 %v841_v17, 0.0  ;;  %v905_v22 = vmax.f32 %v4471_v4, 0.0  ;;  %v908_v26 = vmax.f32 %v4485_v3, 0.0 }
 0x246   : > { %v897_v12 = vmax.f32 %v697_v19, 0.0  ;;  %v702_v36 = vpop.f32.mrb[55].mxu0  ;;  %v956_v47 = vmax.f32 %v843_v7, 0.0  ;;  %v701_v40 = vadd.f32 %v700_v9, %v4462_v1  ;;  %v1129_v27 = vadd.f32 %v1128_v24, %v953_v16 }
 0x247   : > { %v898_v21 = vmax.f32 %v699_v30, 0.0  ;;  %v703_v39 = vadd.f32 %v702_v36, %v4465_v58  ;;  %v1141_v60 = vadd.f32 %v1140_v34, %v954_v33  ;;  %v909_v30 = vmax.f32 %v4491_v2, 0.0 }
 0x248   : > { %v1033_v41 = vadd.f32 %v1032_v10, %v897_v12  ;;  %v899_v42 = vmax.f32 %v701_v40, 0.0  ;;  %v1130_v38 = vadd.f32 %v1129_v27, %v955_v45  ;;  %v906_v10 = vmax.f32 %v4475_v57, 0.0 }
 0x249   : > { %v1045_v43 = vadd.f32 %v1044_v44, %v898_v21  ;;  %v900_v11 = vmax.f32 %v703_v39, 0.0  ;;  %v1142_v14 = vadd.f32 %v1141_v60, %v956_v47  ;;  %v907_v44 = vmax.f32 %v4480_v62, 0.0 }
 0x24a   : > { %v1034_v28 = vadd.f32 %v1033_v41, %v899_v42  ;;  %v910_v24 = vmax.f32 %v4495_v63, 0.0  ;;  %v1083_v34 = vrot.slane %v4553_v35, 4  ;;  %v1095_v3 = vrot.slane %v4555_v61, 4 }
 0x24b   : > { %v1046_v25 = vadd.f32 %v1045_v43, %v900_v11  ;;  %v706_v15 = vpop.f32.mrb[56].mxu0  ;;  %v1119_v2 = vrot.slane %v4596_v23, 4  ;;  %v1131_v40 = vrot.slane %v1130_v38, 4  ;;  %v911_v27 = vmax.f32 %v4500_v18, 0.0 }
 0x24c   : > { %v707_v32 = vadd.f32 %v706_v15, %v4462_v1  ;;  %v708_v48 = vpop.f32.mrb[57].mxu0  ;;  %v1035_v46 = vrot.slane %v1034_v28, 4  ;;  %v912_v60 = vmax.f32 %v4505_v8, 0.0  ;;  %v1143_v41 = vrot.slane %v1142_v14, 4 }
 0x24d   : > { %v1047_v6 = vrot.slane %v1046_v25, 4  ;;  %v709_v19 = vadd.f32 %v708_v48, %v4465_v58  ;;  %v710_v17 = vpop.f32.mrb[58].mxu0  ;;  %v1084_v42 = vadd.f32 %v1083_v34, %v4553_v35  ;;  %v1096_v15 = vadd.f32 %v1095_v3, %v4555_v61 }
 0x24e   : > { %v711_v16 = vadd.f32 %v710_v17, %v4462_v1  ;;  %v712_v33 = vpop.f32.mrb[59].mxu0  ;;  %v1036_v7 = vadd.f32 %v1035_v46, %v1034_v28  ;;  %v901_v12 = vmax.f32 %v707_v32, 0.0  ;;  %v1107_v1 = vrot.slane %v4593_v5, 4 }
 0x24f   : > { %v1048_v9 = vadd.f32 %v1047_v6, %v1046_v25  ;;  %v713_v4 = vadd.f32 %v712_v33, %v4465_v58  ;;  %v902_v62 = vmax.f32 %v709_v19, 0.0  ;;  %v1120_v48 = vadd.f32 %v1119_v2, %v4596_v23 }
 0x250   : > { %v903_v45 = vmax.f32 %v711_v16, 0.0  ;;  %v1037_v57 = vrot.slane %v1036_v7, 2  ;;  %v1108_v32 = vadd.f32 %v1107_v1, %v4593_v5  ;;  %v1132_v6 = vadd.f32 %v1131_v40, %v1130_v38 }
 0x251   : > { %v1049_v36 = vrot.slane %v1048_v9, 2  ;;  %v904_v21 = vmax.f32 %v713_v4, 0.0  ;;  %v913_v8 = vmax.f32 %v4512_v13, 0.0  ;;  %v1144_v16 = vadd.f32 %v1143_v41, %v1142_v14 }
 0x252   : > { %v1053_v47 = vadd.f32 %v903_v45, %v901_v12  ;;  %v1038_v58 = vadd.f32 %v1037_v57, %v1036_v7  ;;  %v1085_v33 = vrot.slane %v1084_v42, 2  ;;  %v1097_v61 = vrot.slane %v1096_v15, 2 }
 0x253   : > { %v1050_v39 = vadd.f32 %v1049_v36, %v1048_v9  ;;  %v1065_v63 = vadd.f32 %v904_v21, %v902_v62  ;;  %v1109_v4 = vrot.slane %v1108_v32, 2  ;;  %v1121_v5 = vrot.slane %v1120_v48, 2 }
 0x254   : > { %v1054_v43 = vadd.f32 %v1053_v47, %v905_v22  ;;  %v1039_v11 = vrot.slane %v1038_v58, 1  ;;  %v914_v22 = vmax.f32 %v4517_v20, 0.0  ;;  %v1133_v23 = vrot.slane %v1132_v6, 2 }
 0x255   : > { %v1051_v28 = vrot.slane %v1050_v39, 1  ;;  %v1066_v25 = vadd.f32 %v1065_v63, %v906_v10  ;;  %v1145_v45 = vrot.slane %v1144_v16, 2  ;;  %v1086_v57 = vadd.f32 %v1085_v33, %v1084_v42 }
 0x256   : > { %v1055_v46 = vadd.f32 %v1054_v43, %v907_v44  ;;  %v1040_v19 = vadd.f32 %v1039_v11, %v1038_v58  ;;  %v1122_v62 = vadd.f32 %v1121_v5, %v1120_v48  ;;  %v1134_v21 = vadd.f32 %v1133_v23, %v1132_v6 }
 0x257   : > { %v1052_v17 = vadd.f32 %v1051_v28, %v1050_v39  ;;  %v1067_v18 = vadd.f32 %v1066_v25, %v908_v26  ;;  %v1146_v1 = vadd.f32 %v1145_v45, %v1144_v16  ;;  %v1087_v47 = vrot.slane %v1086_v57, 1 }
 0x258   : > { %v1056_v35 = vadd.f32 %v1055_v46, %v909_v30  ;;  %v1155_v7 = vpack.c.bf16 %v1040_v19, %v1040_v19  ;;  %v1098_v30 = vadd.f32 %v1097_v61, %v1096_v15 }
 0x259   : > { %v1156_v10 = vpack.c.bf16 %v1052_v17, %v1052_v17  ;;  %v1068_v9 = vadd.f32 %v1067_v18, %v910_v24  ;;  %v1110_v24 = vadd.f32 %v1109_v4, %v1108_v32  ;;  %v1147_v41 = vrot.slane %v1146_v1, 1 }
 0x25a   : > { %v1057_v34 = vadd.f32 %v1056_v35, %v911_v27  ;;  %v1222_v44 = vunpack.c.l.b16 %v1155_v7  ;;  %v1099_v58 = vrot.slane %v1098_v30, 1  ;;  %v1123_v27 = vrot.slane %v1122_v62, 1 }
 0x25b   : > { %v1223_v38 = vunpack.c.l.b16 %v1156_v10  ;;  %v1069_v12 = vadd.f32 %v1068_v9, %v912_v60  ;;  %v1111_v39 = vrot.slane %v1110_v24, 1  ;;  %v1135_v60 = vrot.slane %v1134_v21, 1 }
 0x25c   : > { %v1058_v26 = vadd.f32 %v1057_v34, %v913_v8  ;;  %v1237_v13 = vsel %vm1236_vm2, %v1222_v44, %v4615_v37  ;;  %v1088_v42 = vadd.f32 %v1087_v47, %v1086_v57  ;;  %v1100_v11 = vadd.f32 %v1099_v58, %v1098_v30 }
 0x25d   : > { %v1070_v20 = vadd.f32 %v1069_v12, %v914_v22  ;;  %v1248_v14 = vsel %vm1236_vm2, %v1223_v38, %v4621_v31  ;;  %v1112_v28 = vadd.f32 %v1111_v39, %v1110_v24  ;;  %v1124_v15 = vadd.f32 %v1123_v27, %v1122_v62  ;;  %v4685_v39 = vld [vmem:[#allocation17] ss:$0 sm:$0xff] (%p245_p4) }
 0x25e   : > { %v1059_v36 = vrot.slane %v1058_v26, 4  ;;  %v1136_v32 = vadd.f32 %v1135_v60, %v1134_v21  ;;  %v1148_v46 = vadd.f32 %v1147_v41, %v1146_v1  ;;  %v1159_v19 = vpack.c.bf16 %v1088_v42, %v1088_v42  ;;  %v5454_v21 = vld [vmem:[#allocation78_spill] sm:$0xff]  ;;  %v5456_v1 = vld [vmem:[#allocation77_spill] sm:$0xff] }
 0x25f   : > { %v1071_v3 = vrot.slane %v1070_v20, 4  ;;  %v1160_v18 = vpack.c.bf16 %v1100_v11, %v1100_v11  ;;  %v1161_v8 = vpack.c.bf16 %v1112_v28, %v1112_v28  ;;  %v1162_v16 = vpack.c.bf16 %v1124_v15, %v1124_v15  ;;  %v4712_v41 = vld [vmem:[%s5339_s1 + $0x18] sm:$0xff] (%p245_p4)   ;;  %v4720_v11 = vld [vmem:[%s5339_s1 + $0x20] sm:$0xff] (%p245_p4)   ;;  %v4725_v28 = vld [vmem:[%s5339_s1 + $0x28] sm:$0xff] (%p245_p4)  }
 0x260   : > { %v1060_v2 = vadd.f32 %v1059_v36, %v1058_v26  ;;  %v1163_v35 = vpack.c.bf16 %v1136_v32, %v1136_v32  ;;  %v1164_v7 = vpack.c.bf16 %v1148_v46, %v1148_v46  ;;  %v1226_v9 = vunpack.c.l.b16 %v1159_v19  ;;  %v4732_v32 = vld [vmem:[%s5339_s1 + $0x30] sm:$0xff] (%p245_p4)  }
 0x261   : > { %v1072_v40 = vadd.f32 %v1071_v3, %v1070_v20  ;;  %v1227_v4 = vunpack.c.l.b16 %v1160_v18  ;;  %v1228_v5 = vunpack.c.l.b16 %v1161_v8  ;;  %v1229_v23 = vunpack.c.l.b16 %v1162_v16 }
 0x262   : > { %v1061_v63 = vrot.slane %v1060_v2, 2  ;;  %v1230_v44 = vunpack.c.l.b16 %v1163_v35  ;;  %v1231_v45 = vunpack.c.l.b16 %v1164_v7  ;;  %v1711_v15 = vunpack.c.h.bf16 (%p245_p4), %v4712_v41 }
 0x263   : > { %v1073_v37 = vrot.slane %v1072_v40, 2  ;;  %v1710_v19 = vunpack.c.l.bf16 (%p245_p4), %v4712_v41  ;;  %v1712_v18 = vunpack.c.l.bf16 (%p245_p4), %v4720_v11  ;;  %v1715_v8 = vunpack.c.h.bf16 (%p245_p4), %v4725_v28 }
 0x264   : > { %v1062_v43 = vadd.f32 %v1061_v63, %v1060_v2  ;;  %v4690_v63 = vld [vmem:[%s5339_s1] sm:$0xff] (%p245_p4)   ;;  %v1717_v16 = vunpack.c.h.bf16 (%p245_p4), %v4732_v32  ;;  %v1716_v35 = vunpack.c.l.bf16 (%p245_p4), %v4732_v32 }
 0x265   : > { %v1074_v31 = vadd.f32 %v1073_v37, %v1072_v40  ;;  %v1704_v60 = vunpack.c.l.bf16 (%p245_p4), %v4690_v63  ;;  %v1705_v51 = vunpack.c.h.bf16 (%p245_p4), %v4690_v63 }
 0x266   : > { %v1063_v25 = vrot.slane %v1062_v43, 1 }
 0x267   : > { %v1075_v48 = vrot.slane %v1074_v31, 1  ;;  %v1727_v54 = vmul.f32 (%p245_p4), %v4685_v39, %v1704_v60  ;;  %v4778_v60 = vsub.s32 (%p245_p4), 4, %v4453_v0 }
 0x268   : > { %v1064_v6 = vadd.f32 %v1063_v25, %v1062_v43  ;;  %v1728_v43 = vmul.f32 (%p245_p4), %v4685_v39, %v1705_v51  ;;  %v1732_v25 = vmul.f32 (%p245_p4), %v4685_v39, %v1709_v52  ;;  %v4785_v52 = vsub.s32 (%p245_p4), 5, %v4453_v0 }
 0x269   : > { %v1076_v17 = vadd.f32 %v1075_v48, %v1074_v31  ;;  %v1743_v31 = vsel (%p245_p4), %vm1566_vm7, %v1727_v54, 0.0 }
 0x26a   : > { %v1157_v22 = vpack.c.bf16 %v1064_v6, %v1064_v6  ;;  %1744 = vadd.xlane.f32.xlu0 (%p245_p4), %v1743_v31  ;;  %v1746_v46 = vsel (%p245_p4), %vm1566_vm7, %v1728_v43, 0.0  ;;  %v1731_v6 = vmul.f32 (%p245_p4), %v4685_v39, %v1708_v56  ;;  %v4803_v31 = vsub.s32 (%p245_p4), 3, %v4453_v0 }
 0x26b   : > { %v1158_v33 = vpack.c.bf16 %v1076_v17, %v1076_v17  ;;  %v1713_v17 = vunpack.c.h.bf16 (%p245_p4), %v4720_v11 }
 0x26c   : > { %v1224_v10 = vunpack.c.l.b16 %v1157_v22  ;;  %v1714_v22 = vunpack.c.l.bf16 (%p245_p4), %v4725_v28  ;;  %v1755_v7 = vsel (%p245_p4), %vm1566_vm7, %v1731_v6, 0.0 }
 0x26d   : > { %v1225_v61 = vunpack.c.l.b16 %v1158_v33  ;;  %v1758_v33 = vsel (%p245_p4), %vm1566_vm7, %v1732_v25, 0.0 }
 0x26e   : > { %v1239_v34 = vsel %vm1238_vm3, %v1224_v10, %v1237_v13  ;;  %1747 = vadd.xlane.f32.xlu0 (%p245_p4), %v1746_v46  ;;  %v1734_v10 = vmul.f32 (%p245_p4), %v4685_v39, %v1711_v15 }
 0x26f   : > { %v1241_v38 = vsel %vm1240_vm4, %v1226_v9, %v1239_v34  ;;  %v1249_v12 = vsel %vm1238_vm3, %v1225_v61, %v1248_v14  ;;  %v1733_v9 = vmul.f32 (%p245_p4), %v4685_v39, %v1710_v19  ;;  %v1736_v61 = vmul.f32 (%p245_p4), %v4685_v39, %v1713_v17 }
 0x270   : > { %v1243_v26 = vsel %vm1242_vm5, %v1228_v5, %v1241_v38  ;;  %v1250_v57 = vsel %vm1240_vm4, %v1227_v4, %v1249_v12  ;;  %v1735_v4 = vmul.f32 (%p245_p4), %v4685_v39, %v1712_v18  ;;  %v1738_v5 = vmul.f32 (%p245_p4), %v4685_v39, %v1715_v8 }
 0x271   : > { %v1245_v20 = vsel %vm1244_vm6, %v1230_v44, %v1243_v26  ;;  %v1251_v30 = vsel %vm1242_vm5, %v1229_v23, %v1250_v57  ;;  %v1737_v34 = vmul.f32 (%p245_p4), %v4685_v39, %v1714_v22  ;;  %v1740_v23 = vmul.f32 (%p245_p4), %v4685_v39, %v1717_v16 }
 0x272   : > { %v1252_v24 = vsel %vm1244_vm6, %v1231_v45, %v1251_v30  ;;  %v1253_v13 = vpack.c.b16 %v1245_v20, %v1245_v20  ;;  %v1739_v44 = vmul.f32 (%p245_p4), %v4685_v39, %v1716_v35  ;;  %1756 = vadd.xlane.f32.xlu0 (%p245_p4), %v1755_v7  ;;  %v1764_v38 = vsel (%p245_p4), %vm1566_vm7, %v1734_v10, 0.0 }
 0x273   : > { %v1254_v36 = vpack.c.b16 %v1252_v24, %v1252_v24  ;;  %v1761_v12 = vsel (%p245_p4), %vm1566_vm7, %v1733_v9, 0.0  ;;  %v1770_v45 = vsel (%p245_p4), %vm1566_vm7, %v1736_v61, 0.0  ;;  %v1767_v26 = vsel (%p245_p4), %vm1566_vm7, %v1735_v4, 0.0 }
 0x274   :  { %v1773_v20 = vsel (%p245_p4), %vm1566_vm7, %v1737_v34, 0.0  ;;  %v1782_v30 = vsel (%p245_p4), %vm1566_vm7, %v1740_v23, 0.0  ;;  %v1779_v24 = vsel (%p245_p4), %vm1566_vm7, %v1739_v44, 0.0 }
 0x275   : > { %1449 = vmatprep.mubr.bf16.mxu1 %v1254_v36  ;;  %v4765_v36 = vld [vmem:[%s5339_s1 + $0x38] sm:$0xff] (%p245_p4)  }
 0x276   : > { %1450 = vmatmul.mubr.bf16.vlgmr.msra.gmra.mrb[52].mxu1 %v1253_v13  ;;  %1762 = vadd.xlane.f32.xlu0 (%p245_p4), %v1761_v12  ;;  %v1719_v13 = vunpack.c.h.bf16 (%p245_p4), %v4765_v36 }
 0x27a   :  { %1768 = vadd.xlane.f32.xlu0 (%p245_p4), %v1767_v26 }
 0x27e   :  { %1774 = vadd.xlane.f32.xlu0 (%p245_p4), %v1773_v20 }
 0x282   :  { %1780 = vadd.xlane.f32.xlu0 (%p245_p4), %v1779_v24 }
 0x2f7   :  { %v1745_v46 = vpop.xlane.xlu0 (%p245_p4), %1744 }
 0x2fb   :  { %v1748_v19 = vpop.xlane.xlu0 (%p245_p4), %1747 }
 0x2ff   :  { %v1757_v18 = vpop.xlane.xlu0 (%p245_p4), %1756 }
 0x303   :  { %v1763_v22 = vpop.xlane.xlu0 (%p245_p4), %1762 }
 0x307   :  { %v1769_v35 = vpop.xlane.xlu0 (%p245_p4), %1768 }
 0x30b   :  { %v1775_v7 = vpop.xlane.xlu0 (%p245_p4), %1774 }
 0x30f   :  { %v1781_v9 = vpop.xlane.xlu0 (%p245_p4), %1780 }
 0x348   :  { %247 = sbr.rel (!%p245_p4) target bundleno = 229 (0xe5), region = 126 }
 0x349   : > { %v1451_v62 = vpop.f32.mrb[52].mxu1 }
 0x34a   : > { %v4666_v58 = vadd.f32 %v5454_v21, %v1451_v62   ;;  %v1453_v14 = vpop.f32.mrb[53].mxu1  ;;  %v1718_v62 = vunpack.c.l.bf16 (%p245_p4), %v4765_v36  ;;  %v1742_v21 = vmul.f32 (%p245_p4), %v4685_v39, %v1719_v13 }
 0x34b   : > { %v4669_v57 = vadd.f32 %v5456_v1, %v1453_v14   ;;  %v1455_v47 = vpop.f32.mrb[54].mxu1 }
 0x34c   : > { %v5455_v3 = vmov %v4666_v58  ;;  %v1456_v40 = vpop.f32.mrb[55].mxu1  ;;  %v1741_v14 = vmul.f32 (%p245_p4), %v4685_v39, %v1718_v62  ;;  %v1788_v1 = vsel (%p245_p4), %vm1566_vm7, %v1742_v21, 0.0 }
 0x34d   : > { %v5457_v2 = vmov %v4669_v57  ;;  %v5459_v58 = vmov %v5455_v3  ;;  %v4773_v40 = vld [vmem:[#allocation6] sm:$0xff] (%p245_p4) }
 0x34e   : > { %v5458_v57 = vmov %v5457_v2  ;;  %v4683_v58 = vld [vmem:[%s5339_s1 + $0x8] sm:$0xff] (%p245_p4)   ;;  %v1785_v47 = vsel (%p245_p4), %vm1566_vm7, %v1741_v14, 0.0  ;;  %v1866_v51 = vrot.slane (%p245_p4), %v4773_v40, %v4778_v60  ;;  %v1877_v54 = vrot.slane (%p245_p4), %v4773_v40, %v4785_v52  ;;  %s3971_s1 = smov (%p245_p4), [#allocation21]  }
 0x34f   :  { %v1706_v27 = vunpack.c.l.bf16 %v4683_v58  ;;  %v1707_v37 = vunpack.c.h.bf16 %v4683_v58  ;;  %v1776_v57 = vsel %vm1566_vm7, %v1738_v5, 0.0  ;;  %1786 = vadd.xlane.f32.xlu0 %v1785_v47  ;;  %v1855_v15 = vrot.slane %v4773_v40, %v4803_v31  ;;  %s3201_s14 = sshll.u32 %s3971_s1, 4  ;;  %s3202_s14 = int_to_ptr.vmem [resolvable:$true] %s3201_s14 }
 0x350   :  { %vm2399_vm10 = vcmp.lt.f32.partialorder %v4773_v40, -5e+29  ;;  %s3892_s8 = scalar_lea.vmem %s3202_s14, 128  ;;  %p3897_p6 = scmp.lt.s32.totalorder %s3202_s14, %s3202_s14 }
 0x351   :  { %v1729_v53 = vmul.f32 %v4685_v39, %v1706_v27  ;;  %v1730_v55 = vmul.f32 %v4685_v39, %v1707_v37  ;;  %v1822_v27 = vrot.slane %v4773_v40, %v4456_v59  ;;  %v3334_v37 = vld [vmem:[#allocation2] ss:$0 sm:$0xff]  ;;  %v1833_v39 = vrot.slane %v4773_v40, %v4459_v29  ;;  %p3893_p5 = scmp.ne.s32.totalorder %s3202_s14, %s3892_s8  ;;  %p3898_p7 = scmp.lt.s32.totalorder %s3892_s8, %s3892_s8 }
 0x353   :  { %v1749_v42 = vsel %vm1566_vm7, %v1729_v53, 0.0  ;;  %v1752_v48 = vsel %vm1566_vm7, %v1730_v55, 0.0  ;;  %v4788_v53 = vsub.s32 2, %v4453_v0  ;;  %v4793_v55 = vsub.s32 6, %v4453_v0  ;;  %p3899_p8 = por %p3898_p7, %p3897_p6 }
 0x354   :  { %1750 = vadd.xlane.f32.xlu1 %v1749_v42  ;;  %v4800_v42 = vsub.s32 7, %v4453_v0 }
 0x355   :  { %v1844_v56 = vrot.slane %v4773_v40, %v4788_v53  ;;  %v1888_v43 = vrot.slane %v4773_v40, %v4793_v55  ;;  %p3900_p9 = pnand %p3899_p8, %p3893_p5 }
 0x356   :  { %v1899_v25 = vrot.slane %v4773_v40, %v4800_v42 }
 0x358   :  { %1753 = vadd.xlane.f32.xlu1 %v1752_v48 }
 0x35c   :  { %1759 = vadd.xlane.f32.xlu1 %v1758_v33 }
 0x360   :  { %1765 = vadd.xlane.f32.xlu1 %v1764_v38 }
 0x364   :  { %1771 = vadd.xlane.f32.xlu1 %v1770_v45 }
 0x365   :  { %1798 = vperm.xlu0 %3546, %v3334_v37  }
 0x368   :  { %1777 = vadd.xlane.f32.xlu1 %v1776_v57 }
 0x369   :  { %1868 = vbcast.lane.b32.xlu0 %v1866_v51, 256 }
 0x36c   :  { %1783 = vadd.xlane.f32.xlu1 %v1782_v30 }
 0x36d   :  { %1879 = vbcast.lane.b32.xlu0 %v1877_v54, 256 }
 0x370   :  { %1789 = vadd.xlane.f32.xlu1 %v1788_v1 }
 0x371   :  { %1890 = vbcast.lane.b32.xlu0 %v1888_v43, 256 }
 0x375   :  { %1901 = vbcast.lane.b32.xlu0 %v1899_v25, 256 }
 0x381   :  { %1824 = vbcast.lane.b32.xlu1 %v1822_v27, 256 }
 0x385   :  { %1828 = vbcast.lane.b32.xlu1 %v1822_v27, 264 }
 0x389   :  { %1835 = vbcast.lane.b32.xlu1 %v1833_v39, 256 }
 0x38d   :  { %1839 = vbcast.lane.b32.xlu1 %v1833_v39, 264 }
 0x391   :  { %1846 = vbcast.lane.b32.xlu1 %v1844_v56, 256 }
 0x395   :  { %1850 = vbcast.lane.b32.xlu1 %v1844_v56, 264 }
 0x399   :  { %1857 = vbcast.lane.b32.xlu1 %v1855_v15, 256 }
 0x39d   :  { %1861 = vbcast.lane.b32.xlu1 %v1855_v15, 264 }
 0x3a1   :  { %1872 = vbcast.lane.b32.xlu1 %v1866_v51, 264 }
 0x3a5   :  { %1883 = vbcast.lane.b32.xlu1 %v1877_v54, 264 }
 0x3a9   :  { %1894 = vbcast.lane.b32.xlu1 %v1888_v43, 264 }
 0x3ad   :  { %1905 = vbcast.lane.b32.xlu1 %v1899_v25, 264 }
 0x3dc   :  { %v1787_v4 = vpop.xlane.xlu0 %1786 }
 0x3e1   :  { %v1751_v48 = vpop.xlane.xlu1 %1750 }
 0x3e4   :  { %v1799_v23 = vpop.permute.xlu0 %1798 }
 0x3e5   :  { %v1754_v6 = vpop.xlane.xlu1 %1753  ;;  %v1802_v44 = vadd.f32 %v1799_v23, %v1748_v19  ;;  %v1801_v38 = vadd.f32 %v1799_v23, %v1745_v46  ;;  %v1803_v57 = vadd.f32 %v1799_v23, %v1751_v48  ;;  %v1805_v62 = vadd.f32 %v1799_v23, %v1757_v18 }
 0x3e6   :  { %v1804_v30 = vadd.f32 %v1799_v23, %v1754_v6  ;;  %v1807_v39 = vadd.f32 %v1799_v23, %v1763_v22  ;;  %v1809_v43 = vadd.f32 %v1799_v23, %v1769_v35  ;;  %v1811_v6 = vadd.f32 %v1799_v23, %v1775_v7 }
 0x3e7   :  { %v1813_v35 = vadd.f32 %v1799_v23, %v1781_v9 }
 0x3e8   :  { %v1869_v47 = vpop.permute.xlu0 %1868 }
 0x3e9   :  { %v1760_v17 = vpop.xlane.xlu1 %1759  ;;  %v4832_v48 = vadd.f32 %v1869_v47, %v1809_v43 }
 0x3ea   :  { %v1806_v1 = vadd.f32 %v1799_v23, %v1760_v17 }
 0x3ec   :  { %v1880_v56 = vpop.permute.xlu0 %1879 }
 0x3ed   :  { %v1766_v8 = vpop.xlane.xlu1 %1765  ;;  %v4838_v22 = vadd.f32 %v1880_v56, %v1811_v6 }
 0x3ee   :  { %v1808_v25 = vadd.f32 %v1799_v23, %v1766_v8 }
 0x3f0   :  { %v1891_v17 = vpop.permute.xlu0 %1890 }
 0x3f1   :  { %v1772_v16 = vpop.xlane.xlu1 %1771 }
 0x3f2   :  { %v1810_v19 = vadd.f32 %v1799_v23, %v1772_v16 }
 0x3f5   :  { %v1778_v33 = vpop.xlane.xlu1 %1777 }
 0x3f6   :  { %v1812_v8 = vadd.f32 %v1799_v23, %v1778_v33 }
 0x3f9   :  { %v1784_v10 = vpop.xlane.xlu1 %1783 }
 0x3fa   :  { %v1814_v16 = vadd.f32 %v1799_v23, %v1784_v10 }
 0x3fd   :  { %v4809_v61 = vpop.xlane.xlu1 %1789 }
 0x3fe   :  { %v1816_v33 = vadd.f32 %v1799_v23, %v4809_v61 }
 0x401   :  { %v1825_v5 = vpop.permute.xlu1 %1824 }
 0x402   :  { %v4813_v45 = vadd.f32 %v1825_v5, %v1801_v38  ;;  %v1902_v38 = vpop.permute.xlu0 %1901 }
 0x404   :  { %1956 = vperm.xlu0 %3546, %v4813_v45  }
 0x405   :  { %v1829_v34 = vpop.permute.xlu1 %1828 }
 0x406   :  { %v4811_v12 = vadd.f32 %v1829_v34, %v1802_v44  ;;  %v4844_v44 = vadd.f32 %v1891_v17, %v1813_v35 }
 0x408   :  { %1959 = vperm.xlu1 %3547, %v4811_v12  }
 0x409   :  { %v1836_v26 = vpop.permute.xlu1 %1835 }
 0x40a   :  { %v4817_v20 = vadd.f32 %v1836_v26, %v1803_v57  ;;  %v1815_v26 = vadd.f32 %v1799_v23, %v1787_v4 }
 0x40c   :  { %1962 = vperm.xlu0 %3546, %v4817_v20  }
 0x40d   :  { %v1840_v24 = vpop.permute.xlu1 %1839 }
 0x40e   :  { %v4819_v13 = vadd.f32 %v1840_v24, %v1804_v30  ;;  %v4850_v30 = vadd.f32 %v1902_v38, %v1815_v26 }
 0x410   :  { %1965 = vperm.xlu1 %3547, %v4819_v13  }
 0x411   :  { %v1847_v21 = vpop.permute.xlu1 %1846 }
 0x412   :  { %v4823_v14 = vadd.f32 %v1847_v21, %v1805_v62 }
 0x414   :  { %1968 = vperm.xlu0 %3546, %v4823_v14  }
 0x415   :  { %v1851_v27 = vpop.permute.xlu1 %1850 }
 0x416   :  { %v4826_v37 = vadd.f32 %v1851_v27, %v1806_v1 }
 0x418   :  { %1971 = vperm.xlu1 %3547, %v4826_v37  }
 0x419   :  { %v1858_v51 = vpop.permute.xlu1 %1857 }
 0x41a   :  { %v4829_v54 = vadd.f32 %v1858_v51, %v1807_v39  ;;  %v5460_v51 = vlaneseq }
 0x41c   :  { %1974 = vperm.xlu0 %3546, %v4829_v54   ;;  %v2004_v56 = vand.u32 127, %v5460_v51 }
 0x41d   :  { %v1862_v15 = vpop.permute.xlu1 %1861 }
 0x41e   :  { %v4834_v46 = vadd.f32 %v1862_v15, %v1808_v25  ;;  %v2009_v15 = vadd.s32 4294967288, %v2004_v56  ;;  %v4865_v23 = vsub.s32 %v2004_v56, %v4453_v0 }
 0x420   :  { %1977 = vperm.xlu1 %3547, %v4834_v46   ;;  %1980 = vperm.xlu0 %3546, %v4832_v48   ;;  %v4862_v61 = vsub.s32 %v2009_v15, %v4453_v0 }
 0x421   :  { %v1873_v18 = vpop.permute.xlu1 %1872 }
 0x422   :  { %v4840_v5 = vadd.f32 %v1873_v18, %v1810_v19 }
 0x424   :  { %1983 = vperm.xlu1 %3547, %v4840_v5   ;;  %1986 = vperm.xlu0 %3546, %v4838_v22  }
 0x425   :  { %v1884_v34 = vpop.permute.xlu1 %1883 }
 0x426   :  { %v4846_v7 = vadd.f32 %v1884_v34, %v1812_v8 }
 0x428   :  { %1989 = vperm.xlu1 %3547, %v4846_v7   ;;  %1992 = vperm.xlu0 %3546, %v4844_v44  }
 0x429   :  { %v1895_v57 = vpop.permute.xlu1 %1894 }
 0x42a   :  { %v4852_v9 = vadd.f32 %v1895_v57, %v1814_v16 }
 0x42c   :  { %1995 = vperm.xlu1 %3547, %v4852_v9   ;;  %1998 = vperm.xlu0 %3546, %v4850_v30  }
 0x42d   :  { %v1906_v24 = vpop.permute.xlu1 %1905 }
 0x42e   :  { %v4857_v62 = vadd.f32 %v1906_v24, %v1816_v33 }
 0x430   :  { %2001 = vperm.xlu1 %3547, %v4857_v62  }
 0x483   :  { %v1957_v4 = vpop.permute.xlu0 %1956 }
 0x484   :  { %v2008_v38 = vrot.slane %v1957_v4, %v4865_v23 }
 0x487   :  { %v1960_v21 = vpop.permute.xlu1 %1959 }
 0x488   :  { %v2013_v34 = vrot.slane %v1960_v21, %v4862_v61 }
 0x48b   :  { %v1963_v1 = vpop.permute.xlu0 %1962 }
 0x48c   :  { %v2019_v26 = vrot.slane %v1963_v1, %v4865_v23  ;;  %v2015_v1 = vsel %vm2014_vm8, %v2013_v34, %v2008_v38 }
 0x48f   :  { %v1966_v10 = vpop.permute.xlu1 %1965 }
 0x490   :  { %v2023_v17 = vrot.slane %v1966_v10, %v4862_v61 }
 0x492   :  { %v2024_v33 = vsel %vm2014_vm8, %v2023_v17, %v2019_v26 }
 0x493   :  { %v1969_v47 = vpop.permute.xlu0 %1968 }
 0x494   :  { %v2028_v57 = vrot.slane %v1969_v47, %v4865_v23 }
 0x497   :  { %v1972_v27 = vpop.permute.xlu1 %1971 }
 0x498   :  { %v2032_v18 = vrot.slane %v1972_v27, %v4862_v61 }
 0x49a   :  { %v2033_v27 = vsel %vm2014_vm8, %v2032_v18, %v2028_v57 }
 0x49b   :  { %v1975_v39 = vpop.permute.xlu0 %1974 }
 0x49c   :  { %v2037_v24 = vrot.slane %v1975_v39, %v4865_v23 }
 0x49f   :  { %v1978_v43 = vpop.permute.xlu1 %1977  ;;  %v1981_v25 = vpop.permute.xlu0 %1980 }
 0x4a0   :  { %v2041_v16 = vrot.slane %v1978_v43, %v4862_v61  ;;  %v2046_v21 = vrot.slane %v1981_v25, %v4865_v23  ;;  %v2080_v43 = vsel %vm1232_vm0, %v2024_v33, %v2015_v1 }
 0x4a1   :  { %v2082_v17 = vsel %vm1234_vm1, %v2033_v27, %v2080_v43 }
 0x4a2   :  { %v2042_v51 = vsel %vm2014_vm8, %v2041_v16, %v2037_v24 }
 0x4a3   :  { %v1984_v6 = vpop.permute.xlu1 %1983  ;;  %v1987_v19 = vpop.permute.xlu0 %1986  ;;  %v2084_v34 = vsel %vm1236_vm2, %v2042_v51, %v2082_v17 }
 0x4a4   :  { %v2050_v0 = vrot.slane %v1984_v6, %v4862_v61  ;;  %v2055_v56 = vrot.slane %v1987_v19, %v4865_v23 }
 0x4a6   :  { %v2051_v15 = vsel %vm2014_vm8, %v2050_v0, %v2046_v21 }
 0x4a7   :  { %v1990_v35 = vpop.permute.xlu1 %1989  ;;  %v1993_v8 = vpop.permute.xlu0 %1992  ;;  %v2086_v26 = vsel %vm1238_vm3, %v2051_v15, %v2084_v34 }
 0x4a8   :  { %v2059_v10 = vrot.slane %v1990_v35, %v4862_v61  ;;  %v2064_v39 = vrot.slane %v1993_v8, %v4865_v23 }
 0x4aa   :  { %v2060_v25 = vsel %vm2014_vm8, %v2059_v10, %v2055_v56 }
 0x4ab   :  { %v1996_v4 = vpop.permute.xlu1 %1995  ;;  %v1999_v6 = vpop.permute.xlu0 %1998  ;;  %v2088_v16 = vsel %vm1240_vm4, %v2060_v25, %v2086_v26 }
 0x4ac   :  { %v2068_v47 = vrot.slane %v1996_v4, %v4862_v61  ;;  %v2073_v19 = vrot.slane %v1999_v6, %v4865_v23 }
 0x4ae   :  { %v2069_v35 = vsel %vm2014_vm8, %v2068_v47, %v2064_v39 }
 0x4af   :  { %v2002_v18 = vpop.permute.xlu1 %2001  ;;  %v2090_v57 = vsel %vm1242_vm5, %v2069_v35, %v2088_v16 }
 0x4b0   :  { %v2077_v38 = vrot.slane %v2002_v18, %v4862_v61 }
 0x4b2   :  { %v2078_v8 = vsel %vm2014_vm8, %v2077_v38, %v2073_v19 }
 0x4b3   :  { %v2092_v0 = vsel %vm1244_vm6, %v2078_v8, %v2090_v57 }
 0x4b4   :  { %v2095_v33 = vsel %vm2094_vm9, %v2092_v0, -inf }
 0x4b5   :  { %2096 = vmax.xlane.f32.xlu0 %v2095_v33 }
 0x542   :  { %v2097_v24 = vpop.xlane.xlu0 %2096 }
 0x543   :  { %v2102_v10 = vrot.slane %v2097_v24, %v4456_v59  ;;  %v2106_v21 = vrot.slane %v2097_v24, %v4459_v29  ;;  %v2118_v4 = vrot.slane %v2097_v24, %v4778_v60  ;;  %v4907_v15 = vrot.slane %v2097_v24, %v4800_v42 }
 0x544   :  { %v2110_v6 = vrot.slane %v2097_v24, %v4788_v53  ;;  %v2114_v35 = vrot.slane %v2097_v24, %v4803_v31 }
 0x545   :  { %v2139_v27 = vsub.f32 %v4813_v45, %v2102_v10  ;;  %v2140_v1 = vsub.f32 %v4811_v12, %v2102_v10  ;;  %v2141_v56 = vsub.f32 %v4817_v20, %v2106_v21  ;;  %v2147_v47 = vsub.f32 %v4832_v48, %v2118_v4 }
 0x546   :  { %v2142_v45 = vsub.f32 %v4819_v13, %v2106_v21  ;;  %v2153_v12 = vsub.f32 %v4850_v30, %v4907_v15  ;;  %v2143_v20 = vsub.f32 %v4823_v14, %v2110_v6  ;;  %v2144_v34 = vsub.f32 %v4826_v37, %v2110_v6 }
 0x547   :  { %v2155_v51 = vmul.f32 1.442695, %v2139_v27  ;;  %v2157_v43 = vmul.f32 1.442695, %v2140_v1  ;;  %v2159_v39 = vmul.f32 1.442695, %v2141_v56  ;;  %v2145_v14 = vsub.f32 %v4829_v54, %v2114_v35 }
 0x548   :  { %v2171_v17 = vmul.f32 1.442695, %v2147_v47  ;;  %v2161_v25 = vmul.f32 1.442695, %v2142_v45  ;;  %v2183_v18 = vmul.f32 1.442695, %v2153_v12  ;;  %v2146_v37 = vsub.f32 %v4834_v46, %v2114_v35 }
 0x549   :  { %3602 = vpow2.f32 %v2155_v51  ;;  %v2163_v13 = vmul.f32 1.442695, %v2143_v20  ;;  %v2165_v30 = vmul.f32 1.442695, %v2144_v34  ;;  %v2167_v16 = vmul.f32 1.442695, %v2145_v14 }
 0x54a   :  { %3604 = vpow2.f32 %v2157_v43  ;;  %v2122_v54 = vrot.slane %v2097_v24, %v4785_v52  ;;  %v2148_v0 = vsub.f32 %v4840_v5, %v2118_v4  ;;  %v2169_v33 = vmul.f32 1.442695, %v2146_v37 }
 0x54b   :  { %3606 = vpow2.f32 %v2159_v39  ;;  %v2126_v1 = vrot.slane %v2097_v24, %v4793_v55 }
 0x54c   :  { %3608 = vpow2.f32 %v2171_v17  ;;  %v2149_v46 = vsub.f32 %v4838_v22, %v2122_v54  ;;  %v2173_v27 = vmul.f32 1.442695, %v2148_v0  ;;  %v2150_v5 = vsub.f32 %v4846_v7, %v2122_v54 }
 0x54d   :  { %3610 = vpow2.f32 %v2161_v25  ;;  %v2151_v56 = vsub.f32 %v4844_v44, %v2126_v1  ;;  %v2152_v43 = vsub.f32 %v4852_v9, %v2126_v1  ;;  %v2154_v7 = vsub.f32 %v4857_v62, %v4907_v15 }
 0x54e   :  { %3612 = vpow2.f32 %v2183_v18  ;;  %v2175_v4 = vmul.f32 1.442695, %v2149_v46  ;;  %v2177_v22 = vmul.f32 1.442695, %v2150_v5 }
 0x54f   :  { %3614 = vpow2.f32 %v2163_v13  ;;  %v2179_v24 = vmul.f32 1.442695, %v2151_v56  ;;  %v2181_v6 = vmul.f32 1.442695, %v2152_v43  ;;  %v2185_v45 = vmul.f32 1.442695, %v2154_v7 }
 0x550   :  { %3616 = vpow2.f32 %v2165_v30 }
 0x551   :  { %3618 = vpow2.f32 %v2167_v16 }
 0x552   :  { %3620 = vpow2.f32 %v2169_v33 }
 0x553   :  { %v4914_v48 = vpop.eup %3602  ;;  %3622 = vpow2.f32 %v2173_v27 }
 0x554   :  { %2204 = vperm.xlu1 %3547, %v4914_v48   ;;  %v4919_v19 = vpop.eup %3604  ;;  %3624 = vpow2.f32 %v2175_v4 }
 0x555   :  { %v4923_v38 = vpop.eup %3606  ;;  %3626 = vpow2.f32 %v2177_v22 }
 0x556   :  { %v4925_v26 = vpop.eup %3608  ;;  %3628 = vpow2.f32 %v2179_v24 }
 0x557   :  { %2228 = vperm.xlu0 %3546, %v4925_v26   ;;  %v4930_v8 = vpop.eup %3610  ;;  %3630 = vpow2.f32 %v2181_v6 }
 0x558   :  { %2207 = vperm.xlu1 %3547, %v4919_v19   ;;  %v4933_v57 = vpop.eup %3612  ;;  %3632 = vpow2.f32 %v2185_v45 }
 0x559   :  { %v4938_v10 = vpop.eup %3614 }
 0x55a   :  { %v4942_v21 = vpop.eup %3616 }
 0x55b   :  { %2246 = vperm.xlu0 %3546, %v4933_v57   ;;  %v4947_v51 = vpop.eup %3618 }
 0x55c   :  { %2210 = vperm.xlu1 %3547, %v4923_v38   ;;  %v4951_v47 = vpop.eup %3620 }
 0x55d   :  { %v4955_v39 = vpop.eup %3622 }
 0x55e   :  { %v4960_v44 = vpop.eup %3624 }
 0x55f   :  { %v4963_v17 = vpop.eup %3626 }
 0x560   :  { %2213 = vperm.xlu1 %3547, %v4930_v8   ;;  %v4966_v9 = vpop.eup %3628 }
 0x561   :  { %v4969_v12 = vpop.eup %3630 }
 0x562   :  { %v4972_v62 = vpop.eup %3632 }
 0x564   :  { %2216 = vperm.xlu1 %3547, %v4938_v10  }
 0x568   :  { %2219 = vperm.xlu1 %3547, %v4942_v21  }
 0x56c   :  { %2222 = vperm.xlu1 %3547, %v4947_v51  }
 0x570   :  { %2225 = vperm.xlu1 %3547, %v4951_v47  }
 0x574   :  { %2231 = vperm.xlu1 %3547, %v4955_v39  }
 0x578   :  { %2234 = vperm.xlu1 %3547, %v4960_v44  }
 0x57c   :  { %2237 = vperm.xlu1 %3547, %v4963_v17  }
 0x580   :  { %2240 = vperm.xlu1 %3547, %v4966_v9  }
 0x584   :  { %2243 = vperm.xlu1 %3547, %v4969_v12  }
 0x588   :  { %2249 = vperm.xlu1 %3547, %v4972_v62  }
 0x5d3   :  { %v2205_v15 = vpop.permute.xlu1 %2204 }
 0x5d4   :  { %v2254_v22 = vrot.slane %v2205_v15, %v4865_v23 }
 0x5d6   :  { %v2229_v0 = vpop.permute.xlu0 %2228 }
 0x5d7   :  { %v2208_v20 = vpop.permute.xlu1 %2207  ;;  %v2290_v6 = vrot.slane %v2229_v0, %v4865_v23 }
 0x5d8   :  { %v2258_v27 = vrot.slane %v2208_v20, %v4862_v61 }
 0x5da   :  { %v2247_v15 = vpop.permute.xlu0 %2246 }
 0x5db   :  { %v2211_v25 = vpop.permute.xlu1 %2210 }
 0x5dc   :  { %v2263_v1 = vrot.slane %v2211_v25, %v4865_v23  ;;  %v2259_v25 = vsel %vm2014_vm8, %v2258_v27, %v2254_v22 }
 0x5df   :  { %v2214_v18 = vpop.permute.xlu1 %2213 }
 0x5e0   :  { %v2267_v54 = vrot.slane %v2214_v18, %v4862_v61 }
 0x5e2   :  { %v2268_v43 = vsel %vm2014_vm8, %v2267_v54, %v2263_v1 }
 0x5e3   :  { %v2217_v35 = vpop.permute.xlu1 %2216 }
 0x5e4   :  { %v2272_v4 = vrot.slane %v2217_v35, %v4865_v23 }
 0x5e7   :  { %v2220_v34 = vpop.permute.xlu1 %2219 }
 0x5e8   :  { %v2276_v33 = vrot.slane %v2220_v34, %v4862_v61 }
 0x5ea   :  { %v2277_v45 = vsel %vm2014_vm8, %v2276_v33, %v2272_v4 }
 0x5eb   :  { %v2223_v13 = vpop.permute.xlu1 %2222 }
 0x5ec   :  { %v2281_v24 = vrot.slane %v2223_v13, %v4865_v23 }
 0x5ef   :  { %v2226_v14 = vpop.permute.xlu1 %2225 }
 0x5f0   :  { %v2285_v5 = vrot.slane %v2226_v14, %v4862_v61  ;;  %v2323_v14 = vsel %vm1232_vm0, %v2268_v43, %v2259_v25 }
 0x5f2   :  { %v2286_v18 = vsel %vm2014_vm8, %v2285_v5, %v2281_v24  ;;  %v3556_v24 = vld [vmem:[#allocation14 + $0x4] ss:$8 sps:$4 sm:$0xff]  }
 0x5f3   :  { %v2232_v30 = vpop.permute.xlu1 %2231  ;;  %1591 = vmatprep.subr.bf16.mxu0 %v3556_v24 }
 0x5f4   :  { %v2294_v56 = vrot.slane %v2232_v30, %v4862_v61 }
 0x5f6   :  { %v2295_v13 = vsel %vm2014_vm8, %v2294_v56, %v2290_v6  ;;  %v3559_v6 = vld [vmem:[#allocation14 + $0x14] ss:$8 sps:$4 sm:$0xff]  }
 0x5f7   :  { %v2235_v37 = vpop.permute.xlu1 %2234 }
 0x5f8   :  { %v2299_v35 = vrot.slane %v2235_v37, %v4865_v23  ;;  %v2317_v37 = vrot.slane %v2247_v15, %v4865_v23 }
 0x5fb   :  { %v2238_v16 = vpop.permute.xlu1 %2237 }
 0x5fc   :  { %v2303_v7 = vrot.slane %v2238_v16, %v4862_v61  ;;  %v2324_v16 = vsel %vm1234_vm1, %v2277_v45, %v2323_v14  ;;  %v3561_v45 = vld [vmem:[#allocation14 + $0x10] ss:$8 sps:$4 sm:$0xff]  }
 0x5fd   :  { %v2325_v27 = vsel %vm1236_vm2, %v2286_v18, %v2324_v16 }
 0x5fe   :  { %v2304_v54 = vsel %vm2014_vm8, %v2303_v7, %v2299_v35  ;;  %v2326_v5 = vsel %vm1238_vm3, %v2295_v13, %v2325_v27  ;;  %v3558_v7 = vld [vmem:[#allocation14] ss:$8 sps:$4 sm:$0xff]  }
 0x5ff   :  { %v2241_v46 = vpop.permute.xlu1 %2240  ;;  %v2327_v4 = vsel %vm1240_vm4, %v2304_v54, %v2326_v5  ;;  %1592 = vmatpush1.bf16.msra.mxu0 %v3558_v7  ;;  %v3564_v5 = vld [vmem:[#allocation18 + $0xc8] sm:$0xff]  }
 0x600   :  { %v2308_v30 = vrot.slane %v2241_v46, %v4865_v23  ;;  %1593 = vmatprep.subr.bf16.mxu0 %v3559_v6 }
 0x603   :  { %v2244_v20 = vpop.permute.xlu1 %2243  ;;  %1594 = vmatpush1.bf16.msra.mxu0 %v3561_v45 }
 0x604   :  { %v2312_v34 = vrot.slane %v2244_v20, %v4862_v61 }
 0x606   :  { %v2313_v33 = vsel %vm2014_vm8, %v2312_v34, %v2308_v30  ;;  %3325 = vmatmul.mubr.msk.bf16.vlgmr.msra.gmra.mrb[0].mxu0 %vm1566_vm7, %v4690_v63 }
 0x607   :  { %v2250_v0 = vpop.permute.xlu1 %2249  ;;  %v2328_v46 = vsel %vm1242_vm5, %v2313_v33, %v2327_v4  ;;  %1633 = vmatprep.mubr.bf16.mxu0 %v3970_v50  ;;  %v3567_v4 = vld [vmem:[#allocation18 + $0x90] sm:$0xff]  }
 0x608   :  { %v2321_v1 = vrot.slane %v2250_v0, %v4862_v61 }
 0x60a   :  { %v2322_v56 = vsel %vm2014_vm8, %v2321_v1, %v2317_v37  ;;  %v3563_v1 = vld [vmem:[#allocation18 + $0x80] sm:$0xff]  }
 0x60b   :  { %v2329_v22 = vsel %vm1244_vm6, %v2322_v56, %v2328_v46 }
 0x60c   :  { %v2331_v43 = vsel %vm2094_vm9, %v2329_v22, 0.0 }
 0x60d   :  { %2332 = vadd.xlane.f32.xlu0 %v2331_v43 }
 0x60e   :  { %3326 = vmatmul.mubr.msk.bf16.gmra.mrb[4].mxu0 %vm1566_vm7, %v4683_v58 }
 0x60f   :  { %1643 = vmatprep.mubr.bf16.mxu0 %v3970_v50 }
 0x616   :  { %3327 = vmatmul.mubr.msk.bf16.gmra.mrb[8].mxu0 %vm1566_vm7, %v4698_v49 }
 0x617   :  { %1653 = vmatprep.mubr.bf16.mxu0 %v3970_v50 }
 0x61e   :  { %3328 = vmatmul.mubr.msk.bf16.gmra.mrb[12].mxu0 %vm1566_vm7, %v4712_v41 }
 0x61f   :  { %1663 = vmatprep.mubr.bf16.mxu0 %v3970_v50 }
 0x626   :  { %3329 = vmatmul.mubr.msk.bf16.gmra.mrb[16].mxu0 %vm1566_vm7, %v4720_v11 }
 0x627   :  { %1673 = vmatprep.mubr.bf16.mxu0 %v3970_v50 }
 0x62e   :  { %3330 = vmatmul.mubr.msk.bf16.gmra.mrb[20].mxu0 %vm1566_vm7, %v4725_v28 }
 0x62f   :  { %1683 = vmatprep.mubr.bf16.mxu0 %v3970_v50 }
 0x636   :  { %3331 = vmatmul.mubr.msk.bf16.gmra.mrb[24].mxu0 %vm1566_vm7, %v4732_v32 }
 0x637   :  { %1693 = vmatprep.mubr.bf16.mxu0 %v3970_v50 }
 0x63e   :  { %3332 = vmatmul.mubr.msk.bf16.gmra.mrb[28].mxu0 %vm1566_vm7, %v4765_v36 }
 0x69a   :  { %v2333_v58 = vpop.xlane.xlu0 %2332 }
 0x69b   :  { %v2354_v63 = vrot.slane %v2333_v58, %v4778_v60  ;;  %v2338_v49 = vrot.slane %v2333_v58, %v4456_v59  ;;  %v2366_v41 = vrot.slane %v2333_v58, %v4800_v42  ;;  %v2342_v11 = vrot.slane %v2333_v58, %v4459_v29 }
 0x69c   :  { %v2346_v25 = vrot.slane %v2333_v58, %v4788_v53  ;;  %v2350_v14 = vrot.slane %v2333_v58, %v4803_v31 }
 0x69d   :  { %3634 = vrcp.f32 %v2354_v63 }
 0x69e   :  { %3636 = vrcp.f32 %v2338_v49 }
 0x69f   :  { %3638 = vrcp.f32 %v2366_v41 }
 0x6a0   :  { %3640 = vrcp.f32 %v2342_v11 }
 0x6a1   :  { %3642 = vrcp.f32 %v2346_v25 }
 0x6a2   :  { %3644 = vrcp.f32 %v2350_v14 }
 0x6a7   :  { %v3635_v28 = vpop.eup %3634 }
 0x6a8   :  { %v3637_v32 = vpop.eup %3636  ;;  %v2388_v20 = vmul.f32 %v3635_v28, %v4925_v26 }
 0x6a9   :  { %v3639_v36 = vpop.eup %3638  ;;  %v2376_v18 = vmul.f32 %v3637_v32, %v4914_v48  ;;  %v2377_v34 = vmul.f32 %v3637_v32, %v4919_v19 }
 0x6aa   :  { %2446 = vperm.xlu0 %3546, %v2388_v20   ;;  %v2398_v35 = vmul.f32 %v3639_v36, %v4972_v62  ;;  %v3641_v15 = vpop.eup %3640  ;;  %v2358_v62 = vrot.slane %v2333_v58, %v4785_v52 }
 0x6ab   :  { %2422 = vperm.xlu1 %3547, %v2376_v18   ;;  %v2379_v13 = vmul.f32 %v3641_v15, %v4923_v38  ;;  %v2380_v26 = vmul.f32 %v3641_v15, %v4930_v8  ;;  %v3643_v30 = vpop.eup %3642  ;;  %v2362_v38 = vrot.slane %v2333_v58, %v4793_v55  ;;  %v2389_v8 = vmul.f32 %v3635_v28, %v4955_v39 }
 0x6ac   :  { %v2382_v48 = vmul.f32 %v3643_v30, %v4938_v10  ;;  %v2383_v19 = vmul.f32 %v3643_v30, %v4942_v21  ;;  %v3645_v16 = vpop.eup %3644  ;;  %3646 = vrcp.f32 %v2358_v62  ;;  %v2400_v39 = vsel %vm2399_vm10, 1, %v3970_v50 }
 0x6ad   :  { %v2385_v54 = vmul.f32 %v3645_v16, %v4947_v51  ;;  %v2386_v0 = vmul.f32 %v3645_v16, %v4951_v47  ;;  %3648 = vrcp.f32 %v2362_v38  ;;  %v2397_v47 = vmul.f32 %v3639_v36, %v4933_v57  ;;  %v3569_v57 = vld [vmem:[#allocation18 + $0x98] sm:$0xff]  }
 0x6ae   :  { %2467 = vperm.xlu0 %3546, %v2398_v35  }
 0x6af   :  { %2425 = vperm.xlu1 %3547, %v2377_v34  }
 0x6b3   :  { %2428 = vperm.xlu1 %3547, %v2379_v13  }
 0x6b6   :  { %v3647_v10 = vpop.eup %3646 }
 0x6b7   :  { %2431 = vperm.xlu1 %3547, %v2380_v26   ;;  %v2391_v33 = vmul.f32 %v3647_v10, %v4960_v44  ;;  %v2392_v21 = vmul.f32 %v3647_v10, %v4963_v17  ;;  %v3649_v27 = vpop.eup %3648  ;;  %v3562_v44 = vld [vmem:[#allocation18 + $0xc0] sm:$0xff]   ;;  %v3565_v17 = vld [vmem:[#allocation18 + $0x88] sm:$0xff]  }
 0x6b8   :  { %v2394_v51 = vmul.f32 %v3649_v27, %v4966_v9  ;;  %v2395_v37 = vmul.f32 %v3649_v27, %v4969_v12  ;;  %3370 = vmatprep.subr.bf16.mxu1 %v3562_v44  ;;  %v3566_v9 = vld [vmem:[#allocation18 + $0xd0] sm:$0xff]   ;;  %v3568_v12 = vld [vmem:[#allocation18 + $0xd8] sm:$0xff]  }
 0x6b9   :  { %3371 = vmatpush3.bf16.msra.mxu1 %v3563_v1 }
 0x6ba   :  { %3372 = vmatprep.subr.bf16.mxu1 %v3564_v5 }
 0x6bb   :  { %2434 = vperm.xlu1 %3547, %v2382_v48  }
 0x6bd   :  { %3373 = vmatpush3.bf16.msra.mxu1 %v3565_v17 }
 0x6be   :  { %3374 = vmatprep.subr.bf16.mxu1 %v3566_v9 }
 0x6bf   :  { %2437 = vperm.xlu1 %3547, %v2383_v19  }
 0x6c1   :  { %3375 = vmatpush3.bf16.msra.mxu1 %v3567_v4 }
 0x6c2   :  { %3376 = vmatprep.subr.bf16.mxu1 %v3568_v12 }
 0x6c3   :  { %2440 = vperm.xlu1 %3547, %v2385_v54  }
 0x6c5   :  { %3377 = vmatpush3.bf16.msra.mxu1 %v3569_v57 }
 0x6c7   :  { %2443 = vperm.xlu1 %3547, %v2386_v0  }
 0x6cb   :  { %2449 = vperm.xlu1 %3547, %v2389_v8  }
 0x6cf   :  { %2452 = vperm.xlu1 %3547, %v2391_v33  }
 0x6d3   :  { %2455 = vperm.xlu1 %3547, %v2392_v21  }
 0x6d7   :  { %2458 = vperm.xlu1 %3547, %v2394_v51  }
 0x6d9   :  { %v5056_v46 = vpop.f32.mrb[0].mxu0 }
 0x6da   :  { %v5058_v22 = vpop.f32.mrb[1].mxu0 }
 0x6db   :  { %2461 = vperm.xlu1 %3547, %v2395_v37   ;;  %v5060_v24 = vpop.f32.mrb[2].mxu0 }
 0x6dc   :  { %v5062_v7 = vpop.f32.mrb[3].mxu0 }
 0x6df   :  { %2464 = vperm.xlu1 %3547, %v2397_v47  }
 0x6e1   :  { %v5064_v45 = vpop.f32.mrb[4].mxu0 }
 0x6e2   :  { %v5066_v58 = vpop.f32.mrb[5].mxu0 }
 0x6e3   :  { %2402 = vperm.xlu1 %3547, %v2400_v39   ;;  %v5068_v49 = vpop.f32.mrb[6].mxu0 }
 0x6e4   :  { %v5070_v41 = vpop.f32.mrb[7].mxu0 }
 0x6e9   :  { %v5072_v28 = vpop.f32.mrb[8].mxu0 }
 0x6ea   :  { %v5074_v32 = vpop.f32.mrb[9].mxu0 }
 0x6eb   :  { %v5076_v25 = vpop.f32.mrb[10].mxu0 }
 0x6ec   :  { %v5078_v36 = vpop.f32.mrb[11].mxu0 }
 0x6f1   :  { %v5080_v35 = vpop.f32.mrb[12].mxu0 }
 0x6f2   :  { %v5082_v34 = vpop.f32.mrb[13].mxu0 }
 0x6f3   :  { %v5084_v14 = vpop.f32.mrb[14].mxu0 }
 0x6f4   :  { %v5086_v13 = vpop.f32.mrb[15].mxu0 }
 0x6f9   :  { %v5088_v30 = vpop.f32.mrb[16].mxu0 }
 0x6fa   :  { %v5091_v19 = vpop.f32.mrb[17].mxu0 }
 0x6fb   :  { %v5094_v38 = vpop.f32.mrb[18].mxu0 }
 0x6fc   :  { %v5099_v33 = vpop.f32.mrb[19].mxu0 }
 0x729   :  { %v2447_v48 = vpop.permute.xlu0 %2446 }
 0x72a   :  { %v2423_v40 = vpop.permute.xlu1 %2422  ;;  %v2508_v44 = vrot.slane %v2447_v48, %v4865_v23 }
 0x72b   :  { %v2472_v51 = vrot.slane %v2423_v40, %v4865_v23 }
 0x72d   :  { %v2468_v57 = vpop.permute.xlu0 %2467 }
 0x72e   :  { %v2426_v56 = vpop.permute.xlu1 %2425 }
 0x72f   :  { %v2476_v0 = vrot.slane %v2426_v56, %v4862_v61 }
 0x731   :  { %v2477_v17 = vsel %vm2014_vm8, %v2476_v0, %v2472_v51 }
 0x732   :  { %v2429_v50 = vpop.permute.xlu1 %2428 }
 0x733   :  { %v2481_v8 = vrot.slane %v2429_v50, %v4865_v23 }
 0x736   :  { %v2432_v43 = vpop.permute.xlu1 %2431 }
 0x737   :  { %v2485_v62 = vrot.slane %v2432_v43, %v4862_v61 }
 0x739   :  { %v2486_v37 = vsel %vm2014_vm8, %v2485_v62, %v2481_v8 }
 0x73a   :  { %v2435_v6 = vpop.permute.xlu1 %2434  ;;  %v2541_v40 = vsel %vm1232_vm0, %v2486_v37, %v2477_v17  ;;  %v3572_v37 = vld [vmem:[#allocation18 + $0xe8] sm:$0xff]  }
 0x73b   :  { %v2490_v21 = vrot.slane %v2435_v6, %v4865_v23 }
 0x73e   :  { %v2438_v63 = vpop.permute.xlu1 %2437 }
 0x73f   :  { %v2494_v16 = vrot.slane %v2438_v63, %v4862_v61 }
 0x741   :  { %v2495_v1 = vsel %vm2014_vm8, %v2494_v16, %v2490_v21  ;;  %v3571_v21 = vld [vmem:[#allocation18 + $0xa0] sm:$0xff]  }
 0x742   :  { %v2441_v11 = vpop.permute.xlu1 %2440  ;;  %v2542_v43 = vsel %vm1234_vm1, %v2495_v1, %v2541_v40  ;;  %v3576_v40 = vld [vmem:[#allocation18 + $0xf8] sm:$0xff]  }
 0x743   :  { %v2499_v47 = vrot.slane %v2441_v11, %v4865_v23 }
 0x746   :  { %v2444_v20 = vpop.permute.xlu1 %2443 }
 0x747   :  { %v2503_v10 = vrot.slane %v2444_v20, %v4862_v61 }
 0x749   :  { %v2504_v9 = vsel %vm2014_vm8, %v2503_v10, %v2499_v47 }
 0x74a   :  { %v2450_v18 = vpop.permute.xlu1 %2449  ;;  %v2543_v63 = vsel %vm1236_vm2, %v2504_v9, %v2542_v43  ;;  %v3575_v9 = vld [vmem:[#allocation18 + $0xb0] sm:$0xff]  }
 0x74b   :  { %v2512_v27 = vrot.slane %v2450_v18, %v4862_v61  ;;  %v2539_v18 = vrot.slane %v2468_v57, %v4862_v61 }
 0x74d   :  { %v2513_v56 = vsel %vm2014_vm8, %v2512_v27, %v2508_v44  ;;  %v5133_v27 = vpop.f32.mrb[20].mxu0  ;;  %v3573_v44 = vld [vmem:[#allocation18 + $0xa8] sm:$0xff]  }
 0x74e   :  { %v2453_v15 = vpop.permute.xlu1 %2452  ;;  %v5135_v51 = vpop.f32.mrb[21].mxu0 }
 0x74f   :  { %v2517_v4 = vrot.slane %v2453_v15, %v4865_v23 }
 0x752   :  { %v2456_v26 = vpop.permute.xlu1 %2455 }
 0x753   :  { %v2521_v39 = vrot.slane %v2456_v26, %v4862_v61  ;;  %v2544_v26 = vsel %vm1238_vm3, %v2513_v56, %v2543_v63 }
 0x755   :  { %v2522_v6 = vsel %vm2014_vm8, %v2521_v39, %v2517_v4  ;;  %v5139_v39 = vpop.f32.mrb[22].mxu0  ;;  %v1460_v4 = vld [vmem:[#allocation12] sm:$0x3] }
 0x756   :  { %v2459_v54 = vpop.permute.xlu1 %2458  ;;  %v2545_v48 = vsel %vm1240_vm4, %v2522_v6, %v2544_v26  ;;  %v5141_v1 = vpop.f32.mrb[23].mxu0  ;;  %v1465_v56 = vrot.slane %v1460_v4, %v4456_v59 }
 0x757   :  { %v2526_v50 = vrot.slane %v2459_v54, %v4865_v23 }
 0x75a   :  { %v2462_v5 = vpop.permute.xlu1 %2461 }
 0x75b   :  { %v2530_v12 = vrot.slane %v2462_v5, %v4862_v61  ;;  %v3570_v61 = vld [vmem:[#allocation18 + $0xe0] sm:$0xff]   ;;  %v3574_v5 = vld [vmem:[#allocation18 + $0xf0] sm:$0xff]  }
 0x75c   :  { %3378 = vmatprep.subr.bf16.mxu1 %v3570_v61  ;;  %v3583_v61 = vld [vmem:[#allocation18 + $0x10] sm:$0xff]  }
 0x75d   :  { %v2531_v20 = vsel %vm2014_vm8, %v2530_v12, %v2526_v50  ;;  %3379 = vmatpush3.bf16.msra.mxu1 %v3571_v21  ;;  %v5145_v12 = vpop.f32.mrb[24].mxu0  ;;  %v3586_v21 = vld [vmem:[#allocation18 + $0x60] sm:$0xff]  }
 0x75e   :  { %v2465_v11 = vpop.permute.xlu1 %2464  ;;  %v2546_v16 = vsel %vm1242_vm5, %v2531_v20, %v2545_v48  ;;  %3380 = vmatprep.subr.bf16.mxu1 %v3572_v37  ;;  %v5148_v57 = vpop.f32.mrb[25].mxu0  ;;  %v3587_v37 = vld [vmem:[#allocation18 + $0x20] sm:$0xff]  }
 0x75f   :  { %v2535_v15 = vrot.slane %v2465_v11, %v4865_v23  ;;  %v5153_v43 = vpop.f32.mrb[26].mxu0  ;;  %v1472_v11 = vadd.f32 %v1465_v56, %v5455_v3 }
 0x760   :  { %v5156_v63 = vpop.f32.mrb[27].mxu0 }
 0x761   :  { %v2540_v62 = vsel %vm2014_vm8, %v2539_v18, %v2535_v15  ;;  %3381 = vmatpush3.bf16.msra.mxu1 %v3573_v44  ;;  %v2830_v18 = vpack.c.bf16 %v1472_v11, %v1472_v11  ;;  %v5161_v26 = vpop.f32.mrb[28].mxu0  ;;  %v3589_v44 = vld [vmem:[#allocation18 + $0x28] sm:$0xff]  }
 0x762   :  { %v2547_v54 = vsel %vm1244_vm6, %v2540_v62, %v2546_v16  ;;  %v2403_v0 = vpop.permute.xlu1 %2402  ;;  %3382 = vmatprep.subr.bf16.mxu1 %v3574_v5  ;;  %v5163_v48 = vpop.f32.mrb[29].mxu0  ;;  %v3590_v5 = vld [vmem:[#allocation18 + $0x70] sm:$0xff]  }
 0x763   :  { %vm2404_vm11 = vcmp.eq.s32.totalorder %v2403_v0, 1  ;;  %v5167_v62 = vpop.f32.mrb[30].mxu0 }
 0x764   :  { %v5127_v8 = vsel %vm2404_vm11, 0.0, %v2547_v54  ;;  %v5169_v16 = vpop.f32.mrb[31].mxu0  ;;  %v3581_v54 = vld [vmem:[#allocation18 + $0x8] sm:$0xff]  }
 0x765   :  { %v2553_v10 = vrot.slane %v5127_v8, %v4456_v59  ;;  %v2564_v23 = vrot.slane %v5127_v8, %v4459_v29  ;;  %v2575_v47 = vrot.slane %v5127_v8, %v4788_v53  ;;  %v2586_v17 = vrot.slane %v5127_v8, %v4803_v31  ;;  %3383 = vmatpush3.bf16.msra.mxu1 %v3575_v9  ;;  %v3577_v31 = vld [vmem:[#allocation18 + $0xb8] sm:$0xff]  }
 0x766   :  { %v1469_v53 = vrot.slane %v1460_v4, %v4459_v29  ;;  %v2597_v50 = vrot.slane %v5127_v8, %v4778_v60  ;;  %3384 = vmatprep.subr.bf16.mxu1 %v3576_v40  ;;  %v2608_v15 = vrot.slane %v5127_v8, %v4785_v52  ;;  %v3578_v60 = vld [vmem:[#allocation18 + $0x40] sm:$0xff]   ;;  %v2619_v3 = vrot.slane %v5127_v8, %v4793_v55  ;;  %v3580_v52 = vld [vmem:[#allocation18 + $0x48] sm:$0xff]   ;;  %v3584_v55 = vld [vmem:[#allocation18 + $0x58] sm:$0xff]  }
 0x767   :  { %2559 = vbcast.lane.b32.xlu1 %v2553_v10, 264  ;;  %2555 = vbcast.lane.b32.xlu0 %v2553_v10, 256  ;;  %v2630_v0 = vrot.slane %v5127_v8, %v4800_v42  ;;  %v3582_v10 = vld [vmem:[#allocation18 + $0x50] sm:$0xff]   ;;  %v3592_v8 = vld [vmem:[#allocation18 + $0x78] sm:$0xff]  }
 0x768   :  { %v1473_v6 = vadd.f32 %v1469_v53, %v5457_v2  ;;  %v3579_v2 = vld [vmem:[#allocation18] sm:$0xff]   ;;  %v3591_v42 = vld [vmem:[#allocation18 + $0x30] sm:$0xff]   ;;  %v1494_v9 = vld [vmem:[#allocation15] sm:$0x3] }
 0x769   :  { %3385 = vmatpush3.bf16.msra.mxu1 %v3577_v31  ;;  %v5174_v4 = vrot.slane %v1494_v9, %v4456_v59  ;;  %v5177_v53 = vrot.slane %v1494_v9, %v4459_v29 }
 0x76a   :  { %v2831_v20 = vpack.c.bf16 %v1473_v6, %v1473_v6  ;;  %3392 = vmatprep.subr.bf16.mxu1 %v3578_v60 }
 0x76b   :  { %2570 = vbcast.lane.b32.xlu1 %v2564_v23, 264  ;;  %2566 = vbcast.lane.b32.xlu0 %v2564_v23, 256  ;;  %v3585_v23 = vld [vmem:[#allocation18 + $0x18] sm:$0xff]   ;;  %v1626_v40 = vadd.f32 %v5056_v46, %v5174_v4  ;;  %v1628_v56 = vadd.f32 %v5058_v22, %v5177_v53  ;;  %v1632_v31 = vadd.f32 %v5062_v7, %v5177_v53 }
 0x76c   :  { %2992 = vmatprep.mubr.bf16.mxu1 %v2831_v20  ;;  %v1636_v6 = vadd.f32 %v5064_v45, %v5174_v4  ;;  %v1638_v59 = vadd.f32 %v5066_v58, %v5177_v53  ;;  %v1640_v29 = vadd.f32 %v5068_v49, %v5174_v4  ;;  %v1642_v46 = vadd.f32 %v5070_v41, %v5177_v53 }
 0x76d   :  { %2993 = vmatmul.mubr.bf16.vlgmr.msra.gmra.mrb[0].mxu1 %v2830_v18  ;;  %v1646_v22 = vadd.f32 %v5072_v28, %v5174_v4  ;;  %v1650_v7 = vadd.f32 %v5076_v25, %v5174_v4  ;;  %v1652_v45 = vadd.f32 %v5078_v36, %v5177_v53  ;;  %v5205_v58 = vadd.f32 %v5080_v35, %v5174_v4 }
 0x76e   :  { %3393 = vmatpush3.bf16.msra.mxu1 %v3579_v2  ;;  %v5209_v49 = vadd.f32 %v5082_v34, %v5177_v53  ;;  %v1660_v25 = vadd.f32 %v5084_v14, %v5174_v4  ;;  %v1662_v36 = vadd.f32 %v5086_v13, %v5177_v53  ;;  %v5217_v35 = vadd.f32 %v5088_v30, %v5174_v4 }
 0x76f   :  { %2581 = vbcast.lane.b32.xlu1 %v2575_v47, 264  ;;  %2577 = vbcast.lane.b32.xlu0 %v2575_v47, 256  ;;  %v3588_v47 = vld [vmem:[#allocation18 + $0x68] sm:$0xff]   ;;  %v5221_v34 = vadd.f32 %v5091_v19, %v5177_v53  ;;  %v5229_v60 = vadd.f32 %v5099_v33, %v5177_v53  ;;  %v5233_v30 = vadd.f32 %v5133_v27, %v5174_v4 }
 0x770   :  { %3394 = vmatprep.subr.bf16.mxu1 %v3580_v52  ;;  %v5237_v19 = vadd.f32 %v5135_v51, %v5177_v53  ;;  %v5245_v33 = vadd.f32 %v5141_v1, %v5177_v53  ;;  %v5249_v27 = vadd.f32 %v5145_v12, %v5174_v4  ;;  %v5253_v51 = vadd.f32 %v5148_v57, %v5177_v53 }
 0x771   :  { %v5257_v1 = vadd.f32 %v5153_v43, %v5174_v4  ;;  %v5265_v12 = vadd.f32 %v5161_v26, %v5174_v4  ;;  %v5269_v57 = vadd.f32 %v5163_v48, %v5177_v53  ;;  %v5277_v26 = vadd.f32 %v5169_v16, %v5177_v53 }
 0x772   :  { %3395 = vmatpush3.bf16.msra.mxu1 %v3581_v54 }
 0x773   :  { %2592 = vbcast.lane.b32.xlu1 %v2586_v17, 264  ;;  %2588 = vbcast.lane.b32.xlu0 %v2586_v17, 256  ;;  %v3593_v17 = vld [vmem:[#allocation18 + $0x38] sm:$0xff]  }
 0x774   :  { %3396 = vmatprep.subr.bf16.mxu1 %v3582_v10 }
 0x776   :  { %3397 = vmatpush3.bf16.msra.mxu1 %v3583_v61 }
 0x777   :  { %2603 = vbcast.lane.b32.xlu1 %v2597_v50, 264  ;;  %2599 = vbcast.lane.b32.xlu0 %v2597_v50, 256  ;;  %v1630_v50 = vadd.f32 %v5060_v24, %v5174_v4  ;;  %v1648_v24 = vadd.f32 %v5074_v32, %v5177_v53 }
 0x778   :  { %3398 = vmatprep.subr.bf16.mxu1 %v3584_v55 }
 0x77a   :  { %3399 = vmatpush3.bf16.msra.mxu1 %v3585_v23 }
 0x77b   :  { %2614 = vbcast.lane.b32.xlu1 %v2608_v15, 264  ;;  %2610 = vbcast.lane.b32.xlu0 %v2608_v15, 256  ;;  %v5225_v15 = vadd.f32 %v5094_v38, %v5174_v4  ;;  %v5241_v38 = vadd.f32 %v5139_v39, %v5174_v4 }
 0x77c   :  { %3400 = vmatprep.subr.bf16.mxu1 %v3586_v21  ;;  %v5261_v21 = vadd.f32 %v5156_v63, %v5177_v53 }
 0x77e   :  { %3401 = vmatpush3.bf16.msra.mxu1 %v3587_v37 }
 0x77f   :  { %2625 = vbcast.lane.b32.xlu1 %v2619_v3, 264  ;;  %2621 = vbcast.lane.b32.xlu0 %v2619_v3, 256 }
 0x780   :  { %3402 = vmatprep.subr.bf16.mxu1 %v3588_v47 }
 0x782   :  { %3403 = vmatpush3.bf16.msra.mxu1 %v3589_v44 }
 0x783   :  { %2636 = vbcast.lane.b32.xlu1 %v2630_v0, 264  ;;  %2632 = vbcast.lane.b32.xlu0 %v2630_v0, 256 }
 0x784   :  { %3404 = vmatprep.subr.bf16.mxu1 %v3590_v5 }
 0x786   :  { %3405 = vmatpush3.bf16.msra.mxu1 %v3591_v42 }
 0x787   :  { %3406 = vmatprep.subr.bf16.mxu1 %v3592_v8 }
 0x78a   :  { %3407 = vmatpush3.bf16.msra.mxu1 %v3593_v17 }
 0x7d9   :  { %v2560_v41 = vpop.permute.xlu1 %2559  ;;  %v2556_v11 = vpop.permute.xlu0 %2555 }
 0x7da   :  { %v2640_v28 = vmul.f32 %v2560_v41, %v1630_v50  ;;  %v2641_v20 = vmul.f32 %v2560_v41, %v1632_v31  ;;  %v2638_v18 = vmul.f32 %v2556_v11, %v1626_v40  ;;  %v2639_v32 = vmul.f32 %v2556_v11, %v1628_v56 }
 0x7dc   :  { %v2670_v14 = vadd.f32 %v2640_v28, %v2638_v18  ;;  %v2677_v2 = vadd.f32 %v2641_v20, %v2639_v32 }
 0x7dd   :  { %v2571_v3 = vpop.permute.xlu1 %2570  ;;  %v2567_v13 = vpop.permute.xlu0 %2566 }
 0x7de   :  { %v2671_v52 = vrot.slane %v2670_v14, 4  ;;  %v2678_v54 = vrot.slane %v2677_v2, 4  ;;  %v2644_v0 = vmul.f32 %v2571_v3, %v1640_v29  ;;  %v2645_v10 = vmul.f32 %v2571_v3, %v1642_v46 }
 0x7df   :  { %v2642_v61 = vmul.f32 %v2567_v13, %v1636_v6  ;;  %v2643_v55 = vmul.f32 %v2567_v13, %v1638_v59  ;;  %v5273_v6 = vadd.f32 %v5167_v62, %v5174_v4 }
 0x7e0   :  { %v2672_v39 = vadd.f32 %v2671_v52, %v2670_v14  ;;  %v2679_v23 = vadd.f32 %v2678_v54, %v2677_v2 }
 0x7e1   :  { %v2684_v37 = vadd.f32 %v2644_v0, %v2642_v61  ;;  %v2691_v47 = vadd.f32 %v2645_v10, %v2643_v55  ;;  %v2582_v44 = vpop.permute.xlu1 %2581  ;;  %v2578_v5 = vpop.permute.xlu0 %2577 }
 0x7e2   :  { %v2673_v42 = vrot.slane %v2672_v39, 2  ;;  %v2680_v8 = vrot.slane %v2679_v23, 2  ;;  %v2648_v43 = vmul.f32 %v2582_v44, %v1650_v7  ;;  %v2649_v17 = vmul.f32 %v2582_v44, %v1652_v45 }
 0x7e3   :  { %v2685_v9 = vrot.slane %v2684_v37, 4  ;;  %v2692_v40 = vrot.slane %v2691_v47, 4  ;;  %v2646_v63 = vmul.f32 %v2578_v5, %v1646_v22  ;;  %v2647_v56 = vmul.f32 %v2578_v5, %v1648_v24 }
 0x7e4   :  { %v2674_v50 = vadd.f32 %v2673_v42, %v2672_v39  ;;  %v2681_v31 = vadd.f32 %v2680_v8, %v2679_v23 }
 0x7e5   :  { %v2686_v48 = vadd.f32 %v2685_v9, %v2684_v37  ;;  %v2693_v59 = vadd.f32 %v2692_v40, %v2691_v47  ;;  %v2698_v29 = vadd.f32 %v2648_v43, %v2646_v63  ;;  %v2705_v46 = vadd.f32 %v2649_v17, %v2647_v56  ;;  %v2593_v7 = vpop.permute.xlu1 %2592  ;;  %v2589_v45 = vpop.permute.xlu0 %2588 }
 0x7e6   :  { %v2675_v41 = vrot.slane %v2674_v50, 1  ;;  %v2682_v11 = vrot.slane %v2681_v31, 1  ;;  %v2652_v22 = vmul.f32 %v2593_v7, %v1660_v25  ;;  %v2653_v24 = vmul.f32 %v2593_v7, %v1662_v36 }
 0x7e7   :  { %v2687_v28 = vrot.slane %v2686_v48, 2  ;;  %v2694_v20 = vrot.slane %v2693_v59, 2  ;;  %v2699_v18 = vrot.slane %v2698_v29, 4  ;;  %v2706_v32 = vrot.slane %v2705_v46, 4 }
 0x7e8   :  { %v2676_v62 = vadd.f32 %v2675_v41, %v2674_v50  ;;  %v2683_v4 = vadd.f32 %v2682_v11, %v2681_v31  ;;  %v2650_v14 = vmul.f32 %v2589_v45, %v5205_v58  ;;  %v2651_v16 = vmul.f32 %v2589_v45, %v5209_v49 }
 0x7e9   :  { %v2688_v53 = vadd.f32 %v2687_v28, %v2686_v48  ;;  %v2695_v2 = vadd.f32 %v2694_v20, %v2693_v59  ;;  %v2700_v3 = vadd.f32 %v2699_v18, %v2698_v29  ;;  %v2707_v13 = vadd.f32 %v2706_v32, %v2705_v46  ;;  %v2604_v52 = vpop.permute.xlu1 %2603  ;;  %v2600_v54 = vpop.permute.xlu0 %2599 }
 0x7ea   :  { %v2782_v0 = vpack.c.bf16 %v2676_v62, %v2676_v62  ;;  %v2783_v10 = vpack.c.bf16 %v2683_v4, %v2683_v4  ;;  %v2712_v25 = vadd.f32 %v2652_v22, %v2650_v14  ;;  %v2719_v36 = vadd.f32 %v2653_v24, %v2651_v16 }
 0x7eb   :  { %v2689_v61 = vrot.slane %v2688_v53, 1  ;;  %v2696_v55 = vrot.slane %v2695_v2, 1  ;;  %v2701_v39 = vrot.slane %v2700_v3, 2  ;;  %v2708_v23 = vrot.slane %v2707_v13, 2 }
 0x7ec   :  { %v3016_v37 = vunpack.c.l.b16 %v2782_v0  ;;  %v5281_v47 = vunpack.c.l.b16 %v2783_v10  ;;  %v2713_v58 = vrot.slane %v2712_v25, 4  ;;  %v2720_v44 = vrot.slane %v2719_v36, 4 }
 0x7ed   :  { %v2690_v49 = vadd.f32 %v2689_v61, %v2688_v53  ;;  %v2697_v5 = vadd.f32 %v2696_v55, %v2695_v2  ;;  %v2702_v42 = vadd.f32 %v2701_v39, %v2700_v3  ;;  %v2709_v8 = vadd.f32 %v2708_v23, %v2707_v13  ;;  %v2615_v43 = vpop.permute.xlu1 %2614  ;;  %v2611_v17 = vpop.permute.xlu0 %2610 }
 0x7ee   :  { %v2714_v9 = vadd.f32 %v2713_v58, %v2712_v25  ;;  %v2721_v40 = vadd.f32 %v2720_v44, %v2719_v36  ;;  %v2656_v63 = vmul.f32 %v2604_v52, %v5225_v15  ;;  %v2657_v56 = vmul.f32 %v2604_v52, %v5229_v60 }
 0x7ef   :  { %v2784_v50 = vpack.c.bf16 %v2690_v49, %v2690_v49  ;;  %v2785_v31 = vpack.c.bf16 %v2697_v5, %v2697_v5  ;;  %v2703_v48 = vrot.slane %v2702_v42, 1  ;;  %v2710_v59 = vrot.slane %v2709_v8, 1 }
 0x7f0   :  { %v2715_v29 = vrot.slane %v2714_v9, 2  ;;  %v2722_v46 = vrot.slane %v2721_v40, 2  ;;  %v2654_v7 = vmul.f32 %v2600_v54, %v5217_v35  ;;  %v2655_v45 = vmul.f32 %v2600_v54, %v5221_v34 }
 0x7f1   :  { %v3018_v41 = vunpack.c.l.b16 %v2784_v50  ;;  %v5287_v11 = vunpack.c.l.b16 %v2785_v31  ;;  %v2704_v22 = vadd.f32 %v2703_v48, %v2702_v42  ;;  %v2711_v24 = vadd.f32 %v2710_v59, %v2709_v8  ;;  %v2626_v28 = vpop.permute.xlu1 %2625  ;;  %v2622_v35 = vpop.permute.xlu0 %2621 }
 0x7f2   :  { %v2716_v20 = vadd.f32 %v2715_v29, %v2714_v9  ;;  %v2723_v15 = vadd.f32 %v2722_v46, %v2721_v40  ;;  %v2726_v18 = vadd.f32 %v2656_v63, %v2654_v7  ;;  %v2733_v60 = vadd.f32 %v2657_v56, %v2655_v45 }
 0x7f3   :  { %v5290_v32 = vsel %vm1232_vm0, %v3018_v41, %v3016_v37  ;;  %v2786_v62 = vpack.c.bf16 %v2704_v22, %v2704_v22  ;;  %v2787_v4 = vpack.c.bf16 %v2711_v24, %v2711_v24  ;;  %v2660_v14 = vmul.f32 %v2615_v43, %v5241_v38 }
 0x7f4   :  { %v2717_v16 = vrot.slane %v2716_v20, 1  ;;  %v2724_v34 = vrot.slane %v2723_v15, 1  ;;  %v2727_v53 = vrot.slane %v2726_v18, 4  ;;  %v2734_v2 = vrot.slane %v2733_v60, 4 }
 0x7f5   :  { %v5293_v3 = vunpack.c.l.b16 %v2786_v62  ;;  %v5295_v13 = vunpack.c.l.b16 %v2787_v4  ;;  %v2661_v52 = vmul.f32 %v2615_v43, %v5245_v33  ;;  %v2658_v54 = vmul.f32 %v2611_v17, %v5233_v30  ;;  %v2637_v23 = vpop.permute.xlu1 %2636  ;;  %v2633_v8 = vpop.permute.xlu0 %2632 }
 0x7f6   :  { %v2718_v0 = vadd.f32 %v2717_v16, %v2716_v20  ;;  %v2725_v10 = vadd.f32 %v2724_v34, %v2723_v15  ;;  %v2728_v25 = vadd.f32 %v2727_v53, %v2726_v18  ;;  %v2735_v36 = vadd.f32 %v2734_v2, %v2733_v60 }
 0x7f7   :  { %v2659_v61 = vmul.f32 %v2611_v17, %v5237_v19  ;;  %v2740_v38 = vadd.f32 %v2660_v14, %v2658_v54  ;;  %v2664_v55 = vmul.f32 %v2626_v28, %v5257_v1  ;;  %v2665_v39 = vmul.f32 %v2626_v28, %v5261_v21 }
 0x7f8   :  { %v2788_v37 = vpack.c.bf16 %v2718_v0, %v2718_v0  ;;  %v2789_v58 = vpack.c.bf16 %v2725_v10, %v2725_v10  ;;  %v2729_v44 = vrot.slane %v2728_v25, 2  ;;  %v2736_v49 = vrot.slane %v2735_v36, 2 }
 0x7f9   :  { %v2741_v5 = vrot.slane %v2740_v38, 4  ;;  %v2747_v33 = vadd.f32 %v2661_v52, %v2659_v61  ;;  %v2662_v30 = vmul.f32 %v2622_v35, %v5249_v27  ;;  %v2663_v42 = vmul.f32 %v2622_v35, %v5253_v51 }
 0x7fa   :  { %v3022_v43 = vunpack.c.l.b16 %v2788_v37  ;;  %v2730_v9 = vadd.f32 %v2729_v44, %v2728_v25  ;;  %v2737_v19 = vadd.f32 %v2736_v49, %v2735_v36  ;;  %v2668_v17 = vmul.f32 %v2637_v23, %v5273_v6 }
 0x7fb   :  { %v2742_v1 = vadd.f32 %v2741_v5, %v2740_v38  ;;  %v2748_v40 = vrot.slane %v2747_v33, 4  ;;  %v2754_v21 = vadd.f32 %v2664_v55, %v2662_v30  ;;  %v2761_v63 = vadd.f32 %v2665_v39, %v2663_v42 }
 0x7fc   :  { %v2731_v56 = vrot.slane %v2730_v9, 1  ;;  %v2738_v50 = vrot.slane %v2737_v19, 1  ;;  %v2669_v31 = vmul.f32 %v2637_v23, %v5277_v26  ;;  %v2666_v48 = vmul.f32 %v2633_v8, %v5265_v12 }
 0x7fd   :  { %v2743_v59 = vrot.slane %v2742_v1, 2  ;;  %v2749_v27 = vadd.f32 %v2748_v40, %v2747_v33  ;;  %v2755_v29 = vrot.slane %v2754_v21, 4  ;;  %v2762_v51 = vrot.slane %v2761_v63, 4 }
 0x7fe   :  { %v2732_v46 = vadd.f32 %v2731_v56, %v2730_v9  ;;  %v2739_v7 = vadd.f32 %v2738_v50, %v2737_v19  ;;  %v2667_v45 = vmul.f32 %v2633_v8, %v5269_v57  ;;  %v2768_v41 = vadd.f32 %v2668_v17, %v2666_v48 }
 0x7ff   :  { %v2744_v6 = vadd.f32 %v2743_v59, %v2742_v1  ;;  %v2750_v22 = vrot.slane %v2749_v27, 2  ;;  %v2756_v24 = vadd.f32 %v2755_v29, %v2754_v21  ;;  %v2763_v28 = vadd.f32 %v2762_v51, %v2761_v63 }
 0x800   :  { %v2790_v20 = vpack.c.bf16 %v2732_v46, %v2732_v46  ;;  %v2769_v15 = vrot.slane %v2768_v41, 4  ;;  %v2775_v18 = vadd.f32 %v2669_v31, %v2667_v45  ;;  %v2791_v60 = vpack.c.bf16 %v2739_v7, %v2739_v7 }
 0x801   :  { %v2745_v26 = vrot.slane %v2744_v6, 1  ;;  %v2751_v62 = vadd.f32 %v2750_v22, %v2749_v27  ;;  %v2757_v12 = vrot.slane %v2756_v24, 2  ;;  %v2764_v4 = vrot.slane %v2763_v28, 2 }
 0x802   :  { %v3024_v14 = vunpack.c.l.b16 %v2790_v20  ;;  %v2770_v35 = vadd.f32 %v2769_v15, %v2768_v41  ;;  %v2776_v16 = vrot.slane %v2775_v18, 4  ;;  %v3023_v34 = vunpack.c.l.b16 %v2789_v58 }
 0x803   :  { %v2746_v53 = vadd.f32 %v2745_v26, %v2744_v6  ;;  %v2752_v2 = vrot.slane %v2751_v62, 1  ;;  %v2758_v57 = vadd.f32 %v2757_v12, %v2756_v24  ;;  %v2765_v52 = vadd.f32 %v2764_v4, %v2763_v28  ;;  %v3367_v26 = vld [vmem:[#allocation20] ss:$0 sm:$0xff] }
 0x804   :  { %v2771_v54 = vrot.slane %v2770_v35, 2  ;;  %v2777_v0 = vadd.f32 %v2776_v16, %v2775_v18  ;;  %v3025_v10 = vunpack.c.l.b16 %v2791_v60  ;;  %v3039_v25 = vsel %vm1232_vm0, %v5287_v11, %v5281_v47 }
 0x805   :  { %v2792_v36 = vpack.c.bf16 %v2746_v53, %v2746_v53  ;;  %v2759_v61 = vrot.slane %v2758_v57, 1  ;;  %v2766_v38 = vrot.slane %v2765_v52, 1  ;;  %v2753_v55 = vadd.f32 %v2752_v2, %v2751_v62 }
 0x806   :  { %v2772_v39 = vadd.f32 %v2771_v54, %v2770_v35  ;;  %v2778_v23 = vrot.slane %v2777_v0, 2  ;;  %v3040_v37 = vsel %vm1234_vm1, %v5295_v13, %v3039_v25  ;;  %v3033_v58 = vsel %vm1234_vm1, %v5293_v3, %v5290_v32 }
 0x807   :  { %v3026_v44 = vunpack.c.l.b16 %v2792_v36  ;;  %v2760_v49 = vadd.f32 %v2759_v61, %v2758_v57  ;;  %v2767_v5 = vadd.f32 %v2766_v38, %v2765_v52  ;;  %v2793_v33 = vpack.c.bf16 %v2753_v55, %v2753_v55 }
 0x808   :  { %v2773_v30 = vrot.slane %v2772_v39, 1  ;;  %v2779_v42 = vadd.f32 %v2778_v23, %v2777_v0  ;;  %v3041_v47 = vsel %vm1236_vm2, %v3023_v34, %v3040_v37  ;;  %v3034_v11 = vsel %vm1236_vm2, %v3022_v43, %v3033_v58 }
 0x809   :  { %v2794_v8 = vpack.c.bf16 %v2760_v49, %v2760_v49  ;;  %v2795_v9 = vpack.c.bf16 %v2767_v5, %v2767_v5  ;;  %v3027_v19 = vunpack.c.l.b16 %v2793_v33  ;;  %v3042_v17 = vsel %vm1238_vm3, %v3025_v10, %v3041_v47 }
 0x80a   :  { %v2774_v13 = vadd.f32 %v2773_v30, %v2772_v39  ;;  %v2780_v1 = vrot.slane %v2779_v42, 1  ;;  %v3035_v40 = vsel %vm1238_vm3, %v3024_v14, %v3034_v11 }
 0x80b   :  { %v3029_v32 = vunpack.c.l.b16 %v2795_v9  ;;  %v3043_v3 = vsel %vm1240_vm4, %v3027_v19, %v3042_v17  ;;  %v3028_v21 = vunpack.c.l.b16 %v2794_v8  ;;  %v3036_v63 = vsel %vm1240_vm4, %v3026_v44, %v3035_v40 }
 0x80c   :  { %v2796_v56 = vpack.c.bf16 %v2774_v13, %v2774_v13  ;;  %v2781_v50 = vadd.f32 %v2780_v1, %v2779_v42 }
 0x80d   :  { %v3044_v31 = vsel %vm1242_vm5, %v3029_v32, %v3043_v3  ;;  %v3037_v43 = vsel %vm1242_vm5, %v3028_v21, %v3036_v63 }
 0x80e   :  { %v3030_v48 = vunpack.c.l.b16 %v2796_v56  ;;  %v2797_v59 = vpack.c.bf16 %v2781_v50, %v2781_v50 }
 0x810   :  { %v3031_v27 = vunpack.c.l.b16 %v2797_v59  ;;  %v3038_v29 = vsel %vm1244_vm6, %v3030_v48, %v3037_v43 }
 0x811   :  { %v3046_v46 = vpack.c.b16 %v3038_v29, %v3038_v29 }
 0x812   :  { %v3045_v51 = vsel %vm1244_vm6, %v3031_v27, %v3044_v31 }
 0x813   :  { %v3047_v7 = vpack.c.b16 %v3045_v51, %v3045_v51 }
 0x815   :  { %3178 = vmatprep.mubr.bf16.mxu1 %v3047_v7 }
 0x816   :  { %3179 = vmatmul.mubr.bf16.vlgmr.msra.gmra.mrb[4].mxu1 %v3046_v46 }
 0x840   :  { %v3386_v45 = vpop.f32.mrb[0].mxu1 }
 0x841   :  { %v3387_v41 = vpop.f32.mrb[1].mxu1 }
 0x842   :  { %v3388_v6 = vadd.f32 %v3387_v41, %v3386_v45  ;;  %v3389_v22 = vpop.f32.mrb[2].mxu1 }
 0x843   :  { %v3390_v24 = vpop.f32.mrb[3].mxu1 }
 0x8e9   :  { %v3408_v28 = vpop.f32.mrb[4].mxu1 }
 0x8ea   :  { %v3409_v20 = vpop.f32.mrb[5].mxu1 }
 0x8eb   :  { %v3410_v15 = vadd.f32 %v3409_v20, %v3408_v28  ;;  %v3411_v18 = vpop.f32.mrb[6].mxu1 }
 0x8ec   :  { %v3412_v60 = vpop.f32.mrb[7].mxu1 }
 0x8ed   :  { %v3181_v62 = vadd.f32 %v3410_v15, %v3388_v6 }
 0x8ef   :  { %v3193_v12 = vadd.f32 %v3367_v26, %v3181_v62 }
 0x8f1   :  { %3194 = vst [vmem:[#allocation21] sm:$0xff] %v3193_v12 }
 0x8f2   :  { %3903 = shalt.err (!%p3900_p9)
}
 0x8f3   :  { %s3904_s9 = scalar_lea.hbm %s5351_s13, 128 }
 0x8f4   :  { %p3905_p10 = scmp.ne.s32.totalorder %s5351_s13, %s3904_s9  ;;  %p3908_p11 = scmp.lt.u32.totalorder %s3904_s9, %s5351_s13 }
 0x8f6   :  { %p3910_p12 = pnand %p3908_p11, %p3905_p10 }
 0x8f8   :  { %3913 = shalt.err (!%p3910_p12)
}
 0x8f9   :  { %3204 = dma.vmem_to_hbm [thread:$0]  %s3202_s14, 128, %s5351_s13, [#allocation5]  }
 0x8fa   :  { %3938 = dma.done.wait [#allocation5], 128  }
 0x8fb   :  { %3939 = vsyncadd [#allocation5], 4294967168 }
 0x8fc   :  { %3208 = vsyncpa [#allocation4], 1 }
 0x8fd   :  { %3209 = vsyncpa [#allocation7], 1 }
 0x8fe   :  { %3210 = vsyncpa [#allocation10], 1 }
 0x8ff   :  { %3211 = vsyncpa [#allocation13], 1 }
 0x900   :  { %3212 = vsyncpa [#allocation16], 1 }
 0x901   :  { %3213 = vsyncpa [#allocation19], 1 }
 0x902   :  { %3214 = vsyncpa [#allocation5], 1 }

</bundles_post_ra>
